<compile_context>
chip_gen: v7x
topology: tpu7x:2x2x1
jax: 0.10.0
libtpu: 0.0.40
codegen_flags: <defaults>
</compile_context>

<pallas_src>
import numpy as np
import jax
import jax.numpy as jnp
from jax import lax
from jax.experimental import pallas as pl
from jax.experimental.pallas import tpu as pltpu


def decoder_kernel(
    x_enc_ref,      # (B, Tm1, M)  f32
    y_prev_ref,     # (Tm1, B, 1)  f32
    w1_dc_ref,      # (2P, M)  attn Linear#1 rows acting on [d_n ; c_n]
    w1_x_ref,       # (M, M)   attn Linear#1 rows acting on X_encoded
    b1_ref,         # (1, M)
    w2_ref,         # (1, M)   attn Linear#2 weight as a row (bias dropped)
    w_gates_ref,    # (M+P, 4P)  [w_fc_ctx @ w_ih ; w_hh]  (fc folded into LSTM)
    w_y_gates_ref,  # (1, 4P)    w_fc_y * w_ih
    b_gates_ref,    # (1, 4P)    b_ih + b_hh + b_fc * w_ih
    w_ff_ref,       # (P+M, 1)   fc_final weight, rows ordered [d_n ; context]
    b_ff_ref,       # (1, 1)     SMEM scalar
    y_pred_ref,     # (B, 1)     output
):
    B, Tm1, M = x_enc_ref.shape
    P = w1_dc_ref.shape[0] // 2

    x_enc = x_enc_ref[...]
    w1_dc = w1_dc_ref[...]
    w2 = w2_ref[...]
    w_gates = w_gates_ref[...]
    w_y_gates = w_y_gates_ref[...]
    b_gates = b_gates_ref[...]

    # Loop-invariant piece of the attention pre-activation: X_encoded @ W1_x + b1
    xw = (jnp.dot(x_enc.reshape(B * Tm1, M), w1_x_ref[...],
                  preferred_element_type=jnp.float32)
          + b1_ref[...]).reshape(B, Tm1, M)

    def step(t, carry):
        d_n, c_n, _ = carry  # d_n, c_n: (B, P)

        # --- attention over the T-1 encoder timesteps ---------------------
        dc = jnp.dot(jnp.concatenate([d_n, c_n], axis=1), w1_dc,
                     preferred_element_type=jnp.float32)              # (B, M)
        h = jnp.tanh(xw + dc[:, None, :])                             # (B,Tm1,M)
        scores = jnp.sum(h * w2[None, :, :], axis=-1)                 # (B, Tm1)
        scores = scores - jnp.max(scores, axis=1, keepdims=True)
        e = jnp.exp(scores)
        beta = e * pl.reciprocal(jnp.sum(e, axis=1, keepdims=True),
                                 approx=True)                         # softmax
        context = jnp.sum(beta[:, :, None] * x_enc, axis=1)           # (B, M)

        # --- fc([context, y_t]) + one LSTM cell step, folded into a single
        # --- MXU push over [context ; d_n]  (gate order i, f, g, o) -------
        y_t = y_prev_ref[t]                                           # (B, 1)
        gates = (jnp.dot(jnp.concatenate([context, d_n], axis=1), w_gates,
                         preferred_element_type=jnp.float32)
                 + y_t * w_y_gates + b_gates)                         # (B, 4P)
        i_g = jax.nn.sigmoid(gates[:, 0 * P:1 * P])
        f_g = jax.nn.sigmoid(gates[:, 1 * P:2 * P])
        g_g = jnp.tanh(gates[:, 2 * P:3 * P])
        o_g = jax.nn.sigmoid(gates[:, 3 * P:4 * P])
        c_new = f_g * c_n + i_g * g_g
        d_new = o_g * jnp.tanh(c_new)
        return (d_new, c_new, context)

    d0 = jnp.zeros((B, P), jnp.float32)
    c0 = jnp.zeros((B, P), jnp.float32)
    ctx0 = jnp.zeros((B, M), jnp.float32)
    # Tm1 is a small static trip count: full unroll exposes the whole serial
    # chain to the LLO scheduler instead of hiding it inside a rolled loop.
    d_n, c_n, context = lax.fori_loop(0, Tm1, step, (d0, c0, ctx0), unroll=True)

    # y_pred = fc_final([d_n[0], context])
    y_pred_ref[...] = (
        jnp.dot(jnp.concatenate([d_n, context], axis=1), w_ff_ref[...],
                preferred_element_type=jnp.float32)
        + b_ff_ref[0, 0])


def make_params(key, T, P, M):
    ks = jax.random.split(key, 12)

    def rnd(k, shape, scale=0.1):
        return (scale * jax.random.normal(k, shape)).astype(jnp.float32)

    return dict(
        w_attn1=rnd(ks[0], (2 * P + M, M)),   # (in, out)
        b_attn1=rnd(ks[1], (1, M)),
        w_attn2=rnd(ks[2], (M, 1)),
        b_attn2=rnd(ks[3], (1, 1)),
        w_fc=rnd(ks[4], (M + 1, 1), 1.0),     # fc.weight.data.normal_() in torch
        b_fc=rnd(ks[5], (1, 1)),
        w_ih=rnd(ks[6], (1, 4 * P)),
        w_hh=rnd(ks[7], (P, 4 * P)),
        b_ih=rnd(ks[8], (1, 4 * P)),
        b_hh=rnd(ks[9], (1, 4 * P)),
        w_ff=rnd(ks[10], (P + M, 1)),
        b_ff=rnd(ks[11], (1, 1)),
    )


def decoder_forward_pallas(X_encoded, y_prev, params, P):
    B, Tm1, M = X_encoded.shape
    w1 = params["w_attn1"]            # (2P+M, M)
    w_fc = params["w_fc"]             # (M+1, 1)
    w_ih = params["w_ih"]             # (1, 4P)

    # Algebraic fold of fc([context, y_t]) into the LSTM input->hidden path
    # (rank-1 associativity; mathematically identical to the unfused form).
    w_ctx_gates = jnp.dot(w_fc[:M], w_ih)                               # (M, 4P)
    w_y_gates = w_fc[M:] * w_ih                                         # (1, 4P)
    b_gates = params["b_ih"] + params["b_hh"] + params["b_fc"] * w_ih   # (1, 4P)
    w_gates = jnp.concatenate([w_ctx_gates, params["w_hh"]], axis=0)    # (M+P,4P)

    args = (
        X_encoded,
        jnp.transpose(y_prev)[:, :, None],     # (Tm1, B, 1)
        w1[:2 * P],                            # (2P, M) fused [d ; c] rows
        w1[2 * P:],                            # (M, M)
        params["b_attn1"],                     # (1, M)
        jnp.transpose(params["w_attn2"]),      # (1, M); b_attn2 dropped (softmax-invariant)
        w_gates,
        w_y_gates,
        b_gates,
        params["w_ff"],                        # (P+M, 1)
        params["b_ff"],                        # (1, 1) -> SMEM
    )
    vmem = lambda: pl.BlockSpec(memory_space=pltpu.MemorySpace.VMEM)
    smem = lambda: pl.BlockSpec(memory_space=pltpu.MemorySpace.SMEM)
    in_specs = [vmem() for _ in range(len(args) - 1)] + [smem()]
    return pl.pallas_call(
        decoder_kernel,
        out_shape=jax.ShapeDtypeStruct((B, 1), jnp.float32),
        in_specs=in_specs,
        out_specs=vmem(),
    )(*args)


def decoder_forward_ref(X_encoded, y_prev, params, P):
    """Pure-JAX mirror of the PyTorch forward (concat-based), for verification."""
    B, Tm1, M = X_encoded.shape
    d_n = jnp.zeros((B, P), jnp.float32)
    c_n = jnp.zeros((B, P), jnp.float32)
    context = jnp.zeros((B, M), jnp.float32)
    w1, b1 = params["w_attn1"], params["b_attn1"][0]
    w2, b2 = params["w_attn2"], params["b_attn2"][0]
    w_fc, b_fc = params["w_fc"], params["b_fc"][0]
    w_ih, w_hh = params["w_ih"], params["w_hh"]
    b_l = (params["b_ih"] + params["b_hh"])[0]
    w_ff, b_ff = params["w_ff"], params["b_ff"][0]
    for t in range(Tm1):
        d_rep = jnp.broadcast_to(d_n[:, None, :], (B, Tm1, P))
        c_rep = jnp.broadcast_to(c_n[:, None, :], (B, Tm1, P))
        x = jnp.concatenate([d_rep, c_rep, X_encoded], axis=2).reshape(-1, 2 * P + M)
        scores = (jnp.tanh(x @ w1 + b1) @ w2 + b2).reshape(B, Tm1)
        beta = jax.nn.softmax(scores, axis=1)
        context = jnp.einsum("bt,btm->bm", beta, X_encoded)
        y_tilde = jnp.concatenate([context, y_prev[:, t:t + 1]], axis=1) @ w_fc + b_fc
        gates = y_tilde @ w_ih + d_n @ w_hh + b_l
        i_g = jax.nn.sigmoid(gates[:, 0:P])
        f_g = jax.nn.sigmoid(gates[:, P:2 * P])
        g_g = jnp.tanh(gates[:, 2 * P:3 * P])
        o_g = jax.nn.sigmoid(gates[:, 3 * P:4 * P])
        c_n = f_g * c_n + i_g * g_g
        d_n = o_g * jnp.tanh(c_n)
    return jnp.concatenate([d_n, context], axis=1) @ w_ff + b_ff


if __name__ == "__main__":
    # TODO(synk): lstm_layer.flatten_parameters() is a cuDNN-only no-op; nothing to port.
    T = 9    # -> T-1 = 8 decode steps / encoder timesteps
    B = 4    # batch
    M = 32   # encoder_num_hidden
    P = 32   # decoder_num_hidden

    key = jax.random.PRNGKey(0)
    kx, ky, kp = jax.random.split(key, 3)
    X_encoded = jax.random.normal(kx, (B, T - 1, M), dtype=jnp.float32)
    y_prev = jax.random.normal(ky, (B, T - 1), dtype=jnp.float32)
    params = make_params(kp, T, P, M)

    y_pred = jax.block_until_ready(decoder_forward_pallas(X_encoded, y_prev, params, P))

    y_ref = decoder_forward_ref(X_encoded, y_prev, params, P)
    # Slightly relaxed tolerance: the kernel uses the EUP approximate reciprocal
    # for the softmax normalization (pl.reciprocal(..., approx=True)).
    if not np.allclose(np.asarray(y_pred), np.asarray(y_ref), rtol=1e-3, atol=1e-3):
        raise AssertionError("Pallas kernel disagrees with JAX reference")
    print("KERNEL_OK")
</pallas_src>

<mosaic_0001>
module attributes {stable_mosaic.version = 11 : i64} {
  func.func @decoder_kernel(%arg0: memref<4x8x32xf32, #tpu.memory_space<vmem>>, %arg1: memref<8x4x1xf32, #tpu.memory_space<vmem>>, %arg2: memref<64x32xf32, #tpu.memory_space<vmem>>, %arg3: memref<32x32xf32, #tpu.memory_space<vmem>>, %arg4: memref<1x32xf32, #tpu.memory_space<vmem>>, %arg5: memref<1x32xf32, #tpu.memory_space<vmem>>, %arg6: memref<64x128xf32, #tpu.memory_space<vmem>>, %arg7: memref<1x128xf32, #tpu.memory_space<vmem>>, %arg8: memref<1x128xf32, #tpu.memory_space<vmem>>, %arg9: memref<64x1xf32, #tpu.memory_space<vmem>>, %arg10: memref<1x1xf32, #tpu.memory_space<smem>>, %arg11: memref<4x1xf32, #tpu.memory_space<vmem>>) attributes {dimension_semantics = [], scalar_prefetch = 0 : i64, scratch_operands = 0 : i64, tpu.core_type = #tpu.core_type<tc>} {
    %c0 = arith.constant 0 : index
    %c0_0 = arith.constant 0 : index
    %c0_1 = arith.constant 0 : index
    %0 = vector.load %arg0[%c0, %c0_0, %c0_1] : memref<4x8x32xf32, #tpu.memory_space<vmem>>, vector<4x8x32xf32>
    %c0_2 = arith.constant 0 : index
    %c0_3 = arith.constant 0 : index
    %1 = vector.load %arg2[%c0_2, %c0_3] : memref<64x32xf32, #tpu.memory_space<vmem>>, vector<64x32xf32>
    %c0_4 = arith.constant 0 : index
    %c0_5 = arith.constant 0 : index
    %2 = vector.load %arg5[%c0_4, %c0_5] : memref<1x32xf32, #tpu.memory_space<vmem>>, vector<1x32xf32>
    %c0_6 = arith.constant 0 : index
    %c0_7 = arith.constant 0 : index
    %3 = vector.load %arg6[%c0_6, %c0_7] : memref<64x128xf32, #tpu.memory_space<vmem>>, vector<64x128xf32>
    %c0_8 = arith.constant 0 : index
    %c0_9 = arith.constant 0 : index
    %4 = vector.load %arg7[%c0_8, %c0_9] : memref<1x128xf32, #tpu.memory_space<vmem>>, vector<1x128xf32>
    %c0_10 = arith.constant 0 : index
    %c0_11 = arith.constant 0 : index
    %5 = vector.load %arg8[%c0_10, %c0_11] : memref<1x128xf32, #tpu.memory_space<vmem>>, vector<1x128xf32>
    %6 = vector.shape_cast %0 : vector<4x8x32xf32> to vector<32x32xf32>
    %c0_12 = arith.constant 0 : index
    %c0_13 = arith.constant 0 : index
    %7 = vector.load %arg3[%c0_12, %c0_13] : memref<32x32xf32, #tpu.memory_space<vmem>>, vector<32x32xf32>
    %cst = arith.constant dense<0.000000e+00> : vector<32x32xf32>
    %8 = tpu.matmul %6, %7, %cst {dimension_numbers = #tpu.dot_dimension_numbers<[1], [0], [0], [1], [0, 0, 1, 1], [], []>} : vector<32x32xf32>, vector<32x32xf32>, vector<32x32xf32> -> vector<32x32xf32>
    %c0_14 = arith.constant 0 : index
    %c0_15 = arith.constant 0 : index
    %9 = vector.load %arg4[%c0_14, %c0_15] : memref<1x32xf32, #tpu.memory_space<vmem>>, vector<1x32xf32>
    %10 = vector.broadcast %9 : vector<1x32xf32> to vector<32x32xf32>
    %11 = arith.addf %8, %10 : vector<32x32xf32>
    %12 = vector.shape_cast %11 : vector<32x32xf32> to vector<4x8x32xf32>
    %cst_16 = arith.constant 0.000000e+00 : f32
    %13 = vector.broadcast %cst_16 : f32 to vector<4x32xf32>
    %cst_17 = arith.constant 0.000000e+00 : f32
    %14 = vector.broadcast %cst_17 : f32 to vector<4x32xf32>
    %cst_18 = arith.constant 0.000000e+00 : f32
    %15 = vector.broadcast %cst_18 : f32 to vector<4x32xf32>
    %c0_i32 = arith.constant 0 : i32
    %16 = tpu.concatenate %13, %14 in 1 : vector<4x32xf32>, vector<4x32xf32> -> vector<4x64xf32>
    %cst_19 = arith.constant dense<0.000000e+00> : vector<4x32xf32>
    %17 = tpu.matmul %16, %1, %cst_19 {dimension_numbers = #tpu.dot_dimension_numbers<[1], [0], [0], [1], [0, 0, 1, 1], [], []>} : vector<4x64xf32>, vector<64x32xf32>, vector<4x32xf32> -> vector<4x32xf32>
    %18 = vector.shape_cast %17 : vector<4x32xf32> to vector<4x1x32xf32>
    %19 = vector.broadcast %18 : vector<4x1x32xf32> to vector<4x8x32xf32>
    %20 = arith.addf %12, %19 : vector<4x8x32xf32>
    %21 = math.tanh %20 : vector<4x8x32xf32>
    %22 = vector.shape_cast %2 : vector<1x32xf32> to vector<1x1x32xf32>
    %23 = vector.broadcast %22 : vector<1x1x32xf32> to vector<4x8x32xf32>
    %24 = arith.mulf %21, %23 : vector<4x8x32xf32>
    %cst_20 = arith.constant dense<0.000000e+00> : vector<4x8xf32>
    %25 = vector.multi_reduction <add>, %24, %cst_20 [2] : vector<4x8x32xf32> to vector<4x8xf32>
    %cst_21 = arith.constant dense<0xFF800000> : vector<4xf32>
    %26 = vector.multi_reduction <maximumf>, %25, %cst_21 [1] : vector<4x8xf32> to vector<4xf32>
    %27 = vector.shape_cast %26 : vector<4xf32> to vector<4x1xf32>
    %28 = vector.broadcast %27 : vector<4x1xf32> to vector<4x8xf32>
    %29 = arith.subf %25, %28 : vector<4x8xf32>
    %30 = math.exp %29 : vector<4x8xf32>
    %cst_22 = arith.constant dense<0.000000e+00> : vector<4xf32>
    %31 = vector.multi_reduction <add>, %30, %cst_22 [1] : vector<4x8xf32> to vector<4xf32>
    %32 = vector.shape_cast %31 : vector<4xf32> to vector<4x1xf32>
    %33 = tpu.reciprocal %32 {approx = true} : vector<4x1xf32> -> vector<4x1xf32>
    %34 = vector.broadcast %33 : vector<4x1xf32> to vector<4x8xf32>
    %35 = arith.mulf %30, %34 : vector<4x8xf32>
    %36 = vector.shape_cast %35 : vector<4x8xf32> to vector<4x8x1xf32>
    %37 = vector.broadcast %36 : vector<4x8x1xf32> to vector<4x8x32xf32>
    %38 = arith.mulf %37, %0 : vector<4x8x32xf32>
    %cst_23 = arith.constant dense<0.000000e+00> : vector<4x32xf32>
    %39 = vector.multi_reduction <add>, %38, %cst_23 [1] : vector<4x8x32xf32> to vector<4x32xf32>
    %40 = arith.index_cast %c0_i32 : i32 to index
    %c0_24 = arith.constant 0 : index
    %c0_25 = arith.constant 0 : index
    %41 = vector.load %arg1[%40, %c0_24, %c0_25] : memref<8x4x1xf32, #tpu.memory_space<vmem>>, vector<1x4x1xf32>
    %42 = vector.shape_cast %41 : vector<1x4x1xf32> to vector<4x1xf32>
    %43 = tpu.concatenate %39, %13 in 1 : vector<4x32xf32>, vector<4x32xf32> -> vector<4x64xf32>
    %cst_26 = arith.constant dense<0.000000e+00> : vector<4x128xf32>
    %44 = tpu.matmul %43, %3, %cst_26 {dimension_numbers = #tpu.dot_dimension_numbers<[1], [0], [0], [1], [0, 0, 1, 1], [], []>} : vector<4x64xf32>, vector<64x128xf32>, vector<4x128xf32> -> vector<4x128xf32>
    %45 = vector.broadcast %42 : vector<4x1xf32> to vector<4x128xf32>
    %46 = vector.broadcast %4 : vector<1x128xf32> to vector<4x128xf32>
    %47 = arith.mulf %45, %46 : vector<4x128xf32>
    %48 = arith.addf %44, %47 : vector<4x128xf32>
    %49 = vector.broadcast %5 : vector<1x128xf32> to vector<4x128xf32>
    %50 = arith.addf %48, %49 : vector<4x128xf32>
    %51 = vector.extract_strided_slice %50 {offsets = [0, 0], sizes = [4, 32], strides = [1, 1]} : vector<4x128xf32> to vector<4x32xf32>
    %52 = arith.negf %51 : vector<4x32xf32>
    %53 = math.exp %52 : vector<4x32xf32>
    %cst_27 = arith.constant 1.000000e+00 : f32
    %54 = vector.broadcast %cst_27 : f32 to vector<4x32xf32>
    %55 = arith.addf %54, %53 : vector<4x32xf32>
    %56 = arith.divf %54, %55 : vector<4x32xf32>
    %57 = vector.extract_strided_slice %50 {offsets = [0, 32], sizes = [4, 32], strides = [1, 1]} : vector<4x128xf32> to vector<4x32xf32>
    %58 = arith.negf %57 : vector<4x32xf32>
    %59 = math.exp %58 : vector<4x32xf32>
    %cst_28 = arith.constant 1.000000e+00 : f32
    %60 = vector.broadcast %cst_28 : f32 to vector<4x32xf32>
    %61 = arith.addf %60, %59 : vector<4x32xf32>
    %62 = arith.divf %60, %61 : vector<4x32xf32>
    %63 = vector.extract_strided_slice %50 {offsets = [0, 64], sizes = [4, 32], strides = [1, 1]} : vector<4x128xf32> to vector<4x32xf32>
    %64 = math.tanh %63 : vector<4x32xf32>
    %65 = vector.extract_strided_slice %50 {offsets = [0, 96], sizes = [4, 32], strides = [1, 1]} : vector<4x128xf32> to vector<4x32xf32>
    %66 = arith.negf %65 : vector<4x32xf32>
    %67 = math.exp %66 : vector<4x32xf32>
    %cst_29 = arith.constant 1.000000e+00 : f32
    %68 = vector.broadcast %cst_29 : f32 to vector<4x32xf32>
    %69 = arith.addf %68, %67 : vector<4x32xf32>
    %70 = arith.divf %68, %69 : vector<4x32xf32>
    %71 = arith.mulf %62, %14 : vector<4x32xf32>
    %72 = arith.mulf %56, %64 : vector<4x32xf32>
    %73 = arith.addf %71, %72 : vector<4x32xf32>
    %74 = math.tanh %73 : vector<4x32xf32>
    %75 = arith.mulf %70, %74 : vector<4x32xf32>
    %c1_i32 = arith.constant 1 : i32
    %76 = tpu.concatenate %75, %73 in 1 : vector<4x32xf32>, vector<4x32xf32> -> vector<4x64xf32>
    %cst_30 = arith.constant dense<0.000000e+00> : vector<4x32xf32>
    %77 = tpu.matmul %76, %1, %cst_30 {dimension_numbers = #tpu.dot_dimension_numbers<[1], [0], [0], [1], [0, 0, 1, 1], [], []>} : vector<4x64xf32>, vector<64x32xf32>, vector<4x32xf32> -> vector<4x32xf32>
    %78 = vector.shape_cast %77 : vector<4x32xf32> to vector<4x1x32xf32>
    %79 = vector.broadcast %78 : vector<4x1x32xf32> to vector<4x8x32xf32>
    %80 = arith.addf %12, %79 : vector<4x8x32xf32>
    %81 = math.tanh %80 : vector<4x8x32xf32>
    %82 = vector.shape_cast %2 : vector<1x32xf32> to vector<1x1x32xf32>
    %83 = vector.broadcast %82 : vector<1x1x32xf32> to vector<4x8x32xf32>
    %84 = arith.mulf %81, %83 : vector<4x8x32xf32>
    %cst_31 = arith.constant dense<0.000000e+00> : vector<4x8xf32>
    %85 = vector.multi_reduction <add>, %84, %cst_31 [2] : vector<4x8x32xf32> to vector<4x8xf32>
    %cst_32 = arith.constant dense<0xFF800000> : vector<4xf32>
    %86 = vector.multi_reduction <maximumf>, %85, %cst_32 [1] : vector<4x8xf32> to vector<4xf32>
    %87 = vector.shape_cast %86 : vector<4xf32> to vector<4x1xf32>
    %88 = vector.broadcast %87 : vector<4x1xf32> to vector<4x8xf32>
    %89 = arith.subf %85, %88 : vector<4x8xf32>
    %90 = math.exp %89 : vector<4x8xf32>
    %cst_33 = arith.constant dense<0.000000e+00> : vector<4xf32>
    %91 = vector.multi_reduction <add>, %90, %cst_33 [1] : vector<4x8xf32> to vector<4xf32>
    %92 = vector.shape_cast %91 : vector<4xf32> to vector<4x1xf32>
    %93 = tpu.reciprocal %92 {approx = true} : vector<4x1xf32> -> vector<4x1xf32>
    %94 = vector.broadcast %93 : vector<4x1xf32> to vector<4x8xf32>
    %95 = arith.mulf %90, %94 : vector<4x8xf32>
    %96 = vector.shape_cast %95 : vector<4x8xf32> to vector<4x8x1xf32>
    %97 = vector.broadcast %96 : vector<4x8x1xf32> to vector<4x8x32xf32>
    %98 = arith.mulf %97, %0 : vector<4x8x32xf32>
    %cst_34 = arith.constant dense<0.000000e+00> : vector<4x32xf32>
    %99 = vector.multi_reduction <add>, %98, %cst_34 [1] : vector<4x8x32xf32> to vector<4x32xf32>
    %100 = arith.index_cast %c1_i32 : i32 to index
    %c0_35 = arith.constant 0 : index
    %c0_36 = arith.constant 0 : index
    %101 = vector.load %arg1[%100, %c0_35, %c0_36] : memref<8x4x1xf32, #tpu.memory_space<vmem>>, vector<1x4x1xf32>
    %102 = vector.shape_cast %101 : vector<1x4x1xf32> to vector<4x1xf32>
    %103 = tpu.concatenate %99, %75 in 1 : vector<4x32xf32>, vector<4x32xf32> -> vector<4x64xf32>
    %cst_37 = arith.constant dense<0.000000e+00> : vector<4x128xf32>
    %104 = tpu.matmul %103, %3, %cst_37 {dimension_numbers = #tpu.dot_dimension_numbers<[1], [0], [0], [1], [0, 0, 1, 1], [], []>} : vector<4x64xf32>, vector<64x128xf32>, vector<4x128xf32> -> vector<4x128xf32>
    %105 = vector.broadcast %102 : vector<4x1xf32> to vector<4x128xf32>
    %106 = vector.broadcast %4 : vector<1x128xf32> to vector<4x128xf32>
    %107 = arith.mulf %105, %106 : vector<4x128xf32>
    %108 = arith.addf %104, %107 : vector<4x128xf32>
    %109 = vector.broadcast %5 : vector<1x128xf32> to vector<4x128xf32>
    %110 = arith.addf %108, %109 : vector<4x128xf32>
    %111 = vector.extract_strided_slice %110 {offsets = [0, 0], sizes = [4, 32], strides = [1, 1]} : vector<4x128xf32> to vector<4x32xf32>
    %112 = arith.negf %111 : vector<4x32xf32>
    %113 = math.exp %112 : vector<4x32xf32>
    %cst_38 = arith.constant 1.000000e+00 : f32
    %114 = vector.broadcast %cst_38 : f32 to vector<4x32xf32>
    %115 = arith.addf %114, %113 : vector<4x32xf32>
    %116 = arith.divf %114, %115 : vector<4x32xf32>
    %117 = vector.extract_strided_slice %110 {offsets = [0, 32], sizes = [4, 32], strides = [1, 1]} : vector<4x128xf32> to vector<4x32xf32>
    %118 = arith.negf %117 : vector<4x32xf32>
    %119 = math.exp %118 : vector<4x32xf32>
    %cst_39 = arith.constant 1.000000e+00 : f32
    %120 = vector.broadcast %cst_39 : f32 to vector<4x32xf32>
    %121 = arith.addf %120, %119 : vector<4x32xf32>
    %122 = arith.divf %120, %121 : vector<4x32xf32>
    %123 = vector.extract_strided_slice %110 {offsets = [0, 64], sizes = [4, 32], strides = [1, 1]} : vector<4x128xf32> to vector<4x32xf32>
    %124 = math.tanh %123 : vector<4x32xf32>
    %125 = vector.extract_strided_slice %110 {offsets = [0, 96], sizes = [4, 32], strides = [1, 1]} : vector<4x128xf32> to vector<4x32xf32>
    %126 = arith.negf %125 : vector<4x32xf32>
    %127 = math.exp %126 : vector<4x32xf32>
    %cst_40 = arith.constant 1.000000e+00 : f32
    %128 = vector.broadcast %cst_40 : f32 to vector<4x32xf32>
    %129 = arith.addf %128, %127 : vector<4x32xf32>
    %130 = arith.divf %128, %129 : vector<4x32xf32>
    %131 = arith.mulf %122, %73 : vector<4x32xf32>
    %132 = arith.mulf %116, %124 : vector<4x32xf32>
    %133 = arith.addf %131, %132 : vector<4x32xf32>
    %134 = math.tanh %133 : vector<4x32xf32>
    %135 = arith.mulf %130, %134 : vector<4x32xf32>
    %c2_i32 = arith.constant 2 : i32
    %136 = tpu.concatenate %135, %133 in 1 : vector<4x32xf32>, vector<4x32xf32> -> vector<4x64xf32>
    %cst_41 = arith.constant dense<0.000000e+00> : vector<4x32xf32>
    %137 = tpu.matmul %136, %1, %cst_41 {dimension_numbers = #tpu.dot_dimension_numbers<[1], [0], [0], [1], [0, 0, 1, 1], [], []>} : vector<4x64xf32>, vector<64x32xf32>, vector<4x32xf32> -> vector<4x32xf32>
    %138 = vector.shape_cast %137 : vector<4x32xf32> to vector<4x1x32xf32>
    %139 = vector.broadcast %138 : vector<4x1x32xf32> to vector<4x8x32xf32>
    %140 = arith.addf %12, %139 : vector<4x8x32xf32>
    %141 = math.tanh %140 : vector<4x8x32xf32>
    %142 = vector.shape_cast %2 : vector<1x32xf32> to vector<1x1x32xf32>
    %143 = vector.broadcast %142 : vector<1x1x32xf32> to vector<4x8x32xf32>
    %144 = arith.mulf %141, %143 : vector<4x8x32xf32>
    %cst_42 = arith.constant dense<0.000000e+00> : vector<4x8xf32>
    %145 = vector.multi_reduction <add>, %144, %cst_42 [2] : vector<4x8x32xf32> to vector<4x8xf32>
    %cst_43 = arith.constant dense<0xFF800000> : vector<4xf32>
    %146 = vector.multi_reduction <maximumf>, %145, %cst_43 [1] : vector<4x8xf32> to vector<4xf32>
    %147 = vector.shape_cast %146 : vector<4xf32> to vector<4x1xf32>
    %148 = vector.broadcast %147 : vector<4x1xf32> to vector<4x8xf32>
    %149 = arith.subf %145, %148 : vector<4x8xf32>
    %150 = math.exp %149 : vector<4x8xf32>
    %cst_44 = arith.constant dense<0.000000e+00> : vector<4xf32>
    %151 = vector.multi_reduction <add>, %150, %cst_44 [1] : vector<4x8xf32> to vector<4xf32>
    %152 = vector.shape_cast %151 : vector<4xf32> to vector<4x1xf32>
    %153 = tpu.reciprocal %152 {approx = true} : vector<4x1xf32> -> vector<4x1xf32>
    %154 = vector.broadcast %153 : vector<4x1xf32> to vector<4x8xf32>
    %155 = arith.mulf %150, %154 : vector<4x8xf32>
    %156 = vector.shape_cast %155 : vector<4x8xf32> to vector<4x8x1xf32>
    %157 = vector.broadcast %156 : vector<4x8x1xf32> to vector<4x8x32xf32>
    %158 = arith.mulf %157, %0 : vector<4x8x32xf32>
    %cst_45 = arith.constant dense<0.000000e+00> : vector<4x32xf32>
    %159 = vector.multi_reduction <add>, %158, %cst_45 [1] : vector<4x8x32xf32> to vector<4x32xf32>
    %160 = arith.index_cast %c2_i32 : i32 to index
    %c0_46 = arith.constant 0 : index
    %c0_47 = arith.constant 0 : index
    %161 = vector.load %arg1[%160, %c0_46, %c0_47] : memref<8x4x1xf32, #tpu.memory_space<vmem>>, vector<1x4x1xf32>
    %162 = vector.shape_cast %161 : vector<1x4x1xf32> to vector<4x1xf32>
    %163 = tpu.concatenate %159, %135 in 1 : vector<4x32xf32>, vector<4x32xf32> -> vector<4x64xf32>
    %cst_48 = arith.constant dense<0.000000e+00> : vector<4x128xf32>
    %164 = tpu.matmul %163, %3, %cst_48 {dimension_numbers = #tpu.dot_dimension_numbers<[1], [0], [0], [1], [0, 0, 1, 1], [], []>} : vector<4x64xf32>, vector<64x128xf32>, vector<4x128xf32> -> vector<4x128xf32>
    %165 = vector.broadcast %162 : vector<4x1xf32> to vector<4x128xf32>
    %166 = vector.broadcast %4 : vector<1x128xf32> to vector<4x128xf32>
    %167 = arith.mulf %165, %166 : vector<4x128xf32>
    %168 = arith.addf %164, %167 : vector<4x128xf32>
    %169 = vector.broadcast %5 : vector<1x128xf32> to vector<4x128xf32>
    %170 = arith.addf %168, %169 : vector<4x128xf32>
    %171 = vector.extract_strided_slice %170 {offsets = [0, 0], sizes = [4, 32], strides = [1, 1]} : vector<4x128xf32> to vector<4x32xf32>
    %172 = arith.negf %171 : vector<4x32xf32>
    %173 = math.exp %172 : vector<4x32xf32>
    %cst_49 = arith.constant 1.000000e+00 : f32
    %174 = vector.broadcast %cst_49 : f32 to vector<4x32xf32>
    %175 = arith.addf %174, %173 : vector<4x32xf32>
    %176 = arith.divf %174, %175 : vector<4x32xf32>
    %177 = vector.extract_strided_slice %170 {offsets = [0, 32], sizes = [4, 32], strides = [1, 1]} : vector<4x128xf32> to vector<4x32xf32>
    %178 = arith.negf %177 : vector<4x32xf32>
    %179 = math.exp %178 : vector<4x32xf32>
    %cst_50 = arith.constant 1.000000e+00 : f32
    %180 = vector.broadcast %cst_50 : f32 to vector<4x32xf32>
    %181 = arith.addf %180, %179 : vector<4x32xf32>
    %182 = arith.divf %180, %181 : vector<4x32xf32>
    %183 = vector.extract_strided_slice %170 {offsets = [0, 64], sizes = [4, 32], strides = [1, 1]} : vector<4x128xf32> to vector<4x32xf32>
    %184 = math.tanh %183 : vector<4x32xf32>
    %185 = vector.extract_strided_slice %170 {offsets = [0, 96], sizes = [4, 32], strides = [1, 1]} : vector<4x128xf32> to vector<4x32xf32>
    %186 = arith.negf %185 : vector<4x32xf32>
    %187 = math.exp %186 : vector<4x32xf32>
    %cst_51 = arith.constant 1.000000e+00 : f32
    %188 = vector.broadcast %cst_51 : f32 to vector<4x32xf32>
    %189 = arith.addf %188, %187 : vector<4x32xf32>
    %190 = arith.divf %188, %189 : vector<4x32xf32>
    %191 = arith.mulf %182, %133 : vector<4x32xf32>
    %192 = arith.mulf %176, %184 : vector<4x32xf32>
    %193 = arith.addf %191, %192 : vector<4x32xf32>
    %194 = math.tanh %193 : vector<4x32xf32>
    %195 = arith.mulf %190, %194 : vector<4x32xf32>
    %c3_i32 = arith.constant 3 : i32
    %196 = tpu.concatenate %195, %193 in 1 : vector<4x32xf32>, vector<4x32xf32> -> vector<4x64xf32>
    %cst_52 = arith.constant dense<0.000000e+00> : vector<4x32xf32>
    %197 = tpu.matmul %196, %1, %cst_52 {dimension_numbers = #tpu.dot_dimension_numbers<[1], [0], [0], [1], [0, 0, 1, 1], [], []>} : vector<4x64xf32>, vector<64x32xf32>, vector<4x32xf32> -> vector<4x32xf32>
    %198 = vector.shape_cast %197 : vector<4x32xf32> to vector<4x1x32xf32>
    %199 = vector.broadcast %198 : vector<4x1x32xf32> to vector<4x8x32xf32>
    %200 = arith.addf %12, %199 : vector<4x8x32xf32>
    %201 = math.tanh %200 : vector<4x8x32xf32>
    %202 = vector.shape_cast %2 : vector<1x32xf32> to vector<1x1x32xf32>
    %203 = vector.broadcast %202 : vector<1x1x32xf32> to vector<4x8x32xf32>
    %204 = arith.mulf %201, %203 : vector<4x8x32xf32>
    %cst_53 = arith.constant dense<0.000000e+00> : vector<4x8xf32>
    %205 = vector.multi_reduction <add>, %204, %cst_53 [2] : vector<4x8x32xf32> to vector<4x8xf32>
    %cst_54 = arith.constant dense<0xFF800000> : vector<4xf32>
    %206 = vector.multi_reduction <maximumf>, %205, %cst_54 [1] : vector<4x8xf32> to vector<4xf32>
    %207 = vector.shape_cast %206 : vector<4xf32> to vector<4x1xf32>
    %208 = vector.broadcast %207 : vector<4x1xf32> to vector<4x8xf32>
    %209 = arith.subf %205, %208 : vector<4x8xf32>
    %210 = math.exp %209 : vector<4x8xf32>
    %cst_55 = arith.constant dense<0.000000e+00> : vector<4xf32>
    %211 = vector.multi_reduction <add>, %210, %cst_55 [1] : vector<4x8xf32> to vector<4xf32>
    %212 = vector.shape_cast %211 : vector<4xf32> to vector<4x1xf32>
    %213 = tpu.reciprocal %212 {approx = true} : vector<4x1xf32> -> vector<4x1xf32>
    %214 = vector.broadcast %213 : vector<4x1xf32> to vector<4x8xf32>
    %215 = arith.mulf %210, %214 : vector<4x8xf32>
    %216 = vector.shape_cast %215 : vector<4x8xf32> to vector<4x8x1xf32>
    %217 = vector.broadcast %216 : vector<4x8x1xf32> to vector<4x8x32xf32>
    %218 = arith.mulf %217, %0 : vector<4x8x32xf32>
    %cst_56 = arith.constant dense<0.000000e+00> : vector<4x32xf32>
    %219 = vector.multi_reduction <add>, %218, %cst_56 [1] : vector<4x8x32xf32> to vector<4x32xf32>
    %220 = arith.index_cast %c3_i32 : i32 to index
    %c0_57 = arith.constant 0 : index
    %c0_58 = arith.constant 0 : index
    %221 = vector.load %arg1[%220, %c0_57, %c0_58] : memref<8x4x1xf32, #tpu.memory_space<vmem>>, vector<1x4x1xf32>
    %222 = vector.shape_cast %221 : vector<1x4x1xf32> to vector<4x1xf32>
    %223 = tpu.concatenate %219, %195 in 1 : vector<4x32xf32>, vector<4x32xf32> -> vector<4x64xf32>
    %cst_59 = arith.constant dense<0.000000e+00> : vector<4x128xf32>
    %224 = tpu.matmul %223, %3, %cst_59 {dimension_numbers = #tpu.dot_dimension_numbers<[1], [0], [0], [1], [0, 0, 1, 1], [], []>} : vector<4x64xf32>, vector<64x128xf32>, vector<4x128xf32> -> vector<4x128xf32>
    %225 = vector.broadcast %222 : vector<4x1xf32> to vector<4x128xf32>
    %226 = vector.broadcast %4 : vector<1x128xf32> to vector<4x128xf32>
    %227 = arith.mulf %225, %226 : vector<4x128xf32>
    %228 = arith.addf %224, %227 : vector<4x128xf32>
    %229 = vector.broadcast %5 : vector<1x128xf32> to vector<4x128xf32>
    %230 = arith.addf %228, %229 : vector<4x128xf32>
    %231 = vector.extract_strided_slice %230 {offsets = [0, 0], sizes = [4, 32], strides = [1, 1]} : vector<4x128xf32> to vector<4x32xf32>
    %232 = arith.negf %231 : vector<4x32xf32>
    %233 = math.exp %232 : vector<4x32xf32>
    %cst_60 = arith.constant 1.000000e+00 : f32
    %234 = vector.broadcast %cst_60 : f32 to vector<4x32xf32>
    %235 = arith.addf %234, %233 : vector<4x32xf32>
    %236 = arith.divf %234, %235 : vector<4x32xf32>
    %237 = vector.extract_strided_slice %230 {offsets = [0, 32], sizes = [4, 32], strides = [1, 1]} : vector<4x128xf32> to vector<4x32xf32>
    %238 = arith.negf %237 : vector<4x32xf32>
    %239 = math.exp %238 : vector<4x32xf32>
    %cst_61 = arith.constant 1.000000e+00 : f32
    %240 = vector.broadcast %cst_61 : f32 to vector<4x32xf32>
    %241 = arith.addf %240, %239 : vector<4x32xf32>
    %242 = arith.divf %240, %241 : vector<4x32xf32>
    %243 = vector.extract_strided_slice %230 {offsets = [0, 64], sizes = [4, 32], strides = [1, 1]} : vector<4x128xf32> to vector<4x32xf32>
    %244 = math.tanh %243 : vector<4x32xf32>
    %245 = vector.extract_strided_slice %230 {offsets = [0, 96], sizes = [4, 32], strides = [1, 1]} : vector<4x128xf32> to vector<4x32xf32>
    %246 = arith.negf %245 : vector<4x32xf32>
    %247 = math.exp %246 : vector<4x32xf32>
    %cst_62 = arith.constant 1.000000e+00 : f32
    %248 = vector.broadcast %cst_62 : f32 to vector<4x32xf32>
    %249 = arith.addf %248, %247 : vector<4x32xf32>
    %250 = arith.divf %248, %249 : vector<4x32xf32>
    %251 = arith.mulf %242, %193 : vector<4x32xf32>
    %252 = arith.mulf %236, %244 : vector<4x32xf32>
    %253 = arith.addf %251, %252 : vector<4x32xf32>
    %254 = math.tanh %253 : vector<4x32xf32>
    %255 = arith.mulf %250, %254 : vector<4x32xf32>
    %c4_i32 = arith.constant 4 : i32
    %256 = tpu.concatenate %255, %253 in 1 : vector<4x32xf32>, vector<4x32xf32> -> vector<4x64xf32>
    %cst_63 = arith.constant dense<0.000000e+00> : vector<4x32xf32>
    %257 = tpu.matmul %256, %1, %cst_63 {dimension_numbers = #tpu.dot_dimension_numbers<[1], [0], [0], [1], [0, 0, 1, 1], [], []>} : vector<4x64xf32>, vector<64x32xf32>, vector<4x32xf32> -> vector<4x32xf32>
    %258 = vector.shape_cast %257 : vector<4x32xf32> to vector<4x1x32xf32>
    %259 = vector.broadcast %258 : vector<4x1x32xf32> to vector<4x8x32xf32>
    %260 = arith.addf %12, %259 : vector<4x8x32xf32>
    %261 = math.tanh %260 : vector<4x8x32xf32>
    %262 = vector.shape_cast %2 : vector<1x32xf32> to vector<1x1x32xf32>
    %263 = vector.broadcast %262 : vector<1x1x32xf32> to vector<4x8x32xf32>
    %264 = arith.mulf %261, %263 : vector<4x8x32xf32>
    %cst_64 = arith.constant dense<0.000000e+00> : vector<4x8xf32>
    %265 = vector.multi_reduction <add>, %264, %cst_64 [2] : vector<4x8x32xf32> to vector<4x8xf32>
    %cst_65 = arith.constant dense<0xFF800000> : vector<4xf32>
    %266 = vector.multi_reduction <maximumf>, %265, %cst_65 [1] : vector<4x8xf32> to vector<4xf32>
    %267 = vector.shape_cast %266 : vector<4xf32> to vector<4x1xf32>
    %268 = vector.broadcast %267 : vector<4x1xf32> to vector<4x8xf32>
    %269 = arith.subf %265, %268 : vector<4x8xf32>
    %270 = math.exp %269 : vector<4x8xf32>
    %cst_66 = arith.constant dense<0.000000e+00> : vector<4xf32>
    %271 = vector.multi_reduction <add>, %270, %cst_66 [1] : vector<4x8xf32> to vector<4xf32>
    %272 = vector.shape_cast %271 : vector<4xf32> to vector<4x1xf32>
    %273 = tpu.reciprocal %272 {approx = true} : vector<4x1xf32> -> vector<4x1xf32>
    %274 = vector.broadcast %273 : vector<4x1xf32> to vector<4x8xf32>
    %275 = arith.mulf %270, %274 : vector<4x8xf32>
    %276 = vector.shape_cast %275 : vector<4x8xf32> to vector<4x8x1xf32>
    %277 = vector.broadcast %276 : vector<4x8x1xf32> to vector<4x8x32xf32>
    %278 = arith.mulf %277, %0 : vector<4x8x32xf32>
    %cst_67 = arith.constant dense<0.000000e+00> : vector<4x32xf32>
    %279 = vector.multi_reduction <add>, %278, %cst_67 [1] : vector<4x8x32xf32> to vector<4x32xf32>
    %280 = arith.index_cast %c4_i32 : i32 to index
    %c0_68 = arith.constant 0 : index
    %c0_69 = arith.constant 0 : index
    %281 = vector.load %arg1[%280, %c0_68, %c0_69] : memref<8x4x1xf32, #tpu.memory_space<vmem>>, vector<1x4x1xf32>
    %282 = vector.shape_cast %281 : vector<1x4x1xf32> to vector<4x1xf32>
    %283 = tpu.concatenate %279, %255 in 1 : vector<4x32xf32>, vector<4x32xf32> -> vector<4x64xf32>
    %cst_70 = arith.constant dense<0.000000e+00> : vector<4x128xf32>
    %284 = tpu.matmul %283, %3, %cst_70 {dimension_numbers = #tpu.dot_dimension_numbers<[1], [0], [0], [1], [0, 0, 1, 1], [], []>} : vector<4x64xf32>, vector<64x128xf32>, vector<4x128xf32> -> vector<4x128xf32>
    %285 = vector.broadcast %282 : vector<4x1xf32> to vector<4x128xf32>
    %286 = vector.broadcast %4 : vector<1x128xf32> to vector<4x128xf32>
    %287 = arith.mulf %285, %286 : vector<4x128xf32>
    %288 = arith.addf %284, %287 : vector<4x128xf32>
    %289 = vector.broadcast %5 : vector<1x128xf32> to vector<4x128xf32>
    %290 = arith.addf %288, %289 : vector<4x128xf32>
    %291 = vector.extract_strided_slice %290 {offsets = [0, 0], sizes = [4, 32], strides = [1, 1]} : vector<4x128xf32> to vector<4x32xf32>
    %292 = arith.negf %291 : vector<4x32xf32>
    %293 = math.exp %292 : vector<4x32xf32>
    %cst_71 = arith.constant 1.000000e+00 : f32
    %294 = vector.broadcast %cst_71 : f32 to vector<4x32xf32>
    %295 = arith.addf %294, %293 : vector<4x32xf32>
    %296 = arith.divf %294, %295 : vector<4x32xf32>
    %297 = vector.extract_strided_slice %290 {offsets = [0, 32], sizes = [4, 32], strides = [1, 1]} : vector<4x128xf32> to vector<4x32xf32>
    %298 = arith.negf %297 : vector<4x32xf32>
    %299 = math.exp %298 : vector<4x32xf32>
    %cst_72 = arith.constant 1.000000e+00 : f32
    %300 = vector.broadcast %cst_72 : f32 to vector<4x32xf32>
    %301 = arith.addf %300, %299 : vector<4x32xf32>
    %302 = arith.divf %300, %301 : vector<4x32xf32>
    %303 = vector.extract_strided_slice %290 {offsets = [0, 64], sizes = [4, 32], strides = [1, 1]} : vector<4x128xf32> to vector<4x32xf32>
    %304 = math.tanh %303 : vector<4x32xf32>
    %305 = vector.extract_strided_slice %290 {offsets = [0, 96], sizes = [4, 32], strides = [1, 1]} : vector<4x128xf32> to vector<4x32xf32>
    %306 = arith.negf %305 : vector<4x32xf32>
    %307 = math.exp %306 : vector<4x32xf32>
    %cst_73 = arith.constant 1.000000e+00 : f32
    %308 = vector.broadcast %cst_73 : f32 to vector<4x32xf32>
    %309 = arith.addf %308, %307 : vector<4x32xf32>
    %310 = arith.divf %308, %309 : vector<4x32xf32>
    %311 = arith.mulf %302, %253 : vector<4x32xf32>
    %312 = arith.mulf %296, %304 : vector<4x32xf32>
    %313 = arith.addf %311, %312 : vector<4x32xf32>
    %314 = math.tanh %313 : vector<4x32xf32>
    %315 = arith.mulf %310, %314 : vector<4x32xf32>
    %c5_i32 = arith.constant 5 : i32
    %316 = tpu.concatenate %315, %313 in 1 : vector<4x32xf32>, vector<4x32xf32> -> vector<4x64xf32>
    %cst_74 = arith.constant dense<0.000000e+00> : vector<4x32xf32>
    %317 = tpu.matmul %316, %1, %cst_74 {dimension_numbers = #tpu.dot_dimension_numbers<[1], [0], [0], [1], [0, 0, 1, 1], [], []>} : vector<4x64xf32>, vector<64x32xf32>, vector<4x32xf32> -> vector<4x32xf32>
    %318 = vector.shape_cast %317 : vector<4x32xf32> to vector<4x1x32xf32>
    %319 = vector.broadcast %318 : vector<4x1x32xf32> to vector<4x8x32xf32>
    %320 = arith.addf %12, %319 : vector<4x8x32xf32>
    %321 = math.tanh %320 : vector<4x8x32xf32>
    %322 = vector.shape_cast %2 : vector<1x32xf32> to vector<1x1x32xf32>
    %323 = vector.broadcast %322 : vector<1x1x32xf32> to vector<4x8x32xf32>
    %324 = arith.mulf %321, %323 : vector<4x8x32xf32>
    %cst_75 = arith.constant dense<0.000000e+00> : vector<4x8xf32>
    %325 = vector.multi_reduction <add>, %324, %cst_75 [2] : vector<4x8x32xf32> to vector<4x8xf32>
    %cst_76 = arith.constant dense<0xFF800000> : vector<4xf32>
    %326 = vector.multi_reduction <maximumf>, %325, %cst_76 [1] : vector<4x8xf32> to vector<4xf32>
    %327 = vector.shape_cast %326 : vector<4xf32> to vector<4x1xf32>
    %328 = vector.broadcast %327 : vector<4x1xf32> to vector<4x8xf32>
    %329 = arith.subf %325, %328 : vector<4x8xf32>
    %330 = math.exp %329 : vector<4x8xf32>
    %cst_77 = arith.constant dense<0.000000e+00> : vector<4xf32>
    %331 = vector.multi_reduction <add>, %330, %cst_77 [1] : vector<4x8xf32> to vector<4xf32>
    %332 = vector.shape_cast %331 : vector<4xf32> to vector<4x1xf32>
    %333 = tpu.reciprocal %332 {approx = true} : vector<4x1xf32> -> vector<4x1xf32>
    %334 = vector.broadcast %333 : vector<4x1xf32> to vector<4x8xf32>
    %335 = arith.mulf %330, %334 : vector<4x8xf32>
    %336 = vector.shape_cast %335 : vector<4x8xf32> to vector<4x8x1xf32>
    %337 = vector.broadcast %336 : vector<4x8x1xf32> to vector<4x8x32xf32>
    %338 = arith.mulf %337, %0 : vector<4x8x32xf32>
    %cst_78 = arith.constant dense<0.000000e+00> : vector<4x32xf32>
    %339 = vector.multi_reduction <add>, %338, %cst_78 [1] : vector<4x8x32xf32> to vector<4x32xf32>
    %340 = arith.index_cast %c5_i32 : i32 to index
    %c0_79 = arith.constant 0 : index
    %c0_80 = arith.constant 0 : index
    %341 = vector.load %arg1[%340, %c0_79, %c0_80] : memref<8x4x1xf32, #tpu.memory_space<vmem>>, vector<1x4x1xf32>
    %342 = vector.shape_cast %341 : vector<1x4x1xf32> to vector<4x1xf32>
    %343 = tpu.concatenate %339, %315 in 1 : vector<4x32xf32>, vector<4x32xf32> -> vector<4x64xf32>
    %cst_81 = arith.constant dense<0.000000e+00> : vector<4x128xf32>
    %344 = tpu.matmul %343, %3, %cst_81 {dimension_numbers = #tpu.dot_dimension_numbers<[1], [0], [0], [1], [0, 0, 1, 1], [], []>} : vector<4x64xf32>, vector<64x128xf32>, vector<4x128xf32> -> vector<4x128xf32>
    %345 = vector.broadcast %342 : vector<4x1xf32> to vector<4x128xf32>
    %346 = vector.broadcast %4 : vector<1x128xf32> to vector<4x128xf32>
    %347 = arith.mulf %345, %346 : vector<4x128xf32>
    %348 = arith.addf %344, %347 : vector<4x128xf32>
    %349 = vector.broadcast %5 : vector<1x128xf32> to vector<4x128xf32>
    %350 = arith.addf %348, %349 : vector<4x128xf32>
    %351 = vector.extract_strided_slice %350 {offsets = [0, 0], sizes = [4, 32], strides = [1, 1]} : vector<4x128xf32> to vector<4x32xf32>
    %352 = arith.negf %351 : vector<4x32xf32>
    %353 = math.exp %352 : vector<4x32xf32>
    %cst_82 = arith.constant 1.000000e+00 : f32
    %354 = vector.broadcast %cst_82 : f32 to vector<4x32xf32>
    %355 = arith.addf %354, %353 : vector<4x32xf32>
    %356 = arith.divf %354, %355 : vector<4x32xf32>
    %357 = vector.extract_strided_slice %350 {offsets = [0, 32], sizes = [4, 32], strides = [1, 1]} : vector<4x128xf32> to vector<4x32xf32>
    %358 = arith.negf %357 : vector<4x32xf32>
    %359 = math.exp %358 : vector<4x32xf32>
    %cst_83 = arith.constant 1.000000e+00 : f32
    %360 = vector.broadcast %cst_83 : f32 to vector<4x32xf32>
    %361 = arith.addf %360, %359 : vector<4x32xf32>
    %362 = arith.divf %360, %361 : vector<4x32xf32>
    %363 = vector.extract_strided_slice %350 {offsets = [0, 64], sizes = [4, 32], strides = [1, 1]} : vector<4x128xf32> to vector<4x32xf32>
    %364 = math.tanh %363 : vector<4x32xf32>
    %365 = vector.extract_strided_slice %350 {offsets = [0, 96], sizes = [4, 32], strides = [1, 1]} : vector<4x128xf32> to vector<4x32xf32>
    %366 = arith.negf %365 : vector<4x32xf32>
    %367 = math.exp %366 : vector<4x32xf32>
    %cst_84 = arith.constant 1.000000e+00 : f32
    %368 = vector.broadcast %cst_84 : f32 to vector<4x32xf32>
    %369 = arith.addf %368, %367 : vector<4x32xf32>
    %370 = arith.divf %368, %369 : vector<4x32xf32>
    %371 = arith.mulf %362, %313 : vector<4x32xf32>
    %372 = arith.mulf %356, %364 : vector<4x32xf32>
    %373 = arith.addf %371, %372 : vector<4x32xf32>
    %374 = math.tanh %373 : vector<4x32xf32>
    %375 = arith.mulf %370, %374 : vector<4x32xf32>
    %c6_i32 = arith.constant 6 : i32
    %376 = tpu.concatenate %375, %373 in 1 : vector<4x32xf32>, vector<4x32xf32> -> vector<4x64xf32>
    %cst_85 = arith.constant dense<0.000000e+00> : vector<4x32xf32>
    %377 = tpu.matmul %376, %1, %cst_85 {dimension_numbers = #tpu.dot_dimension_numbers<[1], [0], [0], [1], [0, 0, 1, 1], [], []>} : vector<4x64xf32>, vector<64x32xf32>, vector<4x32xf32> -> vector<4x32xf32>
    %378 = vector.shape_cast %377 : vector<4x32xf32> to vector<4x1x32xf32>
    %379 = vector.broadcast %378 : vector<4x1x32xf32> to vector<4x8x32xf32>
    %380 = arith.addf %12, %379 : vector<4x8x32xf32>
    %381 = math.tanh %380 : vector<4x8x32xf32>
    %382 = vector.shape_cast %2 : vector<1x32xf32> to vector<1x1x32xf32>
    %383 = vector.broadcast %382 : vector<1x1x32xf32> to vector<4x8x32xf32>
    %384 = arith.mulf %381, %383 : vector<4x8x32xf32>
    %cst_86 = arith.constant dense<0.000000e+00> : vector<4x8xf32>
    %385 = vector.multi_reduction <add>, %384, %cst_86 [2] : vector<4x8x32xf32> to vector<4x8xf32>
    %cst_87 = arith.constant dense<0xFF800000> : vector<4xf32>
    %386 = vector.multi_reduction <maximumf>, %385, %cst_87 [1] : vector<4x8xf32> to vector<4xf32>
    %387 = vector.shape_cast %386 : vector<4xf32> to vector<4x1xf32>
    %388 = vector.broadcast %387 : vector<4x1xf32> to vector<4x8xf32>
    %389 = arith.subf %385, %388 : vector<4x8xf32>
    %390 = math.exp %389 : vector<4x8xf32>
    %cst_88 = arith.constant dense<0.000000e+00> : vector<4xf32>
    %391 = vector.multi_reduction <add>, %390, %cst_88 [1] : vector<4x8xf32> to vector<4xf32>
    %392 = vector.shape_cast %391 : vector<4xf32> to vector<4x1xf32>
    %393 = tpu.reciprocal %392 {approx = true} : vector<4x1xf32> -> vector<4x1xf32>
    %394 = vector.broadcast %393 : vector<4x1xf32> to vector<4x8xf32>
    %395 = arith.mulf %390, %394 : vector<4x8xf32>
    %396 = vector.shape_cast %395 : vector<4x8xf32> to vector<4x8x1xf32>
    %397 = vector.broadcast %396 : vector<4x8x1xf32> to vector<4x8x32xf32>
    %398 = arith.mulf %397, %0 : vector<4x8x32xf32>
    %cst_89 = arith.constant dense<0.000000e+00> : vector<4x32xf32>
    %399 = vector.multi_reduction <add>, %398, %cst_89 [1] : vector<4x8x32xf32> to vector<4x32xf32>
    %400 = arith.index_cast %c6_i32 : i32 to index
    %c0_90 = arith.constant 0 : index
    %c0_91 = arith.constant 0 : index
    %401 = vector.load %arg1[%400, %c0_90, %c0_91] : memref<8x4x1xf32, #tpu.memory_space<vmem>>, vector<1x4x1xf32>
    %402 = vector.shape_cast %401 : vector<1x4x1xf32> to vector<4x1xf32>
    %403 = tpu.concatenate %399, %375 in 1 : vector<4x32xf32>, vector<4x32xf32> -> vector<4x64xf32>
    %cst_92 = arith.constant dense<0.000000e+00> : vector<4x128xf32>
    %404 = tpu.matmul %403, %3, %cst_92 {dimension_numbers = #tpu.dot_dimension_numbers<[1], [0], [0], [1], [0, 0, 1, 1], [], []>} : vector<4x64xf32>, vector<64x128xf32>, vector<4x128xf32> -> vector<4x128xf32>
    %405 = vector.broadcast %402 : vector<4x1xf32> to vector<4x128xf32>
    %406 = vector.broadcast %4 : vector<1x128xf32> to vector<4x128xf32>
    %407 = arith.mulf %405, %406 : vector<4x128xf32>
    %408 = arith.addf %404, %407 : vector<4x128xf32>
    %409 = vector.broadcast %5 : vector<1x128xf32> to vector<4x128xf32>
    %410 = arith.addf %408, %409 : vector<4x128xf32>
    %411 = vector.extract_strided_slice %410 {offsets = [0, 0], sizes = [4, 32], strides = [1, 1]} : vector<4x128xf32> to vector<4x32xf32>
    %412 = arith.negf %411 : vector<4x32xf32>
    %413 = math.exp %412 : vector<4x32xf32>
    %cst_93 = arith.constant 1.000000e+00 : f32
    %414 = vector.broadcast %cst_93 : f32 to vector<4x32xf32>
    %415 = arith.addf %414, %413 : vector<4x32xf32>
    %416 = arith.divf %414, %415 : vector<4x32xf32>
    %417 = vector.extract_strided_slice %410 {offsets = [0, 32], sizes = [4, 32], strides = [1, 1]} : vector<4x128xf32> to vector<4x32xf32>
    %418 = arith.negf %417 : vector<4x32xf32>
    %419 = math.exp %418 : vector<4x32xf32>
    %cst_94 = arith.constant 1.000000e+00 : f32
    %420 = vector.broadcast %cst_94 : f32 to vector<4x32xf32>
    %421 = arith.addf %420, %419 : vector<4x32xf32>
    %422 = arith.divf %420, %421 : vector<4x32xf32>
    %423 = vector.extract_strided_slice %410 {offsets = [0, 64], sizes = [4, 32], strides = [1, 1]} : vector<4x128xf32> to vector<4x32xf32>
    %424 = math.tanh %423 : vector<4x32xf32>
    %425 = vector.extract_strided_slice %410 {offsets = [0, 96], sizes = [4, 32], strides = [1, 1]} : vector<4x128xf32> to vector<4x32xf32>
    %426 = arith.negf %425 : vector<4x32xf32>
    %427 = math.exp %426 : vector<4x32xf32>
    %cst_95 = arith.constant 1.000000e+00 : f32
    %428 = vector.broadcast %cst_95 : f32 to vector<4x32xf32>
    %429 = arith.addf %428, %427 : vector<4x32xf32>
    %430 = arith.divf %428, %429 : vector<4x32xf32>
    %431 = arith.mulf %422, %373 : vector<4x32xf32>
    %432 = arith.mulf %416, %424 : vector<4x32xf32>
    %433 = arith.addf %431, %432 : vector<4x32xf32>
    %434 = math.tanh %433 : vector<4x32xf32>
    %435 = arith.mulf %430, %434 : vector<4x32xf32>
    %c7_i32 = arith.constant 7 : i32
    %436 = tpu.concatenate %435, %433 in 1 : vector<4x32xf32>, vector<4x32xf32> -> vector<4x64xf32>
    %cst_96 = arith.constant dense<0.000000e+00> : vector<4x32xf32>
    %437 = tpu.matmul %436, %1, %cst_96 {dimension_numbers = #tpu.dot_dimension_numbers<[1], [0], [0], [1], [0, 0, 1, 1], [], []>} : vector<4x64xf32>, vector<64x32xf32>, vector<4x32xf32> -> vector<4x32xf32>
    %438 = vector.shape_cast %437 : vector<4x32xf32> to vector<4x1x32xf32>
    %439 = vector.broadcast %438 : vector<4x1x32xf32> to vector<4x8x32xf32>
    %440 = arith.addf %12, %439 : vector<4x8x32xf32>
    %441 = math.tanh %440 : vector<4x8x32xf32>
    %442 = vector.shape_cast %2 : vector<1x32xf32> to vector<1x1x32xf32>
    %443 = vector.broadcast %442 : vector<1x1x32xf32> to vector<4x8x32xf32>
    %444 = arith.mulf %441, %443 : vector<4x8x32xf32>
    %cst_97 = arith.constant dense<0.000000e+00> : vector<4x8xf32>
    %445 = vector.multi_reduction <add>, %444, %cst_97 [2] : vector<4x8x32xf32> to vector<4x8xf32>
    %cst_98 = arith.constant dense<0xFF800000> : vector<4xf32>
    %446 = vector.multi_reduction <maximumf>, %445, %cst_98 [1] : vector<4x8xf32> to vector<4xf32>
    %447 = vector.shape_cast %446 : vector<4xf32> to vector<4x1xf32>
    %448 = vector.broadcast %447 : vector<4x1xf32> to vector<4x8xf32>
    %449 = arith.subf %445, %448 : vector<4x8xf32>
    %450 = math.exp %449 : vector<4x8xf32>
    %cst_99 = arith.constant dense<0.000000e+00> : vector<4xf32>
    %451 = vector.multi_reduction <add>, %450, %cst_99 [1] : vector<4x8xf32> to vector<4xf32>
    %452 = vector.shape_cast %451 : vector<4xf32> to vector<4x1xf32>
    %453 = tpu.reciprocal %452 {approx = true} : vector<4x1xf32> -> vector<4x1xf32>
    %454 = vector.broadcast %453 : vector<4x1xf32> to vector<4x8xf32>
    %455 = arith.mulf %450, %454 : vector<4x8xf32>
    %456 = vector.shape_cast %455 : vector<4x8xf32> to vector<4x8x1xf32>
    %457 = vector.broadcast %456 : vector<4x8x1xf32> to vector<4x8x32xf32>
    %458 = arith.mulf %457, %0 : vector<4x8x32xf32>
    %cst_100 = arith.constant dense<0.000000e+00> : vector<4x32xf32>
    %459 = vector.multi_reduction <add>, %458, %cst_100 [1] : vector<4x8x32xf32> to vector<4x32xf32>
    %460 = arith.index_cast %c7_i32 : i32 to index
    %c0_101 = arith.constant 0 : index
    %c0_102 = arith.constant 0 : index
    %461 = vector.load %arg1[%460, %c0_101, %c0_102] : memref<8x4x1xf32, #tpu.memory_space<vmem>>, vector<1x4x1xf32>
    %462 = vector.shape_cast %461 : vector<1x4x1xf32> to vector<4x1xf32>
    %463 = tpu.concatenate %459, %435 in 1 : vector<4x32xf32>, vector<4x32xf32> -> vector<4x64xf32>
    %cst_103 = arith.constant dense<0.000000e+00> : vector<4x128xf32>
    %464 = tpu.matmul %463, %3, %cst_103 {dimension_numbers = #tpu.dot_dimension_numbers<[1], [0], [0], [1], [0, 0, 1, 1], [], []>} : vector<4x64xf32>, vector<64x128xf32>, vector<4x128xf32> -> vector<4x128xf32>
    %465 = vector.broadcast %462 : vector<4x1xf32> to vector<4x128xf32>
    %466 = vector.broadcast %4 : vector<1x128xf32> to vector<4x128xf32>
    %467 = arith.mulf %465, %466 : vector<4x128xf32>
    %468 = arith.addf %464, %467 : vector<4x128xf32>
    %469 = vector.broadcast %5 : vector<1x128xf32> to vector<4x128xf32>
    %470 = arith.addf %468, %469 : vector<4x128xf32>
    %471 = vector.extract_strided_slice %470 {offsets = [0, 0], sizes = [4, 32], strides = [1, 1]} : vector<4x128xf32> to vector<4x32xf32>
    %472 = arith.negf %471 : vector<4x32xf32>
    %473 = math.exp %472 : vector<4x32xf32>
    %cst_104 = arith.constant 1.000000e+00 : f32
    %474 = vector.broadcast %cst_104 : f32 to vector<4x32xf32>
    %475 = arith.addf %474, %473 : vector<4x32xf32>
    %476 = arith.divf %474, %475 : vector<4x32xf32>
    %477 = vector.extract_strided_slice %470 {offsets = [0, 32], sizes = [4, 32], strides = [1, 1]} : vector<4x128xf32> to vector<4x32xf32>
    %478 = arith.negf %477 : vector<4x32xf32>
    %479 = math.exp %478 : vector<4x32xf32>
    %cst_105 = arith.constant 1.000000e+00 : f32
    %480 = vector.broadcast %cst_105 : f32 to vector<4x32xf32>
    %481 = arith.addf %480, %479 : vector<4x32xf32>
    %482 = arith.divf %480, %481 : vector<4x32xf32>
    %483 = vector.extract_strided_slice %470 {offsets = [0, 64], sizes = [4, 32], strides = [1, 1]} : vector<4x128xf32> to vector<4x32xf32>
    %484 = math.tanh %483 : vector<4x32xf32>
    %485 = vector.extract_strided_slice %470 {offsets = [0, 96], sizes = [4, 32], strides = [1, 1]} : vector<4x128xf32> to vector<4x32xf32>
    %486 = arith.negf %485 : vector<4x32xf32>
    %487 = math.exp %486 : vector<4x32xf32>
    %cst_106 = arith.constant 1.000000e+00 : f32
    %488 = vector.broadcast %cst_106 : f32 to vector<4x32xf32>
    %489 = arith.addf %488, %487 : vector<4x32xf32>
    %490 = arith.divf %488, %489 : vector<4x32xf32>
    %491 = arith.mulf %482, %433 : vector<4x32xf32>
    %492 = arith.mulf %476, %484 : vector<4x32xf32>
    %493 = arith.addf %491, %492 : vector<4x32xf32>
    %494 = math.tanh %493 : vector<4x32xf32>
    %495 = arith.mulf %490, %494 : vector<4x32xf32>
    %c8_i32 = arith.constant 8 : i32
    %496 = tpu.concatenate %495, %459 in 1 : vector<4x32xf32>, vector<4x32xf32> -> vector<4x64xf32>
    %c0_107 = arith.constant 0 : index
    %c0_108 = arith.constant 0 : index
    %497 = vector.load %arg9[%c0_107, %c0_108] : memref<64x1xf32, #tpu.memory_space<vmem>>, vector<64x1xf32>
    %cst_109 = arith.constant dense<0.000000e+00> : vector<4x1xf32>
    %498 = tpu.matmul %496, %497, %cst_109 {dimension_numbers = #tpu.dot_dimension_numbers<[1], [0], [0], [1], [0, 0, 1, 1], [], []>} : vector<4x64xf32>, vector<64x1xf32>, vector<4x1xf32> -> vector<4x1xf32>
    %c0_110 = arith.constant 0 : index
    %c0_111 = arith.constant 0 : index
    %499 = memref.load %arg10[%c0_110, %c0_111] : memref<1x1xf32, #tpu.memory_space<smem>>
    %500 = vector.broadcast %499 : f32 to vector<4x1xf32>
    %501 = arith.addf %498, %500 : vector<4x1xf32>
    %c0_112 = arith.constant 0 : index
    %c0_113 = arith.constant 0 : index
    %502 = vector.load %arg11[%c0_112, %c0_113] : memref<4x1xf32, #tpu.memory_space<vmem>>, vector<4x1xf32>
    tpu.vector_store %arg11[%c0_112, %c0_113], %501 {strides = array<i32>} : memref<4x1xf32, #tpu.memory_space<vmem>>, vector<4x1xf32>,
    return
  }
}

</mosaic_0001>

<bundles_post_ra>
// kernel: tpu_custom_call.1
= control target key start
LH: loop header
LB: loop body
LE: loop exit
PB: predicated region body
PF: predicated region fallthrough
CT: control target
= control target key end

     0   :  { %v4800_v0 = vmov 0.0|0.0   ;;  %vm4801_vm0 = vmmov 0   ;;  %v4802_v4 = vmov 0.0   ;;  %vm73_vm1 = vcmask 261120   ;;  %s4805_s30 = smov 64   ;;  %s4806_s12 = smov 32   ;;  %s5891_s2 = inlined_call_operand.vmem [shape: f32[64,32], index: 2, kind: input, shape index: {}]   ;;  %s5892_s3 = inlined_call_operand.vmem [shape: f32[32,32], index: 3, kind: input, shape index: {}]   ;;  %s5893_s0 = inlined_call_operand.vmem [shape: f32[4,8,32], index: 0, kind: input, shape index: {}]   ;;  %s5894_s4 = inlined_call_operand.vmem [shape: f32[1,32], index: 4, kind: input, shape index: {}]   ;;  %s5895_s5 = inlined_call_operand.vmem [shape: f32[1,32], index: 5, kind: input, shape index: {}]   ;;  %s5896_s1 = inlined_call_operand.vmem [shape: f32[8,4,1], index: 1, kind: input, shape index: {}]   ;;  %s5897_s6 = inlined_call_operand.vmem [shape: f32[64,128], index: 6, kind: input, shape index: {}]   ;;  %s5898_s7 = inlined_call_operand.vmem [shape: f32[1,128], index: 7, kind: input, shape index: {}]   ;;  %s5899_s8 = inlined_call_operand.vmem [shape: f32[1,128], index: 8, kind: input, shape index: {}]   ;;  %s5900_s9 = inlined_call_operand.vmem [shape: f32[64,1], index: 9, kind: input, shape index: {}]   ;;  %s5901_s10 = inlined_call_operand.<no memory space> [shape: f32[1,1], index: 10, kind: input, shape index: {}]   ;;  %s5902_s11 = inlined_call_operand.vmem [shape: f32[4,1], index: 11, kind: output, shape index: {}]  }
   0x1   :  { %4365 = vmatprep.subr.bf16.mxu1 %v4800_v0  ;;  %v43_v1 = vld [vmem:[%s5891_s2] sm:$0xff]  ;;  %v44_v2 = vld [vmem:[%s5891_s2 + $0x8] sm:$0xff]  ;;  %v45_v3 = vld [vmem:[%s5891_s2 + $0x10] sm:$0xff]  ;;  %4050 = vmatprep.mubr.msk.f32.mxu1 %vm4801_vm0, %v4802_v4  ;;  %v4803_v24 = vmov 1966171168   ;;  %v249_v26 = vlaneseq  ;;  %vm342_vm2 = vcmask 1041409  }
   0x2   :  { %v4879_v5 = vpack.c.bf16 %v44_v2, %v43_v1  ;;  %v46_v6 = vld [vmem:[%s5891_s2 + $0x18] sm:$0xff]  ;;  %v62_v7 = vld [vmem:[%s5892_s3] sm:$0xff]  ;;  %v63_v8 = vld [vmem:[%s5892_s3 + $0x8] sm:$0xff]  ;;  %v247_v25 = vunpack.c.l.s4 %v4803_v24  ;;  %vm344_vm3 = vcmask 1042434   ;;  %vm346_vm4 = vcmask 1043459  }
   0x3   :  { %v4357_v9 = vpack.c.bf16 %v63_v8, %v62_v7  ;;  %v64_v10 = vld [vmem:[%s5892_s3 + $0x10] sm:$0xff]  ;;  %v4894_v11 = vpack.c.bf16 %v46_v6, %v45_v3  ;;  %v65_v12 = vld [vmem:[%s5892_s3 + $0x18] sm:$0xff]  ;;  %v47_v13 = vld [vmem:[%s5891_s2 + $0x20] sm:$0xff]  ;;  %v4964_v28 = vshrl.u32 %v249_v26, 7  ;;  %v325_v8 = vand.u32 127, %v249_v26 }
   0x4   :  { %4367 = vmatpush3.bf16.msra.mxu1 %v4879_v5  ;;  %v48_v14 = vld [vmem:[%s5891_s2 + $0x28] sm:$0xff]  ;;  %v4361_v15 = vpack.c.bf16 %v65_v12, %v64_v10  ;;  %v4909_v16 = vld [vmem:[%s5893_s0] sm:$0xff]  ;;  %v49_v18 = vld [vmem:[%s5891_s2 + $0x30] sm:$0xff]  ;;  %v248_v27 = vunpack.c.0.s8 %v247_v25  ;;  %vm349_vm5 = vcmask 60416   ;;  %vm171_vm6 = vcmask 523264  }
   0x5   :  { %4368 = vmatprep.subr.bf16.mxu1 %v4800_v0  ;;  %4358 = vmatprep.subr.bf16.mxu0 %v4357_v9  ;;  %v4914_v17 = vpack.c.bf16 %v48_v14, %v47_v13  ;;  %v50_v19 = vld [vmem:[%s5891_s2 + $0x38] sm:$0xff]  ;;  %v4926_v20 = vld [vmem:[%s5893_s0 + $0x8] sm:$0xff]  ;;  %v4931_v21 = vld [vmem:[%s5893_s0 + $0x10] sm:$0xff]  ;;  %v4974_v37 = vsub.s32 0, %v4964_v28  ;;  %v5008_v10 = vsub.s32 %v325_v8, %v4964_v28  ;;  %vm3814_vm7 = vcmask 3072  }
   0x6   :  { %4360 = vmatpush3.bf16.msra.mxu0 %v4357_v9  ;;  %4028 = vmatprep.mubr.msk.f32.mxu0 %vm73_vm1, %v4909_v16  ;;  %v4935_v22 = vpack.c.bf16 %v50_v19, %v49_v18  ;;  %v4945_v23 = vld [vmem:[%s5893_s0 + $0x18] sm:$0xff]  ;;  %v4967_v31 = vsub.s32 %v248_v27, %v4964_v28  ;;  %v3820_v35 = vld [vmem:[%s5894_s4] ss:$0 sm:$0xff] }
   0x7   :  { %4362 = vmatprep.subr.bf16.mxu0 %v4361_v15  ;;  %v4997_v56 = vld [vmem:[%s5895_s5] ss:$0 sm:$0xff] }
   0x8   :  { %4370 = vmatpush3.bf16.msra.mxu1 %v4894_v11  ;;  %v503_v8 = vld [vmem:[%s5896_s1] sm:$0xf] }
   0x9   :  { %4371 = vmatprep.subr.bf16.mxu1 %v4800_v0 }
   0xa   :  { %4364 = vmatpush3.bf16.msra.mxu0 %v4361_v15 }
   0xb   :  { %4377 = vmatprep.subr.bf16.mxu0 %v4800_v0 }
   0xc   :  { %4373 = vmatpush3.bf16.msra.mxu1 %v4914_v17 }
   0xd   :  { %4374 = vmatprep.subr.bf16.mxu1 %v4800_v0  ;;  %4029 = vmatmul.mubr.msk.f32.vlgmr.msra.gmra.mrb[0].mxu0 %vm73_vm1, %v4926_v20 }
   0xe   :  { %4031 = vmatprep.mubr.msk.f32.mxu0 %vm73_vm1, %v4931_v21 }
  0x10   :  { %4376 = vmatpush3.bf16.msra.mxu1 %v4935_v22 }
  0x11   :  { %4032 = vmatmul.mubr.msk.f32.gmra.mrb[2].mxu0 %vm73_vm1, %v4945_v23  ;;  %4389 = vmatprep.subr.bf16.mxu1 %v4800_v0 }
  0x12   :  { %4069 = vmatprep.mubr.msk.f32.mxu0 %vm4801_vm0, %v4802_v4 }
  0x13   :  { %4051 = vmatmul.mubr.f32.vlgmr.msra.gmra.mrb[0].mxu1 %v4802_v4 }
  0x14   :  { %4391 = vmatpush3.bf16.msra.mxu1 %v4879_v5  ;;  %4088 = vmatprep.mubr.msk.f32.mxu1 %vm4801_vm0, %v4802_v4 }
  0x15   :  { %4392 = vmatprep.subr.bf16.mxu1 %v4800_v0 }
  0x18   :  { %4394 = vmatpush3.bf16.msra.mxu1 %v4894_v11 }
  0x19   :  { %4395 = vmatprep.subr.bf16.mxu1 %v4800_v0 }
  0x1c   :  { %4397 = vmatpush3.bf16.msra.mxu1 %v4914_v17 }
  0x1d   :  { %4398 = vmatprep.subr.bf16.mxu1 %v4800_v0 }
  0x20   :  { %4400 = vmatpush3.bf16.msra.mxu1 %v4935_v22 }
  0x21   :  { %4413 = vmatprep.subr.bf16.mxu1 %v4800_v0 }
  0xe0   :  { %v4030_v29 = vpop.f32.mrb[0].mxu0 }
  0xe1   :  { %v152_v30 = vpop.f32.mrb[1].mxu0  ;;  %v4983_v46 = vadd.f32 %v4030_v29, %v3820_v35 }
  0xe2   :  { %v4977_v41 = vadd.f32 %v3820_v35, %v152_v30  ;;  %v4804_v30 = vmov 0  }
  0xe3   :  { %4577 = vset.pattern.permute.xlu0 %v4804_v30  ;;  %4576 = vset.pattern.permute.xlu1 %v4804_v30 }
  0xe4   :  { %v4033_v32 = vpop.f32.mrb[2].mxu0 }
  0xe5   :  { %v162_v33 = vpop.f32.mrb[3].mxu0  ;;  %v4988_v51 = vadd.f32 %v4033_v32, %v3820_v35  ;;  %v5019_v32 = vsub.s32 1, %v4964_v28 }
  0xe6   :  { %v241_v34 = vpop.f32.mrb[0].mxu1  ;;  %v4981_v45 = vadd.f32 %v3820_v35, %v162_v33  ;;  %v5022_v33 = vsub.s32 2, %v4964_v28 }
  0xe7   :  { %v252_v36 = vrot.slane %v241_v34, %v4967_v31  ;;  %v4052_v38 = vpop.f32.mrb[1].mxu1  ;;  %v5025_v34 = vsub.s32 3, %v4964_v28 }
  0xe9   :  { %v253_v39 = vcombine.high %v252_v36, %v252_v36  ;;  %v260_v40 = vrot.slane %v252_v36, %v4967_v31 }
  0xeb   :  { %v267_v42 = vrot.slane %v253_v39, %v4967_v31  ;;  %v268_v43 = vcombine.high %v260_v40, %v260_v40  ;;  %v273_v44 = vrot.slane %v260_v40, %v4974_v37 }
  0xed   :  { %v269_v47 = vcombine.high %v267_v42, %v267_v42  ;;  %v277_v48 = vrot.slane %v267_v42, %v4974_v37  ;;  %v281_v49 = vrot.slane %v268_v43, %v4974_v37  ;;  %v290_v50 = vadd.f32 %v273_v44, %v4977_v41 }
  0xef   :  { %v285_v52 = vrot.slane %v269_v47, %v4974_v37  ;;  %v291_v53 = vadd.f32 %v277_v48, %v4983_v46  ;;  %4578 = vtanh.f32 %v290_v50  ;;  %v292_v54 = vadd.f32 %v281_v49, %v4981_v45 }
  0xf1   :  { %4580 = vtanh.f32 %v291_v53  ;;  %v293_v55 = vadd.f32 %v285_v52, %v4988_v51 }
  0xf2   :  { %4582 = vtanh.f32 %v292_v54 }
  0xf3   :  { %4584 = vtanh.f32 %v293_v55 }
  0xf9   :  { %v4579_v57 = vpop.eup %4578 }
  0xfa   :  { %v304_v58 = vmul.f32 %v4579_v57, %v4997_v56 }
  0xfb   :  { %v4581_v59 = vpop.eup %4580 }
  0xfc   :  { %v4583_v60 = vpop.eup %4582  ;;  %v308_v61 = vsel %vm73_vm1, %v304_v58, 0.0  ;;  %v305_v62 = vmul.f32 %v4581_v59, %v4997_v56 }
  0xfd   :  { %v4585_v63 = vpop.eup %4584  ;;  %309 = vadd.xlane.f32.xlu0 %v308_v61  ;;  %v306_v1 = vmul.f32 %v4583_v60, %v4997_v56 }
  0xfe   :  { %v307_v3 = vmul.f32 %v4585_v63, %v4997_v56  ;;  %v311_v6 = vsel %vm73_vm1, %v305_v62, 0.0 }
  0xff   :  { %v314_v2 = vsel %vm73_vm1, %v306_v1, 0.0 }
 0x100   :  { %315 = vadd.xlane.f32.xlu1 %v314_v2  ;;  %v317_v7 = vsel %vm73_vm1, %v307_v3, 0.0 }
 0x101   :  { %312 = vadd.xlane.f32.xlu0 %v311_v6 }
 0x104   :  { %318 = vadd.xlane.f32.xlu1 %v317_v7 }
 0x18a   :  { %v310_v9 = vpop.xlane.xlu0 %309 }
 0x18b   :  { %v329_v14 = vrot.slane %v310_v9, %v5008_v10 }
 0x18d   :  { %v316_v12 = vpop.xlane.xlu1 %315 }
 0x18e   :  { %v313_v13 = vpop.xlane.xlu0 %312  ;;  %v337_v18 = vrot.slane %v316_v12, %v5008_v10 }
 0x18f   :  { %v333_v15 = vrot.slane %v313_v13, %v5008_v10 }
 0x191   :  { %v319_v19 = vpop.xlane.xlu1 %318  ;;  %v343_v24 = vsel %vm342_vm2, %v333_v15, %v329_v14 }
 0x192   :  { %v341_v25 = vrot.slane %v319_v19, %v5008_v10  ;;  %v345_v26 = vsel %vm344_vm3, %v337_v18, %v343_v24 }
 0x194   :  { %v347_v27 = vsel %vm346_vm4, %v341_v25, %v345_v26 }
 0x195   :  { %v350_v29 = vsel %vm349_vm5, %v347_v27, -inf  ;;  %v52_v27 = vld [vmem:[%s5897_s6] sm:$0xff] }
 0x196   :  { %351 = vmax.xlane.f32.xlu0 %v350_v29  ;;  %v53_v29 = vld [vmem:[%s5897_s6 + $0x8] sm:$0xff] }
 0x197   :  { %v5052_v30 = vpack.c.bf16 %v53_v29, %v52_v27 }
 0x199   :  { %4379 = vmatpush3.bf16.msra.mxu0 %v5052_v30 }
 0x19a   :  { %4380 = vmatprep.subr.bf16.mxu0 %v4800_v0 }
 0x223   :  { %v352_v35 = vpop.xlane.xlu0 %351 }
 0x224   :  { %v357_v36 = vrot.slane %v352_v35, %v4974_v37  ;;  %v361_v38 = vrot.slane %v352_v35, %v5019_v32  ;;  %v365_v39 = vrot.slane %v352_v35, %v5022_v33  ;;  %v369_v40 = vrot.slane %v352_v35, %v5025_v34  ;;  %v54_v35 = vld [vmem:[%s5897_s6 + $0x10] sm:$0xff] }
 0x226   :  { %v374_v42 = vsub.f32 %v310_v9, %v357_v36  ;;  %v375_v43 = vsub.f32 %v313_v13, %v361_v38  ;;  %v376_v44 = vsub.f32 %v316_v12, %v365_v39  ;;  %v377_v49 = vsub.f32 %v319_v19, %v369_v40  ;;  %v55_v36 = vld [vmem:[%s5897_s6 + $0x18] sm:$0xff]  ;;  %v56_v39 = vld [vmem:[%s5897_s6 + $0x20] sm:$0xff]  ;;  %v57_v40 = vld [vmem:[%s5897_s6 + $0x28] sm:$0xff] }
 0x227   :  { %v5062_v38 = vpack.c.bf16 %v55_v36, %v54_v35 }
 0x228   :  { %v378_v47 = vmul.f32 1.442695, %v374_v42  ;;  %v380_v48 = vmul.f32 1.442695, %v375_v43  ;;  %v382_v50 = vmul.f32 1.442695, %v376_v44  ;;  %v5072_v42 = vpack.c.bf16 %v57_v40, %v56_v39 }
 0x229   :  { %v384_v28 = vmul.f32 1.442695, %v377_v49  ;;  %4382 = vmatpush3.bf16.msra.mxu0 %v5062_v38  ;;  %v58_v43 = vld [vmem:[%s5897_s6 + $0x30] sm:$0xff]  ;;  %v59_v44 = vld [vmem:[%s5897_s6 + $0x38] sm:$0xff] }
 0x22a   :  { %4586 = vpow2.f32 %v378_v47  ;;  %4383 = vmatprep.subr.bf16.mxu0 %v4800_v0  ;;  %v5082_v47 = vpack.c.bf16 %v59_v44, %v58_v43 }
 0x22b   :  { %4588 = vpow2.f32 %v380_v48 }
 0x22c   :  { %4590 = vpow2.f32 %v382_v50 }
 0x22d   :  { %4592 = vpow2.f32 %v384_v28  ;;  %4385 = vmatpush3.bf16.msra.mxu0 %v5072_v42 }
 0x22e   :  { %4386 = vmatprep.subr.bf16.mxu0 %v4800_v0 }
 0x231   :  { %4388 = vmatpush3.bf16.msra.mxu0 %v5082_v47 }
 0x232   :  { %4401 = vmatprep.subr.bf16.mxu0 %v4800_v0 }
 0x234   :  { %v4587_v52 = vpop.eup %4586 }
 0x235   :  { %v4589_v53 = vpop.eup %4588  ;;  %391 = vperm.xlu1 %4576, %v4587_v52  }
 0x236   :  { %394 = vperm.xlu0 %4577, %v4589_v53   ;;  %v4591_v54 = vpop.eup %4590 }
 0x237   :  { %v4593_v55 = vpop.eup %4592 }
 0x239   :  { %397 = vperm.xlu1 %4576, %v4591_v54  }
 0x23d   :  { %400 = vperm.xlu1 %4576, %v4593_v55  }
 0x2b4   :  { %v392_v57 = vpop.permute.xlu1 %391 }
 0x2b5   :  { %v395_v58 = vpop.permute.xlu0 %394  ;;  %v405_v61 = vrot.slane %v392_v57, %v5008_v10 }
 0x2b6   :  { %v409_v60 = vrot.slane %v395_v58, %v5008_v10 }
 0x2b8   :  { %v398_v59 = vpop.permute.xlu1 %397  ;;  %v418_v2 = vsel %vm342_vm2, %v409_v60, %v405_v61 }
 0x2b9   :  { %v413_v62 = vrot.slane %v398_v59, %v5008_v10 }
 0x2bb   :  { %v419_v3 = vsel %vm344_vm3, %v413_v62, %v418_v2 }
 0x2bc   :  { %v401_v63 = vpop.permute.xlu1 %400 }
 0x2bd   :  { %v417_v1 = vrot.slane %v401_v63, %v5008_v10 }
 0x2bf   :  { %v420_v6 = vsel %vm346_vm4, %v417_v1, %v419_v3 }
 0x2c0   :  { %v422_v7 = vsel %vm349_vm5, %v420_v6, 0.0 }
 0x2c1   :  { %423 = vadd.xlane.f32.xlu1 %v422_v7 }
 0x2d2   :  { %515 = vperm.xlu1 %4576, %v503_v8  }
 0x34e   :  { %v424_v9 = vpop.xlane.xlu1 %423 }
 0x34f   :  { %4594 = vrcp.f32 %v424_v9 }
 0x359   :  { %v4595_v12 = vpop.eup %4594 }
 0x35a   :  { %v430_v13 = vrot.slane %v4595_v12, %v4974_v37  ;;  %v434_v15 = vrot.slane %v4595_v12, %v5019_v32  ;;  %v438_v19 = vrot.slane %v4595_v12, %v5022_v33  ;;  %v442_v25 = vrot.slane %v4595_v12, %v5025_v34 }
 0x35c   :  { %v447_v14 = vmul.f32 %v4587_v52, %v430_v13  ;;  %v448_v18 = vmul.f32 %v4589_v53, %v434_v15  ;;  %v449_v24 = vmul.f32 %v4591_v54, %v438_v19  ;;  %v450_v26 = vmul.f32 %v4593_v55, %v442_v25 }
 0x35e   :  { %453 = vperm.xlu0 %4577, %v447_v14  }
 0x362   :  { %458 = vperm.xlu0 %4577, %v448_v18  }
 0x366   :  { %463 = vperm.xlu0 %4577, %v449_v24  }
 0x36a   :  { %468 = vperm.xlu0 %4577, %v450_v26  }
 0x3dd   :  { %v454_v48 = vpop.permute.xlu0 %453 }
 0x3de   :  { %v471_v49 = vmul.f32 %v454_v48, %v4909_v16 }
 0x3e0   :  { %v475_v50 = vsel %vm73_vm1, %v471_v49, 0.0  ;;  %v5112_v49 = vld [vmem:[%s5898_s7] ss:$0 sm:$0xff] }
 0x3e1   :  { %v476_v28 = vrot.slane %v475_v50, 4  ;;  %v459_v52 = vpop.permute.xlu0 %458 }
 0x3e2   :  { %v472_v53 = vmul.f32 %v459_v52, %v4926_v20  ;;  %v5118_v52 = vld [vmem:[%s5899_s8] ss:$0 sm:$0xff] }
 0x3e3   :  { %v477_v55 = vadd.f32 %v476_v28, %v475_v50  ;;  %v516_v50 = vpop.permute.xlu1 %515 }
 0x3e4   :  { %v482_v54 = vsel %vm73_vm1, %v472_v53, 0.0  ;;  %v524_v28 = vmul.f32 %v5112_v49, %v516_v50 }
 0x3e5   :  { %v483_v57 = vrot.slane %v482_v54, 4  ;;  %v464_v58 = vpop.permute.xlu0 %463  ;;  %v478_v62 = vrot.slane %v477_v55, 2 }
 0x3e6   :  { %v473_v59 = vmul.f32 %v464_v58, %v4931_v21 }
 0x3e7   :  { %v484_v60 = vadd.f32 %v483_v57, %v482_v54  ;;  %v479_v9 = vadd.f32 %v478_v62, %v477_v55 }
 0x3e8   :  { %v489_v61 = vsel %vm73_vm1, %v473_v59, 0.0 }
 0x3e9   :  { %v485_v63 = vrot.slane %v484_v60, 2  ;;  %v490_v1 = vrot.slane %v489_v61, 4  ;;  %v469_v2 = vpop.permute.xlu0 %468  ;;  %v480_v19 = vrot.slane %v479_v9, 1 }
 0x3ea   :  { %v474_v3 = vmul.f32 %v469_v2, %v4945_v23 }
 0x3eb   :  { %v486_v6 = vadd.f32 %v485_v63, %v484_v60  ;;  %v491_v7 = vadd.f32 %v490_v1, %v489_v61  ;;  %v481_v35 = vadd.f32 %v480_v19, %v479_v9 }
 0x3ec   :  { %v496_v8 = vsel %vm73_vm1, %v474_v3, 0.0 }
 0x3ed   :  { %v492_v12 = vrot.slane %v491_v7, 2  ;;  %v497_v13 = vrot.slane %v496_v8, 4  ;;  %v487_v14 = vrot.slane %v486_v6, 1 }
 0x3ef   :  { %v493_v15 = vadd.f32 %v492_v12, %v491_v7  ;;  %v498_v18 = vadd.f32 %v497_v13, %v496_v8  ;;  %v488_v26 = vadd.f32 %v487_v14, %v486_v6 }
 0x3f1   :  { %v494_v24 = vrot.slane %v493_v15, 1  ;;  %v499_v25 = vrot.slane %v498_v18, 2  ;;  %v508_v39 = vsel %vm342_vm2, %v488_v26, %v481_v35 }
 0x3f3   :  { %v500_v27 = vadd.f32 %v499_v25, %v498_v18  ;;  %v495_v29 = vadd.f32 %v494_v24, %v493_v15 }
 0x3f5   :  { %v501_v36 = vrot.slane %v500_v27, 1  ;;  %v509_v43 = vsel %vm344_vm3, %v495_v29, %v508_v39 }
 0x3f7   :  { %v502_v40 = vadd.f32 %v501_v36, %v500_v27 }
 0x3f9   :  { %v510_v44 = vsel %vm346_vm4, %v502_v40, %v509_v43 }
 0x3fa   :  { %v512_v48 = vsel %vm73_vm1, %v510_v44, 0.0 }
 0x3fb   :  { %4070 = vmatmul.mubr.msk.f32.vlgmr.msra.gmra.mrb[4].mxu0 %vm171_vm6, %v512_v48 }
 0x3fc   :  { %4403 = vmatpush3.bf16.msra.mxu0 %v5052_v30  ;;  %4107 = vmatprep.mubr.msk.f32.mxu0 %vm4801_vm0, %v4802_v4 }
 0x3fd   :  { %4404 = vmatprep.subr.bf16.mxu0 %v4800_v0 }
 0x400   :  { %4406 = vmatpush3.bf16.msra.mxu0 %v5062_v38 }
 0x401   :  { %4407 = vmatprep.subr.bf16.mxu0 %v4800_v0 }
 0x404   :  { %4409 = vmatpush3.bf16.msra.mxu0 %v5072_v42 }
 0x405   :  { %4410 = vmatprep.subr.bf16.mxu0 %v4800_v0 }
 0x408   :  { %4412 = vmatpush3.bf16.msra.mxu0 %v5082_v47 }
 0x409   :  { %4425 = vmatprep.subr.bf16.mxu0 %v4800_v0 }
 0x4ce   :  { %v594_v53 = vpop.f32.mrb[4].mxu0 }
 0x4cf   :  { %v595_v54 = vadd.f32 %v594_v53, %v524_v28  ;;  %v4071_v55 = vpop.f32.mrb[5].mxu0 }
 0x4d1   :  { %v604_v57 = vadd.f32 %v5118_v52, %v595_v54 }
 0x4d3   :  { %4596 = vtanh.f32 %v604_v57  ;;  %v3829_v59 = vmul.f32 -1.442695, %v604_v57 }
 0x4d5   :  { %4598 = vpow2.f32 %v3829_v59 }
 0x4dd   :  { %v4597_v58 = vpop.eup %4596 }
 0x4de   :  { %614 = vrot.lane.b32.xlu0 %v4597_v58, %s4805_s30 }
 0x4df   :  { %v4599_v60 = vpop.eup %4598 }
 0x4e0   :  { %v608_v61 = vadd.f32 1.0, %v4599_v60 }
 0x4e2   :  { %4600 = vrcp.f32 %v608_v61 }
 0x4ec   :  { %v4601_v62 = vpop.eup %4600 }
 0x4ed   :  { %v612_v2 = vmul.f32 0.0, %v4601_v62 }
 0x550   :  { %v615_v63 = vpop.permute.xlu0 %614 }
 0x551   :  { %v617_v1 = vmul.f32 %v4601_v62, %v615_v63 }
 0x553   :  { %619 = vrot.lane.b32.xlu0 %v617_v1, %s4806_s12 }
 0x5c5   :  { %v620_v3 = vpop.permute.xlu0 %619 }
 0x5c6   :  { %v5123_v6 = vadd.f32 %v620_v3, %v612_v2 }
 0x5c8   :  { %4602 = vtanh.f32 %v5123_v6 }
 0x5d2   :  { %v4603_v7 = vpop.eup %4602 }
 0x5d3   :  { %625 = vrot.lane.b32.xlu0 %v4603_v7, %s4805_s30 }
 0x645   :  { %v626_v8 = vpop.permute.xlu0 %625 }
 0x646   :  { %v5127_v9 = vmul.f32 %v4601_v62, %v626_v8 }
 0x648   :  { %630 = vrot.lane.b32.xlu0 %v5127_v9, %s4806_s12 }
 0x6ba   :  { %v631_v12 = vpop.permute.xlu0 %630 }
 0x6bb   :  { %v633_v13 = vsel %vm73_vm1, %v631_v12, %v5123_v6 }
 0x6bc   :  { %4089 = vmatmul.mubr.msk.f32.vlgmr.msra.gmra.mrb[2].mxu1 %vm171_vm6, %v633_v13 }
 0x6bd   :  { %4415 = vmatpush3.bf16.msra.mxu1 %v4879_v5  ;;  %4126 = vmatprep.mubr.msk.f32.mxu1 %vm4801_vm0, %v4802_v4 }
 0x6be   :  { %4416 = vmatprep.subr.bf16.mxu1 %v4800_v0 }
 0x6c1   :  { %4418 = vmatpush3.bf16.msra.mxu1 %v4894_v11 }
 0x6c2   :  { %4419 = vmatprep.subr.bf16.mxu1 %v4800_v0 }
 0x6c5   :  { %4421 = vmatpush3.bf16.msra.mxu1 %v4914_v17 }
 0x6c6   :  { %4422 = vmatprep.subr.bf16.mxu1 %v4800_v0 }
 0x6c9   :  { %4424 = vmatpush3.bf16.msra.mxu1 %v4935_v22 }
 0x6ca   :  { %4437 = vmatprep.subr.bf16.mxu1 %v4800_v0 }
 0x78f   :  { %v703_v14 = vpop.f32.mrb[2].mxu1 }
 0x790   :  { %v714_v15 = vrot.slane %v703_v14, %v4967_v31  ;;  %v4090_v18 = vpop.f32.mrb[3].mxu1 }
 0x792   :  { %v715_v19 = vcombine.high %v714_v15, %v714_v15  ;;  %v722_v24 = vrot.slane %v714_v15, %v4967_v31 }
 0x794   :  { %v729_v25 = vrot.slane %v715_v19, %v4967_v31  ;;  %v730_v26 = vcombine.high %v722_v24, %v722_v24  ;;  %v735_v27 = vrot.slane %v722_v24, %v4974_v37 }
 0x796   :  { %v731_v29 = vcombine.high %v729_v25, %v729_v25  ;;  %v739_v35 = vrot.slane %v729_v25, %v4974_v37  ;;  %v743_v36 = vrot.slane %v730_v26, %v4974_v37  ;;  %v752_v39 = vadd.f32 %v735_v27, %v4977_v41 }
 0x798   :  { %v747_v40 = vrot.slane %v731_v29, %v4974_v37  ;;  %v753_v43 = vadd.f32 %v739_v35, %v4983_v46  ;;  %v754_v44 = vadd.f32 %v743_v36, %v4981_v45  ;;  %4604 = vtanh.f32 %v752_v39 }
 0x79a   :  { %v755_v48 = vadd.f32 %v747_v40, %v4988_v51  ;;  %4606 = vtanh.f32 %v753_v43 }
 0x79b   :  { %4608 = vtanh.f32 %v754_v44 }
 0x79c   :  { %4610 = vtanh.f32 %v755_v48 }
 0x7a2   :  { %v4605_v50 = vpop.eup %4604 }
 0x7a3   :  { %v760_v28 = vmul.f32 %v4605_v50, %v4997_v56 }
 0x7a4   :  { %v4607_v53 = vpop.eup %4606 }
 0x7a5   :  { %v4609_v54 = vpop.eup %4608  ;;  %v764_v55 = vsel %vm73_vm1, %v760_v28, 0.0  ;;  %v761_v57 = vmul.f32 %v4607_v53, %v4997_v56 }
 0x7a6   :  { %v4611_v58 = vpop.eup %4610  ;;  %765 = vadd.xlane.f32.xlu1 %v764_v55  ;;  %v762_v61 = vmul.f32 %v4609_v54, %v4997_v56 }
 0x7a7   :  { %v767_v59 = vsel %vm73_vm1, %v761_v57, 0.0  ;;  %v763_v60 = vmul.f32 %v4611_v58, %v4997_v56 }
 0x7a8   :  { %768 = vadd.xlane.f32.xlu0 %v767_v59  ;;  %v770_v63 = vsel %vm73_vm1, %v762_v61, 0.0 }
 0x7a9   :  { %v773_v62 = vsel %vm73_vm1, %v763_v60, 0.0 }
 0x7aa   :  { %774 = vadd.xlane.f32.xlu1 %v773_v62 }
 0x7ac   :  { %771 = vadd.xlane.f32.xlu0 %v770_v63 }
 0x833   :  { %v766_v1 = vpop.xlane.xlu1 %765 }
 0x834   :  { %v783_v8 = vrot.slane %v766_v1, %v5008_v10 }
 0x835   :  { %v769_v2 = vpop.xlane.xlu0 %768 }
 0x836   :  { %v787_v3 = vrot.slane %v769_v2, %v5008_v10 }
 0x837   :  { %v775_v7 = vpop.xlane.xlu1 %774 }
 0x838   :  { %v795_v14 = vrot.slane %v775_v7, %v5008_v10  ;;  %v796_v15 = vsel %vm342_vm2, %v787_v3, %v783_v8 }
 0x839   :  { %v772_v12 = vpop.xlane.xlu0 %771 }
 0x83a   :  { %v791_v13 = vrot.slane %v772_v12, %v5008_v10 }
 0x83c   :  { %v797_v18 = vsel %vm344_vm3, %v791_v13, %v796_v15 }
 0x83d   :  { %v798_v19 = vsel %vm346_vm4, %v795_v14, %v797_v18 }
 0x83e   :  { %v800_v24 = vsel %vm349_vm5, %v798_v19, -inf }
 0x83f   :  { %801 = vmax.xlane.f32.xlu0 %v800_v24 }
 0x8cc   :  { %v802_v25 = vpop.xlane.xlu0 %801 }
 0x8cd   :  { %v807_v26 = vrot.slane %v802_v25, %v4974_v37  ;;  %v811_v27 = vrot.slane %v802_v25, %v5019_v32  ;;  %v815_v29 = vrot.slane %v802_v25, %v5022_v33  ;;  %v819_v35 = vrot.slane %v802_v25, %v5025_v34 }
 0x8cf   :  { %v824_v36 = vsub.f32 %v766_v1, %v807_v26  ;;  %v825_v39 = vsub.f32 %v769_v2, %v811_v27  ;;  %v826_v40 = vsub.f32 %v772_v12, %v815_v29  ;;  %v827_v48 = vsub.f32 %v775_v7, %v819_v35  ;;  %v3831_v35 = vld [vmem:[%s5896_s1 + $0x4] sm:$0xf] }
 0x8d1   :  { %v828_v43 = vmul.f32 1.442695, %v824_v36  ;;  %v830_v44 = vmul.f32 1.442695, %v825_v39  ;;  %v832_v50 = vmul.f32 1.442695, %v826_v40 }
 0x8d2   :  { %v834_v28 = vmul.f32 1.442695, %v827_v48 }
 0x8d3   :  { %4612 = vpow2.f32 %v828_v43 }
 0x8d4   :  { %4614 = vpow2.f32 %v830_v44 }
 0x8d5   :  { %4616 = vpow2.f32 %v832_v50 }
 0x8d6   :  { %4618 = vpow2.f32 %v834_v28 }
 0x8dd   :  { %v4613_v53 = vpop.eup %4612 }
 0x8de   :  { %v4615_v54 = vpop.eup %4614  ;;  %841 = vperm.xlu1 %4576, %v4613_v53  }
 0x8df   :  { %844 = vperm.xlu0 %4577, %v4615_v54   ;;  %v4617_v55 = vpop.eup %4616 }
 0x8e0   :  { %v4619_v57 = vpop.eup %4618 }
 0x8e2   :  { %847 = vperm.xlu1 %4576, %v4617_v55  }
 0x8e6   :  { %850 = vperm.xlu1 %4576, %v4619_v57  }
 0x95d   :  { %v842_v58 = vpop.permute.xlu1 %841 }
 0x95e   :  { %v845_v59 = vpop.permute.xlu0 %844  ;;  %v855_v62 = vrot.slane %v842_v58, %v5008_v10 }
 0x95f   :  { %v859_v61 = vrot.slane %v845_v59, %v5008_v10 }
 0x961   :  { %v848_v60 = vpop.permute.xlu1 %847  ;;  %v868_v3 = vsel %vm342_vm2, %v859_v61, %v855_v62 }
 0x962   :  { %v863_v63 = vrot.slane %v848_v60, %v5008_v10 }
 0x964   :  { %v869_v7 = vsel %vm344_vm3, %v863_v63, %v868_v3 }
 0x965   :  { %v851_v1 = vpop.permute.xlu1 %850 }
 0x966   :  { %v867_v2 = vrot.slane %v851_v1, %v5008_v10 }
 0x968   :  { %v870_v8 = vsel %vm346_vm4, %v867_v2, %v869_v7 }
 0x969   :  { %v872_v12 = vsel %vm349_vm5, %v870_v8, 0.0 }
 0x96a   :  { %873 = vadd.xlane.f32.xlu0 %v872_v12 }
 0x9f7   :  { %v874_v13 = vpop.xlane.xlu0 %873 }
 0x9f8   :  { %4620 = vrcp.f32 %v874_v13 }
 0xa02   :  { %v4621_v14 = vpop.eup %4620 }
 0xa03   :  { %v880_v15 = vrot.slane %v4621_v14, %v4974_v37  ;;  %v884_v19 = vrot.slane %v4621_v14, %v5019_v32  ;;  %v888_v25 = vrot.slane %v4621_v14, %v5022_v33  ;;  %v892_v27 = vrot.slane %v4621_v14, %v5025_v34 }
 0xa05   :  { %v897_v18 = vmul.f32 %v4613_v53, %v880_v15  ;;  %v898_v24 = vmul.f32 %v4615_v54, %v884_v19  ;;  %v899_v26 = vmul.f32 %v4617_v55, %v888_v25  ;;  %v900_v29 = vmul.f32 %v4619_v57, %v892_v27 }
 0xa07   :  { %903 = vperm.xlu1 %4576, %v897_v18  }
 0xa0b   :  { %908 = vperm.xlu1 %4576, %v898_v24  }
 0xa0f   :  { %913 = vperm.xlu1 %4576, %v899_v26  }
 0xa13   :  { %918 = vperm.xlu1 %4576, %v900_v29  }
 0xa17   :  { %963 = vrot.lane.b32.xlu1 %v5127_v9, %s4805_s30 }
 0xa1b   :  { %969 = vperm.xlu1 %4576, %v3831_v35  }
 0xa86   :  { %v904_v36 = vpop.permute.xlu1 %903 }
 0xa87   :  { %v921_v39 = vmul.f32 %v904_v36, %v4909_v16 }
 0xa89   :  { %v925_v40 = vsel %vm73_vm1, %v921_v39, 0.0 }
 0xa8a   :  { %v926_v43 = vrot.slane %v925_v40, 4  ;;  %v909_v44 = vpop.permute.xlu1 %908 }
 0xa8b   :  { %v922_v48 = vmul.f32 %v909_v44, %v4926_v20 }
 0xa8c   :  { %v927_v28 = vadd.f32 %v926_v43, %v925_v40 }
 0xa8d   :  { %v932_v50 = vsel %vm73_vm1, %v922_v48, 0.0 }
 0xa8e   :  { %v933_v53 = vrot.slane %v932_v50, 4  ;;  %v914_v54 = vpop.permute.xlu1 %913  ;;  %v928_v58 = vrot.slane %v927_v28, 2 }
 0xa8f   :  { %v923_v9 = vmul.f32 %v914_v54, %v4931_v21 }
 0xa90   :  { %v934_v55 = vadd.f32 %v933_v53, %v932_v50  ;;  %v929_v1 = vadd.f32 %v928_v58, %v927_v28 }
 0xa91   :  { %v939_v57 = vsel %vm73_vm1, %v923_v9, 0.0 }
 0xa92   :  { %v935_v59 = vrot.slane %v934_v55, 2  ;;  %v940_v60 = vrot.slane %v939_v57, 4  ;;  %v919_v16 = vpop.permute.xlu1 %918  ;;  %v930_v21 = vrot.slane %v929_v1, 1 }
 0xa93   :  { %v924_v61 = vmul.f32 %v919_v16, %v4945_v23 }
 0xa94   :  { %v936_v62 = vadd.f32 %v935_v59, %v934_v55  ;;  %v941_v63 = vadd.f32 %v940_v60, %v939_v57  ;;  %v931_v24 = vadd.f32 %v930_v21, %v929_v1 }
 0xa95   :  { %v946_v20 = vsel %vm73_vm1, %v924_v61, 0.0 }
 0xa96   :  { %v942_v2 = vrot.slane %v941_v63, 2  ;;  %v947_v3 = vrot.slane %v946_v20, 4  ;;  %v937_v7 = vrot.slane %v936_v62, 1  ;;  %v964_v35 = vpop.permute.xlu1 %963 }
 0xa98   :  { %v943_v8 = vadd.f32 %v942_v2, %v941_v63  ;;  %v948_v12 = vadd.f32 %v947_v3, %v946_v20  ;;  %v938_v15 = vadd.f32 %v937_v7, %v936_v62 }
 0xa9a   :  { %v944_v13 = vrot.slane %v943_v8, 1  ;;  %v949_v14 = vrot.slane %v948_v12, 2  ;;  %v959_v23 = vsel %vm342_vm2, %v938_v15, %v931_v24  ;;  %v970_v39 = vpop.permute.xlu1 %969 }
 0xa9b   :  { %v972_v40 = vmul.f32 %v5112_v49, %v970_v39 }
 0xa9c   :  { %v950_v18 = vadd.f32 %v949_v14, %v948_v12  ;;  %v945_v19 = vadd.f32 %v944_v13, %v943_v8 }
 0xa9e   :  { %v951_v25 = vrot.slane %v950_v18, 1  ;;  %v960_v27 = vsel %vm344_vm3, %v945_v19, %v959_v23 }
 0xaa0   :  { %v952_v26 = vadd.f32 %v951_v25, %v950_v18 }
 0xaa2   :  { %v961_v29 = vsel %vm346_vm4, %v952_v26, %v960_v27 }
 0xaa3   :  { %v966_v36 = vsel %vm73_vm1, %v961_v29, %v964_v35 }
 0xaa4   :  { %4108 = vmatmul.mubr.msk.f32.vlgmr.msra.gmra.mrb[6].mxu0 %vm171_vm6, %v966_v36 }
 0xaa5   :  { %4427 = vmatpush3.bf16.msra.mxu0 %v5052_v30  ;;  %4145 = vmatprep.mubr.msk.f32.mxu0 %vm4801_vm0, %v4802_v4 }
 0xaa6   :  { %4428 = vmatprep.subr.bf16.mxu0 %v4800_v0 }
 0xaa9   :  { %4430 = vmatpush3.bf16.msra.mxu0 %v5062_v38 }
 0xaaa   :  { %4431 = vmatprep.subr.bf16.mxu0 %v4800_v0 }
 0xaad   :  { %4433 = vmatpush3.bf16.msra.mxu0 %v5072_v42 }
 0xaae   :  { %4434 = vmatprep.subr.bf16.mxu0 %v4800_v0 }
 0xab1   :  { %4436 = vmatpush3.bf16.msra.mxu0 %v5082_v47 }
 0xab2   :  { %4449 = vmatprep.subr.bf16.mxu0 %v4800_v0 }
 0xb77   :  { %v1042_v43 = vpop.f32.mrb[6].mxu0 }
 0xb78   :  { %v1043_v44 = vadd.f32 %v1042_v43, %v972_v40  ;;  %v4109_v48 = vpop.f32.mrb[7].mxu0 }
 0xb7a   :  { %v1046_v50 = vadd.f32 %v5118_v52, %v1043_v44 }
 0xb7c   :  { %4622 = vtanh.f32 %v1046_v50  ;;  %v3833_v53 = vmul.f32 -1.442695, %v1046_v50 }
 0xb7e   :  { %4624 = vpow2.f32 %v3833_v53 }
 0xb86   :  { %v4623_v28 = vpop.eup %4622 }
 0xb87   :  { %1056 = vrot.lane.b32.xlu1 %v4623_v28, %s4805_s30 }
 0xb88   :  { %v4625_v54 = vpop.eup %4624 }
 0xb89   :  { %v1050_v9 = vadd.f32 1.0, %v4625_v54 }
 0xb8b   :  { %4626 = vrcp.f32 %v1050_v9 }
 0xb95   :  { %v4627_v55 = vpop.eup %4626 }
 0xb96   :  { %v1054_v59 = vmul.f32 %v4627_v55, %v5123_v6 }
 0xbf9   :  { %v1057_v57 = vpop.permute.xlu1 %1056 }
 0xbfa   :  { %v1059_v58 = vmul.f32 %v4627_v55, %v1057_v57 }
 0xbfc   :  { %1061 = vrot.lane.b32.xlu1 %v1059_v58, %s4806_s12 }
 0xc6e   :  { %v1062_v60 = vpop.permute.xlu1 %1061 }
 0xc6f   :  { %v5220_v16 = vadd.f32 %v1062_v60, %v1054_v59 }
 0xc71   :  { %4628 = vtanh.f32 %v5220_v16 }
 0xc7b   :  { %v4629_v61 = vpop.eup %4628 }
 0xc7c   :  { %1067 = vrot.lane.b32.xlu0 %v4629_v61, %s4805_s30 }
 0xcee   :  { %v1068_v62 = vpop.permute.xlu0 %1067 }
 0xcef   :  { %v5224_v63 = vmul.f32 %v4627_v55, %v1068_v62 }
 0xcf1   :  { %1072 = vrot.lane.b32.xlu1 %v5224_v63, %s4806_s12 }
 0xd63   :  { %v1073_v20 = vpop.permute.xlu1 %1072 }
 0xd64   :  { %v1075_v1 = vsel %vm73_vm1, %v1073_v20, %v5220_v16 }
 0xd65   :  { %4127 = vmatmul.mubr.msk.f32.vlgmr.msra.gmra.mrb[4].mxu1 %vm171_vm6, %v1075_v1 }
 0xd66   :  { %4439 = vmatpush3.bf16.msra.mxu1 %v4879_v5  ;;  %4164 = vmatprep.mubr.msk.f32.mxu1 %vm4801_vm0, %v4802_v4 }
 0xd67   :  { %4440 = vmatprep.subr.bf16.mxu1 %v4800_v0 }
 0xd6a   :  { %4442 = vmatpush3.bf16.msra.mxu1 %v4894_v11 }
 0xd6b   :  { %4443 = vmatprep.subr.bf16.mxu1 %v4800_v0 }
 0xd6e   :  { %4445 = vmatpush3.bf16.msra.mxu1 %v4914_v17 }
 0xd6f   :  { %4446 = vmatprep.subr.bf16.mxu1 %v4800_v0 }
 0xd72   :  { %4448 = vmatpush3.bf16.msra.mxu1 %v4935_v22 }
 0xd73   :  { %4461 = vmatprep.subr.bf16.mxu1 %v4800_v0 }
 0xe38   :  { %v1145_v6 = vpop.f32.mrb[4].mxu1 }
 0xe39   :  { %v1156_v2 = vrot.slane %v1145_v6, %v4967_v31  ;;  %v4128_v3 = vpop.f32.mrb[5].mxu1 }
 0xe3b   :  { %v1157_v7 = vcombine.high %v1156_v2, %v1156_v2  ;;  %v1164_v8 = vrot.slane %v1156_v2, %v4967_v31 }
 0xe3d   :  { %v1171_v12 = vrot.slane %v1157_v7, %v4967_v31  ;;  %v1172_v21 = vcombine.high %v1164_v8, %v1164_v8  ;;  %v1177_v13 = vrot.slane %v1164_v8, %v4974_v37 }
 0xe3f   :  { %v1173_v14 = vcombine.high %v1171_v12, %v1171_v12  ;;  %v1181_v15 = vrot.slane %v1171_v12, %v4974_v37  ;;  %v1185_v18 = vrot.slane %v1172_v21, %v4974_v37  ;;  %v1194_v19 = vadd.f32 %v1177_v13, %v4977_v41 }
 0xe41   :  { %v1189_v24 = vrot.slane %v1173_v14, %v4974_v37  ;;  %v1195_v25 = vadd.f32 %v1181_v15, %v4983_v46  ;;  %v1196_v26 = vadd.f32 %v1185_v18, %v4981_v45  ;;  %4630 = vtanh.f32 %v1194_v19 }
 0xe43   :  { %v1197_v23 = vadd.f32 %v1189_v24, %v4988_v51  ;;  %4632 = vtanh.f32 %v1195_v25 }
 0xe44   :  { %4634 = vtanh.f32 %v1196_v26 }
 0xe45   :  { %4636 = vtanh.f32 %v1197_v23 }
 0xe4b   :  { %v4631_v27 = vpop.eup %4630 }
 0xe4c   :  { %v1202_v29 = vmul.f32 %v4631_v27, %v4997_v56 }
 0xe4d   :  { %v4633_v35 = vpop.eup %4632 }
 0xe4e   :  { %v4635_v36 = vpop.eup %4634  ;;  %v1206_v39 = vsel %vm73_vm1, %v1202_v29, 0.0  ;;  %v1203_v40 = vmul.f32 %v4633_v35, %v4997_v56 }
 0xe4f   :  { %v4637_v43 = vpop.eup %4636  ;;  %1207 = vadd.xlane.f32.xlu1 %v1206_v39  ;;  %v1204_v44 = vmul.f32 %v4635_v36, %v4997_v56 }
 0xe50   :  { %v1209_v48 = vsel %vm73_vm1, %v1203_v40, 0.0  ;;  %v1205_v28 = vmul.f32 %v4637_v43, %v4997_v56 }
 0xe51   :  { %1210 = vadd.xlane.f32.xlu0 %v1209_v48  ;;  %v1212_v50 = vsel %vm73_vm1, %v1204_v44, 0.0 }
 0xe52   :  { %v1215_v53 = vsel %vm73_vm1, %v1205_v28, 0.0 }
 0xe53   :  { %1213 = vadd.xlane.f32.xlu1 %v1212_v50 }
 0xe57   :  { %1216 = vadd.xlane.f32.xlu1 %v1215_v53 }
 0xedc   :  { %v1208_v54 = vpop.xlane.xlu1 %1207 }
 0xedd   :  { %v1225_v58 = vrot.slane %v1208_v54, %v5008_v10 }
 0xede   :  { %v1211_v9 = vpop.xlane.xlu0 %1210 }
 0xedf   :  { %v1229_v55 = vrot.slane %v1211_v9, %v5008_v10 }
 0xee0   :  { %v1214_v57 = vpop.xlane.xlu1 %1213 }
 0xee1   :  { %v1233_v59 = vrot.slane %v1214_v57, %v5008_v10  ;;  %v1238_v60 = vsel %vm342_vm2, %v1229_v55, %v1225_v58 }
 0xee3   :  { %v1239_v56 = vsel %vm344_vm3, %v1233_v59, %v1238_v60 }
 0xee4   :  { %v1217_v61 = vpop.xlane.xlu1 %1216 }
 0xee5   :  { %v1237_v62 = vrot.slane %v1217_v61, %v5008_v10 }
 0xee7   :  { %v1240_v20 = vsel %vm346_vm4, %v1237_v62, %v1239_v56 }
 0xee8   :  { %v1242_v1 = vsel %vm349_vm5, %v1240_v20, -inf }
 0xee9   :  { %1243 = vmax.xlane.f32.xlu1 %v1242_v1  ;;  %v3835_v1 = vld [vmem:[%s5896_s1 + $0x8] sm:$0xf] }
 0xf76   :  { %v1244_v6 = vpop.xlane.xlu1 %1243 }
 0xf77   :  { %v1249_v2 = vrot.slane %v1244_v6, %v4974_v37  ;;  %v1253_v3 = vrot.slane %v1244_v6, %v5019_v32  ;;  %v1257_v7 = vrot.slane %v1244_v6, %v5022_v33  ;;  %v1261_v8 = vrot.slane %v1244_v6, %v5025_v34 }
 0xf79   :  { %v1266_v12 = vsub.f32 %v1208_v54, %v1249_v2  ;;  %v1267_v21 = vsub.f32 %v1211_v9, %v1253_v3  ;;  %v1269_v13 = vsub.f32 %v1217_v61, %v1261_v8  ;;  %v1268_v14 = vsub.f32 %v1214_v57, %v1257_v7  ;;  %v5292_v2 = vld [vmem:[%s5893_s0] sm:$0xff] }
 0xf7b   :  { %v1270_v15 = vmul.f32 1.442695, %v1266_v12  ;;  %v1272_v18 = vmul.f32 1.442695, %v1267_v21  ;;  %v1276_v19 = vmul.f32 1.442695, %v1269_v13 }
 0xf7c   :  { %v1274_v24 = vmul.f32 1.442695, %v1268_v14 }
 0xf7d   :  { %4638 = vpow2.f32 %v1270_v15 }
 0xf7e   :  { %4640 = vpow2.f32 %v1272_v18 }
 0xf7f   :  { %4642 = vpow2.f32 %v1276_v19  ;;  %v5306_v19 = vld [vmem:[%s5893_s0 + $0x10] sm:$0xff] }
 0xf80   :  { %4644 = vpow2.f32 %v1274_v24 }
 0xf87   :  { %v4639_v25 = vpop.eup %4638 }
 0xf88   :  { %v4641_v26 = vpop.eup %4640  ;;  %1283 = vperm.xlu0 %4577, %v4639_v25  }
 0xf89   :  { %1286 = vperm.xlu1 %4576, %v4641_v26   ;;  %v4643_v23 = vpop.eup %4642 }
 0xf8a   :  { %v4645_v27 = vpop.eup %4644 }
 0xf8c   :  { %1292 = vperm.xlu0 %4577, %v4643_v23  }
 0xf8d   :  { %1289 = vperm.xlu1 %4576, %v4645_v27  }
0x1007   :  { %v1284_v29 = vpop.permute.xlu0 %1283 }
0x1008   :  { %v1287_v35 = vpop.permute.xlu1 %1286  ;;  %v1297_v39 = vrot.slane %v1284_v29, %v5008_v10 }
0x1009   :  { %v1301_v36 = vrot.slane %v1287_v35, %v5008_v10 }
0x100b   :  { %v1293_v40 = vpop.permute.xlu0 %1292  ;;  %v1310_v50 = vsel %vm342_vm2, %v1301_v36, %v1297_v39  ;;  %v5313_v36 = vld [vmem:[%s5893_s0 + $0x18] sm:$0xff] }
0x100c   :  { %v1290_v43 = vpop.permute.xlu1 %1289  ;;  %v1309_v44 = vrot.slane %v1293_v40, %v5008_v10 }
0x100d   :  { %v1305_v48 = vrot.slane %v1290_v43, %v5008_v10 }
0x100f   :  { %v1311_v28 = vsel %vm344_vm3, %v1305_v48, %v1310_v50 }
0x1010   :  { %v1312_v53 = vsel %vm346_vm4, %v1309_v44, %v1311_v28 }
0x1011   :  { %v1314_v54 = vsel %vm349_vm5, %v1312_v53, 0.0 }
0x1012   :  { %1315 = vadd.xlane.f32.xlu1 %v1314_v54 }
0x109f   :  { %v1316_v9 = vpop.xlane.xlu1 %1315 }
0x10a0   :  { %4646 = vrcp.f32 %v1316_v9 }
0x10aa   :  { %v4647_v55 = vpop.eup %4646 }
0x10ab   :  { %v1322_v57 = vrot.slane %v4647_v55, %v4974_v37  ;;  %v1326_v59 = vrot.slane %v4647_v55, %v5019_v32  ;;  %v1330_v61 = vrot.slane %v4647_v55, %v5022_v33  ;;  %v1334_v56 = vrot.slane %v4647_v55, %v5025_v34 }
0x10ad   :  { %v1339_v58 = vmul.f32 %v4639_v25, %v1322_v57  ;;  %v1340_v60 = vmul.f32 %v4641_v26, %v1326_v59  ;;  %v1341_v62 = vmul.f32 %v4645_v27, %v1330_v61  ;;  %v1342_v20 = vmul.f32 %v4643_v23, %v1334_v56 }
0x10af   :  { %1345 = vperm.xlu0 %4577, %v1339_v58  }
0x10b3   :  { %1350 = vperm.xlu0 %4577, %v1340_v60  }
0x10b7   :  { %1355 = vperm.xlu0 %4577, %v1341_v62  }
0x10bb   :  { %1360 = vperm.xlu0 %4577, %v1342_v20  }
0x10bf   :  { %1405 = vrot.lane.b32.xlu0 %v5224_v63, %s4805_s30  ;;  %v5299_v63 = vld [vmem:[%s5893_s0 + $0x8] sm:$0xff] }
0x10c3   :  { %1411 = vperm.xlu0 %4577, %v3835_v1  }
0x112e   :  { %v1346_v6 = vpop.permute.xlu0 %1345 }
0x112f   :  { %v1363_v3 = vmul.f32 %v5292_v2, %v1346_v6 }
0x1131   :  { %v1367_v7 = vsel %vm73_vm1, %v1363_v3, 0.0 }
0x1132   :  { %v1368_v8 = vrot.slane %v1367_v7, 4  ;;  %v1351_v12 = vpop.permute.xlu0 %1350 }
0x1133   :  { %v1364_v21 = vmul.f32 %v5299_v63, %v1351_v12 }
0x1134   :  { %v1369_v14 = vadd.f32 %v1368_v8, %v1367_v7 }
0x1135   :  { %v1374_v13 = vsel %vm73_vm1, %v1364_v21, 0.0 }
0x1136   :  { %v1375_v15 = vrot.slane %v1374_v13, 4  ;;  %v1356_v18 = vpop.permute.xlu0 %1355  ;;  %v1370_v23 = vrot.slane %v1369_v14, 2 }
0x1137   :  { %v1365_v24 = vmul.f32 %v5306_v19, %v1356_v18 }
0x1138   :  { %v1376_v25 = vadd.f32 %v1375_v15, %v1374_v13  ;;  %v1371_v48 = vadd.f32 %v1370_v23, %v1369_v14 }
0x1139   :  { %v1381_v26 = vsel %vm73_vm1, %v1365_v24, 0.0 }
0x113a   :  { %v1377_v27 = vrot.slane %v1376_v25, 2  ;;  %v1382_v29 = vrot.slane %v1381_v26, 4  ;;  %v1361_v35 = vpop.permute.xlu0 %1360  ;;  %v1372_v55 = vrot.slane %v1371_v48, 1 }
0x113b   :  { %v1366_v39 = vmul.f32 %v5313_v36, %v1361_v35 }
0x113c   :  { %v1378_v40 = vadd.f32 %v1377_v27, %v1376_v25  ;;  %v1383_v43 = vadd.f32 %v1382_v29, %v1381_v26  ;;  %v1373_v62 = vadd.f32 %v1372_v55, %v1371_v48 }
0x113d   :  { %v1388_v44 = vsel %vm73_vm1, %v1366_v39, 0.0 }
0x113e   :  { %v1384_v50 = vrot.slane %v1383_v43, 2  ;;  %v1389_v28 = vrot.slane %v1388_v44, 4  ;;  %v1379_v53 = vrot.slane %v1378_v40, 1  ;;  %v1406_v7 = vpop.permute.xlu0 %1405 }
0x1140   :  { %v1385_v54 = vadd.f32 %v1384_v50, %v1383_v43  ;;  %v1390_v9 = vadd.f32 %v1389_v28, %v1388_v44  ;;  %v1380_v59 = vadd.f32 %v1379_v53, %v1378_v40 }
0x1142   :  { %v1386_v57 = vrot.slane %v1385_v54, 1  ;;  %v1391_v58 = vrot.slane %v1390_v9, 2  ;;  %v1401_v1 = vsel %vm342_vm2, %v1380_v59, %v1373_v62  ;;  %v1412_v12 = vpop.permute.xlu0 %1411 }
0x1143   :  { %v1414_v21 = vmul.f32 %v5112_v49, %v1412_v12 }
0x1144   :  { %v1392_v60 = vadd.f32 %v1391_v58, %v1390_v9  ;;  %v1387_v61 = vadd.f32 %v1386_v57, %v1385_v54 }
0x1146   :  { %v1393_v56 = vrot.slane %v1392_v60, 1  ;;  %v1402_v6 = vsel %vm344_vm3, %v1387_v61, %v1401_v1 }
0x1148   :  { %v1394_v20 = vadd.f32 %v1393_v56, %v1392_v60 }
0x114a   :  { %v1403_v3 = vsel %vm346_vm4, %v1394_v20, %v1402_v6 }
0x114b   :  { %v1408_v8 = vsel %vm73_vm1, %v1403_v3, %v1406_v7  ;;  %v5372_v7 = vld [vmem:[%s5895_s5] ss:$0 sm:$0xff] }
0x114c   :  { %4146 = vmatmul.mubr.msk.f32.vlgmr.msra.gmra.mrb[8].mxu0 %vm171_vm6, %v1408_v8 }
0x114d   :  { %4451 = vmatpush3.bf16.msra.mxu0 %v5052_v30  ;;  %4183 = vmatprep.mubr.msk.f32.mxu0 %vm4801_vm0, %v4802_v4 }
0x114e   :  { %4452 = vmatprep.subr.bf16.mxu0 %v4800_v0 }
0x1151   :  { %4454 = vmatpush3.bf16.msra.mxu0 %v5062_v38 }
0x1152   :  { %4455 = vmatprep.subr.bf16.mxu0 %v4800_v0 }
0x1155   :  { %4457 = vmatpush3.bf16.msra.mxu0 %v5072_v42 }
0x1156   :  { %4458 = vmatprep.subr.bf16.mxu0 %v4800_v0 }
0x1159   :  { %4460 = vmatpush3.bf16.msra.mxu0 %v5082_v47 }
0x115a   :  { %4473 = vmatprep.subr.bf16.mxu0 %v4800_v0 }
0x121f   :  { %v1484_v13 = vpop.f32.mrb[8].mxu0 }
0x1220   :  { %v1485_v14 = vadd.f32 %v1484_v13, %v1414_v21  ;;  %v4147_v15 = vpop.f32.mrb[9].mxu0 }
0x1222   :  { %v1488_v18 = vadd.f32 %v5118_v52, %v1485_v14 }
0x1224   :  { %4648 = vtanh.f32 %v1488_v18  ;;  %v3837_v25 = vmul.f32 -1.442695, %v1488_v18 }
0x1226   :  { %4650 = vpow2.f32 %v3837_v25 }
0x122e   :  { %v4649_v24 = vpop.eup %4648 }
0x122f   :  { %1498 = vrot.lane.b32.xlu0 %v4649_v24, %s4805_s30 }
0x1230   :  { %v4651_v26 = vpop.eup %4650 }
0x1231   :  { %v1492_v23 = vadd.f32 1.0, %v4651_v26 }
0x1233   :  { %4652 = vrcp.f32 %v1492_v23 }
0x123d   :  { %v4653_v27 = vpop.eup %4652 }
0x123e   :  { %v1496_v49 = vmul.f32 %v4653_v27, %v5220_v16 }
0x12a1   :  { %v1499_v29 = vpop.permute.xlu0 %1498 }
0x12a2   :  { %v1501_v35 = vmul.f32 %v4653_v27, %v1499_v29 }
0x12a4   :  { %1503 = vrot.lane.b32.xlu0 %v1501_v35, %s4806_s12 }
0x1316   :  { %v1504_v39 = vpop.permute.xlu0 %1503 }
0x1317   :  { %v5337_v40 = vadd.f32 %v1504_v39, %v1496_v49 }
0x1319   :  { %4654 = vtanh.f32 %v5337_v40 }
0x1323   :  { %v4655_v52 = vpop.eup %4654 }
0x1324   :  { %1509 = vrot.lane.b32.xlu0 %v4655_v52, %s4805_s30 }
0x1396   :  { %v1510_v43 = vpop.permute.xlu0 %1509 }
0x1397   :  { %v5341_v44 = vmul.f32 %v4653_v27, %v1510_v43 }
0x1399   :  { %1514 = vrot.lane.b32.xlu1 %v5341_v44, %s4806_s12 }
0x140b   :  { %v1515_v48 = vpop.permute.xlu1 %1514 }
0x140c   :  { %v1517_v50 = vsel %vm73_vm1, %v1515_v48, %v5337_v40 }
0x140d   :  { %4165 = vmatmul.mubr.msk.f32.vlgmr.msra.gmra.mrb[6].mxu1 %vm171_vm6, %v1517_v50 }
0x140e   :  { %4463 = vmatpush3.bf16.msra.mxu1 %v4879_v5  ;;  %4202 = vmatprep.mubr.msk.f32.mxu1 %vm4801_vm0, %v4802_v4 }
0x140f   :  { %4464 = vmatprep.subr.bf16.mxu1 %v4800_v0 }
0x1412   :  { %4466 = vmatpush3.bf16.msra.mxu1 %v4894_v11 }
0x1413   :  { %4467 = vmatprep.subr.bf16.mxu1 %v4800_v0 }
0x1416   :  { %4469 = vmatpush3.bf16.msra.mxu1 %v4914_v17 }
0x1417   :  { %4470 = vmatprep.subr.bf16.mxu1 %v4800_v0 }
0x141a   :  { %4472 = vmatpush3.bf16.msra.mxu1 %v4935_v22 }
0x141b   :  { %4485 = vmatprep.subr.bf16.mxu1 %v4800_v0 }
0x14e0   :  { %v1587_v16 = vpop.f32.mrb[6].mxu1 }
0x14e1   :  { %v1598_v28 = vrot.slane %v1587_v16, %v4967_v31  ;;  %v4166_v53 = vpop.f32.mrb[7].mxu1 }
0x14e3   :  { %v1599_v54 = vcombine.high %v1598_v28, %v1598_v28  ;;  %v1606_v9 = vrot.slane %v1598_v28, %v4967_v31 }
0x14e5   :  { %v1613_v55 = vrot.slane %v1599_v54, %v4967_v31  ;;  %v1614_v57 = vcombine.high %v1606_v9, %v1606_v9  ;;  %v1619_v58 = vrot.slane %v1606_v9, %v4974_v37 }
0x14e7   :  { %v1615_v59 = vcombine.high %v1613_v55, %v1613_v55  ;;  %v1623_v60 = vrot.slane %v1613_v55, %v4974_v37  ;;  %v1627_v61 = vrot.slane %v1614_v57, %v4974_v37  ;;  %v1636_v62 = vadd.f32 %v1619_v58, %v4977_v41 }
0x14e9   :  { %v1631_v56 = vrot.slane %v1615_v59, %v4974_v37  ;;  %v1637_v20 = vadd.f32 %v1623_v60, %v4983_v46  ;;  %v1638_v1 = vadd.f32 %v1627_v61, %v4981_v45  ;;  %4656 = vtanh.f32 %v1636_v62 }
0x14eb   :  { %v1639_v6 = vadd.f32 %v1631_v56, %v4988_v51  ;;  %4658 = vtanh.f32 %v1637_v20 }
0x14ec   :  { %4660 = vtanh.f32 %v1638_v1 }
0x14ed   :  { %4662 = vtanh.f32 %v1639_v6 }
0x14f3   :  { %v4657_v3 = vpop.eup %4656 }
0x14f4   :  { %v1644_v8 = vmul.f32 %v5372_v7, %v4657_v3 }
0x14f5   :  { %v4659_v12 = vpop.eup %4658 }
0x14f6   :  { %v4661_v21 = vpop.eup %4660  ;;  %v1648_v13 = vsel %vm73_vm1, %v1644_v8, 0.0  ;;  %v1645_v14 = vmul.f32 %v5372_v7, %v4659_v12 }
0x14f7   :  { %v4663_v15 = vpop.eup %4662  ;;  %1649 = vadd.xlane.f32.xlu0 %v1648_v13  ;;  %v1646_v18 = vmul.f32 %v5372_v7, %v4661_v21 }
0x14f8   :  { %v1651_v24 = vsel %vm73_vm1, %v1645_v14, 0.0  ;;  %v1647_v26 = vmul.f32 %v5372_v7, %v4663_v15 }
0x14f9   :  { %1652 = vadd.xlane.f32.xlu1 %v1651_v24  ;;  %v1654_v25 = vsel %vm73_vm1, %v1646_v18, 0.0 }
0x14fa   :  { %v1657_v23 = vsel %vm73_vm1, %v1647_v26, 0.0 }
0x14fb   :  { %1655 = vadd.xlane.f32.xlu0 %v1654_v25 }
0x14ff   :  { %1658 = vadd.xlane.f32.xlu0 %v1657_v23 }
0x1584   :  { %v1650_v27 = vpop.xlane.xlu0 %1649 }
0x1585   :  { %v1667_v39 = vrot.slane %v1650_v27, %v5008_v10 }
0x1586   :  { %v1653_v29 = vpop.xlane.xlu1 %1652 }
0x1587   :  { %v1671_v35 = vrot.slane %v1653_v29, %v5008_v10 }
0x1588   :  { %v1656_v49 = vpop.xlane.xlu0 %1655 }
0x1589   :  { %v1675_v52 = vrot.slane %v1656_v49, %v5008_v10  ;;  %v1680_v43 = vsel %vm342_vm2, %v1671_v35, %v1667_v39 }
0x158b   :  { %v1681_v16 = vsel %vm344_vm3, %v1675_v52, %v1680_v43 }
0x158c   :  { %v1659_v48 = vpop.xlane.xlu0 %1658 }
0x158d   :  { %v1679_v50 = vrot.slane %v1659_v48, %v5008_v10 }
0x158f   :  { %v1682_v28 = vsel %vm346_vm4, %v1679_v50, %v1681_v16 }
0x1590   :  { %v1684_v53 = vsel %vm349_vm5, %v1682_v28, -inf }
0x1591   :  { %1685 = vmax.xlane.f32.xlu0 %v1684_v53 }
0x161e   :  { %v1686_v54 = vpop.xlane.xlu0 %1685 }
0x161f   :  { %v1691_v9 = vrot.slane %v1686_v54, %v4974_v37  ;;  %v1695_v55 = vrot.slane %v1686_v54, %v5019_v32  ;;  %v1699_v57 = vrot.slane %v1686_v54, %v5022_v33  ;;  %v1703_v58 = vrot.slane %v1686_v54, %v5025_v34 }
0x1621   :  { %v1708_v59 = vsub.f32 %v1650_v27, %v1691_v9  ;;  %v1709_v60 = vsub.f32 %v1653_v29, %v1695_v55  ;;  %v1710_v61 = vsub.f32 %v1656_v49, %v1699_v57  ;;  %v1711_v62 = vsub.f32 %v1659_v48, %v1703_v58  ;;  %v3839_v55 = vld [vmem:[%s5896_s1 + $0xc] sm:$0xf] }
0x1623   :  { %v1712_v56 = vmul.f32 1.442695, %v1708_v59  ;;  %v1714_v20 = vmul.f32 1.442695, %v1709_v60  ;;  %v1716_v1 = vmul.f32 1.442695, %v1710_v61 }
0x1624   :  { %v1718_v6 = vmul.f32 1.442695, %v1711_v62 }
0x1625   :  { %4664 = vpow2.f32 %v1712_v56 }
0x1626   :  { %4666 = vpow2.f32 %v1714_v20 }
0x1627   :  { %4668 = vpow2.f32 %v1716_v1 }
0x1628   :  { %4670 = vpow2.f32 %v1718_v6 }
0x162f   :  { %v4665_v3 = vpop.eup %4664 }
0x1630   :  { %v4667_v8 = vpop.eup %4666  ;;  %1725 = vperm.xlu0 %4577, %v4665_v3  }
0x1631   :  { %1728 = vperm.xlu1 %4576, %v4667_v8   ;;  %v4669_v12 = vpop.eup %4668 }
0x1632   :  { %v4671_v21 = vpop.eup %4670 }
0x1634   :  { %1731 = vperm.xlu0 %4577, %v4669_v12  }
0x1635   :  { %1734 = vperm.xlu1 %4576, %v4671_v21  }
0x16af   :  { %v1726_v13 = vpop.permute.xlu0 %1725 }
0x16b0   :  { %v1729_v14 = vpop.permute.xlu1 %1728  ;;  %v1739_v18 = vrot.slane %v1726_v13, %v5008_v10 }
0x16b1   :  { %v1743_v15 = vrot.slane %v1729_v14, %v5008_v10 }
0x16b3   :  { %v1732_v24 = vpop.permute.xlu0 %1731  ;;  %v1752_v23 = vsel %vm342_vm2, %v1743_v15, %v1739_v18 }
0x16b4   :  { %v1735_v25 = vpop.permute.xlu1 %1734  ;;  %v1747_v26 = vrot.slane %v1732_v24, %v5008_v10 }
0x16b5   :  { %v1751_v27 = vrot.slane %v1735_v25, %v5008_v10 }
0x16b6   :  { %v1753_v29 = vsel %vm344_vm3, %v1747_v26, %v1752_v23 }
0x16b7   :  { %v1754_v35 = vsel %vm346_vm4, %v1751_v27, %v1753_v29 }
0x16b8   :  { %v1756_v49 = vsel %vm349_vm5, %v1754_v35, 0.0 }
0x16b9   :  { %1757 = vadd.xlane.f32.xlu0 %v1756_v49 }
0x1746   :  { %v1758_v39 = vpop.xlane.xlu0 %1757 }
0x1747   :  { %4672 = vrcp.f32 %v1758_v39 }
0x1751   :  { %v4673_v52 = vpop.eup %4672 }
0x1752   :  { %v1764_v43 = vrot.slane %v4673_v52, %v4974_v37  ;;  %v1768_v50 = vrot.slane %v4673_v52, %v5019_v32  ;;  %v1772_v28 = vrot.slane %v4673_v52, %v5022_v33  ;;  %v1776_v54 = vrot.slane %v4673_v52, %v5025_v34 }
0x1754   :  { %v1781_v48 = vmul.f32 %v4665_v3, %v1764_v43  ;;  %v1782_v16 = vmul.f32 %v4667_v8, %v1768_v50  ;;  %v1783_v53 = vmul.f32 %v4669_v12, %v1772_v28  ;;  %v1784_v9 = vmul.f32 %v4671_v21, %v1776_v54 }
0x1756   :  { %1787 = vperm.xlu1 %4576, %v1781_v48  }
0x175a   :  { %1792 = vperm.xlu1 %4576, %v1782_v16  }
0x175e   :  { %1797 = vperm.xlu1 %4576, %v1783_v53  }
0x1762   :  { %1802 = vperm.xlu1 %4576, %v1784_v9  }
0x1766   :  { %1847 = vrot.lane.b32.xlu1 %v5341_v44, %s4805_s30 }
0x176a   :  { %1853 = vperm.xlu1 %4576, %v3839_v55  }
0x17d5   :  { %v1788_v57 = vpop.permute.xlu1 %1787 }
0x17d6   :  { %v1805_v58 = vmul.f32 %v5292_v2, %v1788_v57 }
0x17d8   :  { %v1809_v59 = vsel %vm73_vm1, %v1805_v58, 0.0 }
0x17d9   :  { %v1810_v60 = vrot.slane %v1809_v59, 4  ;;  %v1793_v61 = vpop.permute.xlu1 %1792 }
0x17da   :  { %v1806_v62 = vmul.f32 %v5299_v63, %v1793_v61  ;;  %v5437_v61 = vld [vmem:[%s5898_s7] ss:$0 sm:$0xff] }
0x17db   :  { %v1811_v20 = vadd.f32 %v1810_v60, %v1809_v59 }
0x17dc   :  { %v1816_v56 = vsel %vm73_vm1, %v1806_v62, 0.0 }
0x17dd   :  { %v1817_v1 = vrot.slane %v1816_v56, 4  ;;  %v1798_v6 = vpop.permute.xlu1 %1797  ;;  %v1812_v12 = vrot.slane %v1811_v20, 2 }
0x17de   :  { %v1807_v44 = vmul.f32 %v5306_v19, %v1798_v6  ;;  %v5443_v6 = vld [vmem:[%s5899_s8] ss:$0 sm:$0xff] }
0x17df   :  { %v1818_v3 = vadd.f32 %v1817_v1, %v1816_v56  ;;  %v1813_v26 = vadd.f32 %v1812_v12, %v1811_v20 }
0x17e0   :  { %v1823_v8 = vsel %vm73_vm1, %v1807_v44, 0.0 }
0x17e1   :  { %v1819_v21 = vrot.slane %v1818_v3, 2  ;;  %v1824_v13 = vrot.slane %v1823_v8, 4  ;;  %v1803_v14 = vpop.permute.xlu1 %1802  ;;  %v1814_v39 = vrot.slane %v1813_v26, 1 }
0x17e2   :  { %v1808_v15 = vmul.f32 %v5313_v36, %v1803_v14 }
0x17e3   :  { %v1820_v18 = vadd.f32 %v1819_v21, %v1818_v3  ;;  %v1825_v24 = vadd.f32 %v1824_v13, %v1823_v8  ;;  %v1815_v28 = vadd.f32 %v1814_v39, %v1813_v26 }
0x17e4   :  { %v1830_v25 = vsel %vm73_vm1, %v1808_v15, 0.0 }
0x17e5   :  { %v1826_v23 = vrot.slane %v1825_v24, 2  ;;  %v1831_v27 = vrot.slane %v1830_v25, 4  ;;  %v1821_v29 = vrot.slane %v1820_v18, 1  ;;  %v1848_v58 = vpop.permute.xlu1 %1847 }
0x17e7   :  { %v1827_v35 = vadd.f32 %v1826_v23, %v1825_v24  ;;  %v1832_v49 = vadd.f32 %v1831_v27, %v1830_v25  ;;  %v1822_v48 = vadd.f32 %v1821_v29, %v1820_v18 }
0x17e9   :  { %v1828_v52 = vrot.slane %v1827_v35, 1  ;;  %v1833_v43 = vrot.slane %v1832_v49, 2  ;;  %v1843_v9 = vsel %vm342_vm2, %v1822_v48, %v1815_v28  ;;  %v1854_v60 = vpop.permute.xlu1 %1853 }
0x17ea   :  { %v1856_v62 = vmul.f32 %v5437_v61, %v1854_v60 }
0x17eb   :  { %v1834_v50 = vadd.f32 %v1833_v43, %v1832_v49  ;;  %v1829_v16 = vadd.f32 %v1828_v52, %v1827_v35 }
0x17ed   :  { %v1835_v53 = vrot.slane %v1834_v50, 1  ;;  %v1844_v55 = vsel %vm344_vm3, %v1829_v16, %v1843_v9 }
0x17ef   :  { %v1836_v54 = vadd.f32 %v1835_v53, %v1834_v50 }
0x17f1   :  { %v1845_v57 = vsel %vm346_vm4, %v1836_v54, %v1844_v55 }
0x17f2   :  { %v1850_v59 = vsel %vm73_vm1, %v1845_v57, %v1848_v58 }
0x17f3   :  { %4184 = vmatmul.mubr.msk.f32.vlgmr.msra.gmra.mrb[10].mxu0 %vm171_vm6, %v1850_v59 }
0x17f4   :  { %4475 = vmatpush3.bf16.msra.mxu0 %v5052_v30  ;;  %4221 = vmatprep.mubr.msk.f32.mxu0 %vm4801_vm0, %v4802_v4 }
0x17f5   :  { %4476 = vmatprep.subr.bf16.mxu0 %v4800_v0 }
0x17f8   :  { %4478 = vmatpush3.bf16.msra.mxu0 %v5062_v38 }
0x17f9   :  { %4479 = vmatprep.subr.bf16.mxu0 %v4800_v0 }
0x17fc   :  { %4481 = vmatpush3.bf16.msra.mxu0 %v5072_v42 }
0x17fd   :  { %4482 = vmatprep.subr.bf16.mxu0 %v4800_v0 }
0x1800   :  { %4484 = vmatpush3.bf16.msra.mxu0 %v5082_v47 }
0x1801   :  { %4497 = vmatprep.subr.bf16.mxu0 %v4800_v0 }
0x18c6   :  { %v1926_v56 = vpop.f32.mrb[10].mxu0 }
0x18c7   :  { %v1927_v20 = vadd.f32 %v1926_v56, %v1856_v62  ;;  %v4185_v1 = vpop.f32.mrb[11].mxu0 }
0x18c9   :  { %v1930_v44 = vadd.f32 %v5443_v6, %v1927_v20 }
0x18cb   :  { %4674 = vtanh.f32 %v1930_v44  ;;  %v3841_v8 = vmul.f32 -1.442695, %v1930_v44 }
0x18cd   :  { %4676 = vpow2.f32 %v3841_v8 }
0x18d5   :  { %v4675_v3 = vpop.eup %4674 }
0x18d6   :  { %1940 = vrot.lane.b32.xlu1 %v4675_v3, %s4805_s30 }
0x18d7   :  { %v4677_v12 = vpop.eup %4676 }
0x18d8   :  { %v1934_v21 = vadd.f32 1.0, %v4677_v12 }
0x18da   :  { %4678 = vrcp.f32 %v1934_v21 }
0x18e4   :  { %v4679_v13 = vpop.eup %4678 }
0x18e5   :  { %v1938_v18 = vmul.f32 %v4679_v13, %v5337_v40 }
0x1948   :  { %v1941_v14 = vpop.permute.xlu1 %1940 }
0x1949   :  { %v1943_v15 = vmul.f32 %v4679_v13, %v1941_v14 }
0x194b   :  { %1945 = vrot.lane.b32.xlu1 %v1943_v15, %s4806_s12 }
0x19bd   :  { %v1946_v24 = vpop.permute.xlu1 %1945 }
0x19be   :  { %v5449_v25 = vadd.f32 %v1946_v24, %v1938_v18 }
0x19c0   :  { %4680 = vtanh.f32 %v5449_v25 }
0x19ca   :  { %v4681_v26 = vpop.eup %4680 }
0x19cb   :  { %1951 = vrot.lane.b32.xlu0 %v4681_v26, %s4805_s30 }
0x1a3d   :  { %v1952_v23 = vpop.permute.xlu0 %1951 }
0x1a3e   :  { %v5453_v27 = vmul.f32 %v4679_v13, %v1952_v23 }
0x1a40   :  { %1956 = vrot.lane.b32.xlu1 %v5453_v27, %s4806_s12 }
0x1ab2   :  { %v1957_v29 = vpop.permute.xlu1 %1956 }
0x1ab3   :  { %v1959_v35 = vsel %vm73_vm1, %v1957_v29, %v5449_v25 }
0x1ab4   :  { %4203 = vmatmul.mubr.msk.f32.vlgmr.msra.gmra.mrb[8].mxu1 %vm171_vm6, %v1959_v35 }
0x1ab5   :  { %4487 = vmatpush3.bf16.msra.mxu1 %v4879_v5  ;;  %4240 = vmatprep.mubr.msk.f32.mxu1 %vm4801_vm0, %v4802_v4 }
0x1ab6   :  { %4488 = vmatprep.subr.bf16.mxu1 %v4800_v0 }
0x1ab9   :  { %4490 = vmatpush3.bf16.msra.mxu1 %v4894_v11 }
0x1aba   :  { %4491 = vmatprep.subr.bf16.mxu1 %v4800_v0 }
0x1abd   :  { %4493 = vmatpush3.bf16.msra.mxu1 %v4914_v17 }
0x1abe   :  { %4494 = vmatprep.subr.bf16.mxu1 %v4800_v0 }
0x1ac1   :  { %4496 = vmatpush3.bf16.msra.mxu1 %v4935_v22 }
0x1ac2   :  { %4509 = vmatprep.subr.bf16.mxu1 %v4800_v0 }
0x1b87   :  { %v2029_v40 = vpop.f32.mrb[8].mxu1 }
0x1b88   :  { %v2040_v49 = vrot.slane %v2029_v40, %v4967_v31  ;;  %v4204_v39 = vpop.f32.mrb[9].mxu1 }
0x1b8a   :  { %v2041_v52 = vcombine.high %v2040_v49, %v2040_v49  ;;  %v2048_v43 = vrot.slane %v2040_v49, %v4967_v31 }
0x1b8c   :  { %v2055_v48 = vrot.slane %v2041_v52, %v4967_v31  ;;  %v2056_v50 = vcombine.high %v2048_v43, %v2048_v43  ;;  %v2061_v16 = vrot.slane %v2048_v43, %v4974_v37 }
0x1b8e   :  { %v2057_v28 = vcombine.high %v2055_v48, %v2055_v48  ;;  %v2065_v53 = vrot.slane %v2055_v48, %v4974_v37  ;;  %v2069_v54 = vrot.slane %v2056_v50, %v4974_v37  ;;  %v2078_v9 = vadd.f32 %v2061_v16, %v4977_v41 }
0x1b90   :  { %v2073_v55 = vrot.slane %v2057_v28, %v4974_v37  ;;  %v2079_v57 = vadd.f32 %v2065_v53, %v4983_v46  ;;  %v2080_v58 = vadd.f32 %v2069_v54, %v4981_v45  ;;  %4682 = vtanh.f32 %v2078_v9 }
0x1b92   :  { %v2081_v59 = vadd.f32 %v2073_v55, %v4988_v51  ;;  %4684 = vtanh.f32 %v2079_v57 }
0x1b93   :  { %4686 = vtanh.f32 %v2080_v58 }
0x1b94   :  { %4688 = vtanh.f32 %v2081_v59 }
0x1b9a   :  { %v4683_v60 = vpop.eup %4682 }
0x1b9b   :  { %v2086_v62 = vmul.f32 %v5372_v7, %v4683_v60 }
0x1b9c   :  { %v4685_v56 = vpop.eup %4684 }
0x1b9d   :  { %v4687_v20 = vpop.eup %4686  ;;  %v2090_v1 = vsel %vm73_vm1, %v2086_v62, 0.0  ;;  %v2087_v44 = vmul.f32 %v5372_v7, %v4685_v56 }
0x1b9e   :  { %v4689_v3 = vpop.eup %4688  ;;  %2091 = vadd.xlane.f32.xlu1 %v2090_v1  ;;  %v2088_v8 = vmul.f32 %v5372_v7, %v4687_v20 }
0x1b9f   :  { %v2093_v12 = vsel %vm73_vm1, %v2087_v44, 0.0  ;;  %v2089_v13 = vmul.f32 %v5372_v7, %v4689_v3 }
0x1ba0   :  { %2094 = vadd.xlane.f32.xlu0 %v2093_v12  ;;  %v2096_v21 = vsel %vm73_vm1, %v2088_v8, 0.0 }
0x1ba1   :  { %v2099_v14 = vsel %vm73_vm1, %v2089_v13, 0.0 }
0x1ba2   :  { %2097 = vadd.xlane.f32.xlu1 %v2096_v21 }
0x1ba6   :  { %2100 = vadd.xlane.f32.xlu1 %v2099_v14 }
0x1c2b   :  { %v2092_v15 = vpop.xlane.xlu1 %2091 }
0x1c2c   :  { %v2109_v23 = vrot.slane %v2092_v15, %v5008_v10 }
0x1c2d   :  { %v2095_v18 = vpop.xlane.xlu0 %2094 }
0x1c2e   :  { %v2113_v24 = vrot.slane %v2095_v18, %v5008_v10 }
0x1c2f   :  { %v2098_v26 = vpop.xlane.xlu1 %2097 }
0x1c30   :  { %v2117_v29 = vrot.slane %v2098_v26, %v5008_v10  ;;  %v2122_v35 = vsel %vm342_vm2, %v2113_v24, %v2109_v23 }
0x1c32   :  { %v2123_v39 = vsel %vm344_vm3, %v2117_v29, %v2122_v35 }
0x1c33   :  { %v2101_v40 = vpop.xlane.xlu1 %2100 }
0x1c34   :  { %v2121_v49 = vrot.slane %v2101_v40, %v5008_v10 }
0x1c36   :  { %v2124_v52 = vsel %vm346_vm4, %v2121_v49, %v2123_v39 }
0x1c37   :  { %v2126_v43 = vsel %vm349_vm5, %v2124_v52, -inf }
0x1c38   :  { %2127 = vmax.xlane.f32.xlu1 %v2126_v43 }
0x1cc5   :  { %v2128_v48 = vpop.xlane.xlu1 %2127 }
0x1cc6   :  { %v2133_v50 = vrot.slane %v2128_v48, %v4974_v37  ;;  %v2137_v16 = vrot.slane %v2128_v48, %v5019_v32  ;;  %v2141_v28 = vrot.slane %v2128_v48, %v5022_v33  ;;  %v2145_v53 = vrot.slane %v2128_v48, %v5025_v34 }
0x1cc8   :  { %v2150_v54 = vsub.f32 %v2092_v15, %v2133_v50  ;;  %v2151_v9 = vsub.f32 %v2095_v18, %v2137_v16  ;;  %v2153_v55 = vsub.f32 %v2101_v40, %v2145_v53  ;;  %v2152_v57 = vsub.f32 %v2098_v26, %v2141_v28  ;;  %v3843_v53 = vld [vmem:[%s5896_s1 + $0x10] sm:$0xf] }
0x1cca   :  { %v2154_v58 = vmul.f32 1.442695, %v2150_v54  ;;  %v2156_v59 = vmul.f32 1.442695, %v2151_v9  ;;  %v2160_v60 = vmul.f32 1.442695, %v2153_v55 }
0x1ccb   :  { %v2158_v62 = vmul.f32 1.442695, %v2152_v57 }
0x1ccc   :  { %4690 = vpow2.f32 %v2154_v58 }
0x1ccd   :  { %4692 = vpow2.f32 %v2156_v59 }
0x1cce   :  { %4694 = vpow2.f32 %v2160_v60 }
0x1ccf   :  { %4696 = vpow2.f32 %v2158_v62 }
0x1cd6   :  { %v4691_v56 = vpop.eup %4690 }
0x1cd7   :  { %v4693_v20 = vpop.eup %4692  ;;  %2167 = vperm.xlu0 %4577, %v4691_v56  }
0x1cd8   :  { %2170 = vperm.xlu1 %4576, %v4693_v20   ;;  %v4695_v1 = vpop.eup %4694 }
0x1cd9   :  { %v4697_v44 = vpop.eup %4696 }
0x1cdb   :  { %2176 = vperm.xlu0 %4577, %v4695_v1  }
0x1cdc   :  { %2173 = vperm.xlu1 %4576, %v4697_v44  }
0x1d56   :  { %v2168_v3 = vpop.permute.xlu0 %2167 }
0x1d57   :  { %v2171_v8 = vpop.permute.xlu1 %2170  ;;  %v2181_v21 = vrot.slane %v2168_v3, %v5008_v10 }
0x1d58   :  { %v2185_v12 = vrot.slane %v2171_v8, %v5008_v10 }
0x1d5a   :  { %v2177_v13 = vpop.permute.xlu0 %2176  ;;  %v2194_v24 = vsel %vm342_vm2, %v2185_v12, %v2181_v21 }
0x1d5b   :  { %v2174_v14 = vpop.permute.xlu1 %2173  ;;  %v2193_v15 = vrot.slane %v2177_v13, %v5008_v10 }
0x1d5c   :  { %v2189_v18 = vrot.slane %v2174_v14, %v5008_v10 }
0x1d5e   :  { %v2195_v26 = vsel %vm344_vm3, %v2189_v18, %v2194_v24 }
0x1d5f   :  { %v2196_v23 = vsel %vm346_vm4, %v2193_v15, %v2195_v26 }
0x1d60   :  { %v2198_v29 = vsel %vm349_vm5, %v2196_v23, 0.0 }
0x1d61   :  { %2199 = vadd.xlane.f32.xlu1 %v2198_v29 }
0x1dee   :  { %v2200_v35 = vpop.xlane.xlu1 %2199 }
0x1def   :  { %4698 = vrcp.f32 %v2200_v35 }
0x1df9   :  { %v4699_v40 = vpop.eup %4698 }
0x1dfa   :  { %v2206_v49 = vrot.slane %v4699_v40, %v4974_v37  ;;  %v2210_v52 = vrot.slane %v4699_v40, %v5019_v32  ;;  %v2214_v48 = vrot.slane %v4699_v40, %v5022_v33  ;;  %v2218_v16 = vrot.slane %v4699_v40, %v5025_v34 }
0x1dfc   :  { %v2223_v39 = vmul.f32 %v4691_v56, %v2206_v49  ;;  %v2224_v43 = vmul.f32 %v4693_v20, %v2210_v52  ;;  %v2225_v50 = vmul.f32 %v4697_v44, %v2214_v48  ;;  %v2226_v28 = vmul.f32 %v4695_v1, %v2218_v16 }
0x1dfe   :  { %2229 = vperm.xlu0 %4577, %v2223_v39  }
0x1e02   :  { %2234 = vperm.xlu0 %4577, %v2224_v43  }
0x1e06   :  { %2239 = vperm.xlu0 %4577, %v2225_v50  }
0x1e0a   :  { %2244 = vperm.xlu0 %4577, %v2226_v28  }
0x1e0e   :  { %2289 = vrot.lane.b32.xlu0 %v5453_v27, %s4805_s30 }
0x1e12   :  { %2295 = vperm.xlu0 %4577, %v3843_v53  }
0x1e7d   :  { %v2230_v54 = vpop.permute.xlu0 %2229 }
0x1e7e   :  { %v2247_v9 = vmul.f32 %v5292_v2, %v2230_v54 }
0x1e80   :  { %v2251_v55 = vsel %vm73_vm1, %v2247_v9, 0.0 }
0x1e81   :  { %v2252_v57 = vrot.slane %v2251_v55, 4  ;;  %v2235_v58 = vpop.permute.xlu0 %2234 }
0x1e82   :  { %v2248_v59 = vmul.f32 %v5299_v63, %v2235_v58 }
0x1e83   :  { %v2253_v62 = vadd.f32 %v2252_v57, %v2251_v55 }
0x1e84   :  { %v2258_v60 = vsel %vm73_vm1, %v2248_v59, 0.0 }
0x1e85   :  { %v2259_v56 = vrot.slane %v2258_v60, 4  ;;  %v2240_v20 = vpop.permute.xlu0 %2239  ;;  %v2254_v3 = vrot.slane %v2253_v62, 2 }
0x1e86   :  { %v2249_v27 = vmul.f32 %v5306_v19, %v2240_v20 }
0x1e87   :  { %v2260_v1 = vadd.f32 %v2259_v56, %v2258_v60  ;;  %v2255_v15 = vadd.f32 %v2254_v3, %v2253_v62 }
0x1e88   :  { %v2265_v44 = vsel %vm73_vm1, %v2249_v27, 0.0 }
0x1e89   :  { %v2261_v8 = vrot.slane %v2260_v1, 2  ;;  %v2266_v12 = vrot.slane %v2265_v44, 4  ;;  %v2245_v2 = vpop.permute.xlu0 %2244  ;;  %v2256_v19 = vrot.slane %v2255_v15, 1 }
0x1e8a   :  { %v2250_v21 = vmul.f32 %v5313_v36, %v2245_v2 }
0x1e8b   :  { %v2262_v13 = vadd.f32 %v2261_v8, %v2260_v1  ;;  %v2267_v14 = vadd.f32 %v2266_v12, %v2265_v44  ;;  %v2257_v43 = vadd.f32 %v2256_v19, %v2255_v15 }
0x1e8c   :  { %v2272_v63 = vsel %vm73_vm1, %v2250_v21, 0.0 }
0x1e8d   :  { %v2268_v18 = vrot.slane %v2267_v14, 2  ;;  %v2273_v24 = vrot.slane %v2272_v63, 4  ;;  %v2263_v26 = vrot.slane %v2262_v13, 1  ;;  %v2290_v53 = vpop.permute.xlu0 %2289 }
0x1e8f   :  { %v2269_v23 = vadd.f32 %v2268_v18, %v2267_v14  ;;  %v2274_v29 = vadd.f32 %v2273_v24, %v2272_v63  ;;  %v2264_v49 = vadd.f32 %v2263_v26, %v2262_v13 }
0x1e91   :  { %v2270_v35 = vrot.slane %v2269_v23, 1  ;;  %v2275_v40 = vrot.slane %v2274_v29, 2  ;;  %v2285_v36 = vsel %vm342_vm2, %v2264_v49, %v2257_v43  ;;  %v2296_v9 = vpop.permute.xlu0 %2295 }
0x1e92   :  { %v2298_v55 = vmul.f32 %v5437_v61, %v2296_v9 }
0x1e93   :  { %v2276_v39 = vadd.f32 %v2275_v40, %v2274_v29  ;;  %v2271_v52 = vadd.f32 %v2270_v35, %v2269_v23 }
0x1e95   :  { %v2277_v48 = vrot.slane %v2276_v39, 1  ;;  %v2286_v16 = vsel %vm344_vm3, %v2271_v52, %v2285_v36 }
0x1e97   :  { %v2278_v50 = vadd.f32 %v2277_v48, %v2276_v39 }
0x1e99   :  { %v2287_v28 = vsel %vm346_vm4, %v2278_v50, %v2286_v16 }
0x1e9a   :  { %v2292_v54 = vsel %vm73_vm1, %v2287_v28, %v2290_v53 }
0x1e9b   :  { %4222 = vmatmul.mubr.msk.f32.vlgmr.msra.gmra.mrb[12].mxu0 %vm171_vm6, %v2292_v54 }
0x1e9c   :  { %4499 = vmatpush3.bf16.msra.mxu0 %v5052_v30  ;;  %4259 = vmatprep.mubr.msk.f32.mxu0 %vm4801_vm0, %v4802_v4 }
0x1e9d   :  { %4500 = vmatprep.subr.bf16.mxu0 %v4800_v0 }
0x1ea0   :  { %4502 = vmatpush3.bf16.msra.mxu0 %v5062_v38 }
0x1ea1   :  { %4503 = vmatprep.subr.bf16.mxu0 %v4800_v0 }
0x1ea4   :  { %4505 = vmatpush3.bf16.msra.mxu0 %v5072_v42 }
0x1ea5   :  { %4506 = vmatprep.subr.bf16.mxu0 %v4800_v0 }
0x1ea8   :  { %4508 = vmatpush3.bf16.msra.mxu0 %v5082_v47 }
0x1ea9   :  { %4521 = vmatprep.subr.bf16.mxu0 %v4800_v0 }
0x1f6e   :  { %v2368_v57 = vpop.f32.mrb[12].mxu0 }
0x1f6f   :  { %v2369_v58 = vadd.f32 %v2368_v57, %v2298_v55  ;;  %v4223_v59 = vpop.f32.mrb[13].mxu0 }
0x1f71   :  { %v2372_v60 = vadd.f32 %v5443_v6, %v2369_v58 }
0x1f73   :  { %4700 = vtanh.f32 %v2372_v60  ;;  %v3845_v56 = vmul.f32 -1.442695, %v2372_v60 }
0x1f75   :  { %4702 = vpow2.f32 %v3845_v56 }
0x1f7d   :  { %v4701_v62 = vpop.eup %4700 }
0x1f7e   :  { %2382 = vrot.lane.b32.xlu0 %v4701_v62, %s4805_s30 }
0x1f7f   :  { %v4703_v20 = vpop.eup %4702 }
0x1f80   :  { %v2376_v27 = vadd.f32 1.0, %v4703_v20 }
0x1f82   :  { %4704 = vrcp.f32 %v2376_v27 }
0x1f8c   :  { %v4705_v1 = vpop.eup %4704 }
0x1f8d   :  { %v2380_v8 = vmul.f32 %v4705_v1, %v5449_v25 }
0x1ff0   :  { %v2383_v44 = vpop.permute.xlu0 %2382 }
0x1ff1   :  { %v2385_v3 = vmul.f32 %v4705_v1, %v2383_v44 }
0x1ff3   :  { %2387 = vrot.lane.b32.xlu0 %v2385_v3, %s4806_s12 }
0x2065   :  { %v2388_v12 = vpop.permute.xlu0 %2387 }
0x2066   :  { %v5546_v2 = vadd.f32 %v2388_v12, %v2380_v8 }
0x2068   :  { %4706 = vtanh.f32 %v5546_v2 }
0x2072   :  { %v4707_v21 = vpop.eup %4706 }
0x2073   :  { %2393 = vrot.lane.b32.xlu0 %v4707_v21, %s4805_s30 }
0x20e5   :  { %v2394_v13 = vpop.permute.xlu0 %2393 }
0x20e6   :  { %v5550_v14 = vmul.f32 %v4705_v1, %v2394_v13 }
0x20e8   :  { %2398 = vrot.lane.b32.xlu1 %v5550_v14, %s4806_s12 }
0x215a   :  { %v2399_v63 = vpop.permute.xlu1 %2398 }
0x215b   :  { %v2401_v15 = vsel %vm73_vm1, %v2399_v63, %v5546_v2 }
0x215c   :  { %4241 = vmatmul.mubr.msk.f32.vlgmr.msra.gmra.mrb[10].mxu1 %vm171_vm6, %v2401_v15 }
0x215d   :  { %4511 = vmatpush3.bf16.msra.mxu1 %v4879_v5  ;;  %4278 = vmatprep.mubr.msk.f32.mxu1 %vm4801_vm0, %v4802_v4 }
0x215e   :  { %4512 = vmatprep.subr.bf16.mxu1 %v4800_v0 }
0x2161   :  { %4514 = vmatpush3.bf16.msra.mxu1 %v4894_v11 }
0x2162   :  { %4515 = vmatprep.subr.bf16.mxu1 %v4800_v0 }
0x2165   :  { %4517 = vmatpush3.bf16.msra.mxu1 %v4914_v17 }
0x2166   :  { %4518 = vmatprep.subr.bf16.mxu1 %v4800_v0 }
0x2169   :  { %4520 = vmatpush3.bf16.msra.mxu1 %v4935_v22 }
0x216a   :  { %4533 = vmatprep.subr.bf16.mxu1 %v4800_v0 }
0x222f   :  { %v2471_v25 = vpop.f32.mrb[10].mxu1 }
0x2230   :  { %v2482_v18 = vrot.slane %v2471_v25, %v4967_v31  ;;  %v4242_v24 = vpop.f32.mrb[11].mxu1 }
0x2232   :  { %v2483_v26 = vcombine.high %v2482_v18, %v2482_v18  ;;  %v2490_v23 = vrot.slane %v2482_v18, %v4967_v31 }
0x2234   :  { %v2497_v29 = vrot.slane %v2483_v26, %v4967_v31  ;;  %v2498_v19 = vcombine.high %v2490_v23, %v2490_v23  ;;  %v2503_v35 = vrot.slane %v2490_v23, %v4974_v37 }
0x2236   :  { %v2499_v40 = vcombine.high %v2497_v29, %v2497_v29  ;;  %v2507_v49 = vrot.slane %v2497_v29, %v4974_v37  ;;  %v2511_v39 = vrot.slane %v2498_v19, %v4974_v37  ;;  %v2520_v52 = vadd.f32 %v2503_v35, %v4977_v41 }
0x2238   :  { %v2515_v43 = vrot.slane %v2499_v40, %v4974_v37  ;;  %v2521_v48 = vadd.f32 %v2507_v49, %v4983_v46  ;;  %v2522_v50 = vadd.f32 %v2511_v39, %v4981_v45  ;;  %4708 = vtanh.f32 %v2520_v52 }
0x223a   :  { %v2523_v36 = vadd.f32 %v2515_v43, %v4988_v51  ;;  %4710 = vtanh.f32 %v2521_v48 }
0x223b   :  { %4712 = vtanh.f32 %v2522_v50 }
0x223c   :  { %4714 = vtanh.f32 %v2523_v36 }
0x2242   :  { %v4709_v16 = vpop.eup %4708 }
0x2243   :  { %v2528_v28 = vmul.f32 %v5372_v7, %v4709_v16 }
0x2244   :  { %v4711_v53 = vpop.eup %4710 }
0x2245   :  { %v4713_v54 = vpop.eup %4712  ;;  %v2532_v9 = vsel %vm73_vm1, %v2528_v28, 0.0  ;;  %v2529_v55 = vmul.f32 %v5372_v7, %v4711_v53 }
0x2246   :  { %v4715_v57 = vpop.eup %4714  ;;  %2533 = vadd.xlane.f32.xlu0 %v2532_v9  ;;  %v2530_v58 = vmul.f32 %v5372_v7, %v4713_v54 }
0x2247   :  { %v2535_v59 = vsel %vm73_vm1, %v2529_v55, 0.0  ;;  %v2531_v62 = vmul.f32 %v5372_v7, %v4715_v57 }
0x2248   :  { %2536 = vadd.xlane.f32.xlu1 %v2535_v59  ;;  %v2538_v60 = vsel %vm73_vm1, %v2530_v58, 0.0 }
0x2249   :  { %v2541_v56 = vsel %vm73_vm1, %v2531_v62, 0.0 }
0x224a   :  { %2539 = vadd.xlane.f32.xlu0 %v2538_v60 }
0x224e   :  { %2542 = vadd.xlane.f32.xlu0 %v2541_v56 }
0x22d3   :  { %v2534_v20 = vpop.xlane.xlu0 %2533 }
0x22d4   :  { %v2551_v3 = vrot.slane %v2534_v20, %v5008_v10 }
0x22d5   :  { %v2537_v27 = vpop.xlane.xlu1 %2536 }
0x22d6   :  { %v2555_v1 = vrot.slane %v2537_v27, %v5008_v10 }
0x22d7   :  { %v2540_v44 = vpop.xlane.xlu0 %2539 }
0x22d8   :  { %v2559_v8 = vrot.slane %v2540_v44, %v5008_v10  ;;  %v2564_v12 = vsel %vm342_vm2, %v2555_v1, %v2551_v3 }
0x22da   :  { %v2565_v7 = vsel %vm344_vm3, %v2559_v8, %v2564_v12 }
0x22db   :  { %v2543_v21 = vpop.xlane.xlu0 %2542 }
0x22dc   :  { %v2563_v13 = vrot.slane %v2543_v21, %v5008_v10 }
0x22de   :  { %v2566_v63 = vsel %vm346_vm4, %v2563_v13, %v2565_v7 }
0x22df   :  { %v2568_v15 = vsel %vm349_vm5, %v2566_v63, -inf }
0x22e0   :  { %2569 = vmax.xlane.f32.xlu0 %v2568_v15  ;;  %v3847_v15 = vld [vmem:[%s5896_s1 + $0x14] sm:$0xf] }
0x236d   :  { %v2570_v25 = vpop.xlane.xlu0 %2569 }
0x236e   :  { %v2575_v18 = vrot.slane %v2570_v25, %v4974_v37  ;;  %v2579_v24 = vrot.slane %v2570_v25, %v5019_v32  ;;  %v2583_v26 = vrot.slane %v2570_v25, %v5022_v33  ;;  %v2587_v23 = vrot.slane %v2570_v25, %v5025_v34 }
0x2370   :  { %v2592_v29 = vsub.f32 %v2534_v20, %v2575_v18  ;;  %v2593_v19 = vsub.f32 %v2537_v27, %v2579_v24  ;;  %v2594_v35 = vsub.f32 %v2540_v44, %v2583_v26  ;;  %v2595_v40 = vsub.f32 %v2543_v21, %v2587_v23  ;;  %v5618_v18 = vld [vmem:[%s5893_s0] sm:$0xff] }
0x2372   :  { %v2596_v49 = vmul.f32 1.442695, %v2592_v29  ;;  %v2598_v39 = vmul.f32 1.442695, %v2593_v19  ;;  %v2600_v52 = vmul.f32 1.442695, %v2594_v35 }
0x2373   :  { %v2602_v43 = vmul.f32 1.442695, %v2595_v40 }
0x2374   :  { %4716 = vpow2.f32 %v2596_v49 }
0x2375   :  { %4718 = vpow2.f32 %v2598_v39 }
0x2376   :  { %4720 = vpow2.f32 %v2600_v52  ;;  %v5632_v52 = vld [vmem:[%s5893_s0 + $0x10] sm:$0xff] }
0x2377   :  { %4722 = vpow2.f32 %v2602_v43 }
0x237e   :  { %v4717_v48 = vpop.eup %4716 }
0x237f   :  { %v4719_v50 = vpop.eup %4718  ;;  %2609 = vperm.xlu0 %4577, %v4717_v48  }
0x2380   :  { %2612 = vperm.xlu1 %4576, %v4719_v50   ;;  %v4721_v36 = vpop.eup %4720 }
0x2381   :  { %v4723_v16 = vpop.eup %4722 }
0x2383   :  { %2615 = vperm.xlu0 %4577, %v4721_v36  }
0x2384   :  { %2618 = vperm.xlu1 %4576, %v4723_v16  }
0x23fe   :  { %v2610_v28 = vpop.permute.xlu0 %2609 }
0x23ff   :  { %v2613_v53 = vpop.permute.xlu1 %2612  ;;  %v2623_v9 = vrot.slane %v2610_v28, %v5008_v10 }
0x2400   :  { %v2627_v54 = vrot.slane %v2613_v53, %v5008_v10 }
0x2402   :  { %v2616_v55 = vpop.permute.xlu0 %2615  ;;  %v2636_v59 = vsel %vm342_vm2, %v2627_v54, %v2623_v9  ;;  %v5639_v54 = vld [vmem:[%s5893_s0 + $0x18] sm:$0xff] }
0x2403   :  { %v2619_v57 = vpop.permute.xlu1 %2618  ;;  %v2631_v58 = vrot.slane %v2616_v55, %v5008_v10 }
0x2404   :  { %v2635_v60 = vrot.slane %v2619_v57, %v5008_v10 }
0x2405   :  { %v2637_v62 = vsel %vm344_vm3, %v2631_v58, %v2636_v59 }
0x2406   :  { %v2638_v56 = vsel %vm346_vm4, %v2635_v60, %v2637_v62 }
0x2407   :  { %v2640_v20 = vsel %vm349_vm5, %v2638_v56, 0.0 }
0x2408   :  { %2641 = vadd.xlane.f32.xlu0 %v2640_v20 }
0x2495   :  { %v2642_v27 = vpop.xlane.xlu0 %2641 }
0x2496   :  { %4724 = vrcp.f32 %v2642_v27 }
0x24a0   :  { %v4725_v1 = vpop.eup %4724 }
0x24a1   :  { %v2648_v44 = vrot.slane %v4725_v1, %v4974_v37  ;;  %v2652_v8 = vrot.slane %v4725_v1, %v5019_v32  ;;  %v2656_v21 = vrot.slane %v4725_v1, %v5022_v33  ;;  %v2660_v7 = vrot.slane %v4725_v1, %v5025_v34 }
0x24a3   :  { %v2665_v3 = vmul.f32 %v4717_v48, %v2648_v44  ;;  %v2666_v12 = vmul.f32 %v4719_v50, %v2652_v8  ;;  %v2667_v13 = vmul.f32 %v4721_v36, %v2656_v21  ;;  %v2668_v63 = vmul.f32 %v4723_v16, %v2660_v7 }
0x24a5   :  { %2671 = vperm.xlu1 %4576, %v2665_v3  }
0x24a9   :  { %2676 = vperm.xlu1 %4576, %v2666_v12  }
0x24ad   :  { %2681 = vperm.xlu1 %4576, %v2667_v13  }
0x24b1   :  { %2686 = vperm.xlu1 %4576, %v2668_v63  }
0x24b5   :  { %2731 = vrot.lane.b32.xlu1 %v5550_v14, %s4805_s30  ;;  %v5625_v14 = vld [vmem:[%s5893_s0 + $0x8] sm:$0xff] }
0x24b9   :  { %2737 = vperm.xlu1 %4576, %v3847_v15  }
0x2524   :  { %v2672_v25 = vpop.permute.xlu1 %2671 }
0x2525   :  { %v2689_v24 = vmul.f32 %v5618_v18, %v2672_v25 }
0x2527   :  { %v2693_v26 = vsel %vm73_vm1, %v2689_v24, 0.0 }
0x2528   :  { %v2694_v23 = vrot.slane %v2693_v26, 4  ;;  %v2677_v29 = vpop.permute.xlu1 %2676 }
0x2529   :  { %v2690_v19 = vmul.f32 %v5625_v14, %v2677_v29 }
0x252a   :  { %v2695_v40 = vadd.f32 %v2694_v23, %v2693_v26 }
0x252b   :  { %v2700_v35 = vsel %vm73_vm1, %v2690_v19, 0.0 }
0x252c   :  { %v2701_v49 = vrot.slane %v2700_v35, 4  ;;  %v2682_v39 = vpop.permute.xlu1 %2681  ;;  %v2696_v36 = vrot.slane %v2695_v40, 2 }
0x252d   :  { %v2691_v43 = vmul.f32 %v5632_v52, %v2682_v39 }
0x252e   :  { %v2702_v48 = vadd.f32 %v2701_v49, %v2700_v35  ;;  %v2697_v59 = vadd.f32 %v2696_v36, %v2695_v40 }
0x252f   :  { %v2707_v50 = vsel %vm73_vm1, %v2691_v43, 0.0 }
0x2530   :  { %v2703_v16 = vrot.slane %v2702_v48, 2  ;;  %v2708_v28 = vrot.slane %v2707_v50, 4  ;;  %v2687_v53 = vpop.permute.xlu1 %2686  ;;  %v2698_v1 = vrot.slane %v2697_v59, 1 }
0x2531   :  { %v2692_v9 = vmul.f32 %v5639_v54, %v2687_v53 }
0x2532   :  { %v2704_v55 = vadd.f32 %v2703_v16, %v2702_v48  ;;  %v2709_v57 = vadd.f32 %v2708_v28, %v2707_v50  ;;  %v2699_v13 = vadd.f32 %v2698_v1, %v2697_v59 }
0x2533   :  { %v2714_v58 = vsel %vm73_vm1, %v2692_v9, 0.0 }
0x2534   :  { %v2710_v60 = vrot.slane %v2709_v57, 2  ;;  %v2715_v62 = vrot.slane %v2714_v58, 4  ;;  %v2705_v56 = vrot.slane %v2704_v55, 1  ;;  %v2732_v26 = vpop.permute.xlu1 %2731 }
0x2536   :  { %v2711_v20 = vadd.f32 %v2710_v60, %v2709_v57  ;;  %v2716_v27 = vadd.f32 %v2715_v62, %v2714_v58  ;;  %v2706_v8 = vadd.f32 %v2705_v56, %v2704_v55 }
0x2538   :  { %v2712_v44 = vrot.slane %v2711_v20, 1  ;;  %v2717_v3 = vrot.slane %v2716_v27, 2  ;;  %v2727_v15 = vsel %vm342_vm2, %v2706_v8, %v2699_v13  ;;  %v2738_v29 = vpop.permute.xlu1 %2737 }
0x2539   :  { %v2740_v19 = vmul.f32 %v5437_v61, %v2738_v29 }
0x253a   :  { %v2718_v12 = vadd.f32 %v2717_v3, %v2716_v27  ;;  %v2713_v21 = vadd.f32 %v2712_v44, %v2711_v20 }
0x253c   :  { %v2719_v7 = vrot.slane %v2718_v12, 1  ;;  %v2728_v25 = vsel %vm344_vm3, %v2713_v21, %v2727_v15 }
0x253e   :  { %v2720_v63 = vadd.f32 %v2719_v7, %v2718_v12 }
0x2540   :  { %v2729_v24 = vsel %vm346_vm4, %v2720_v63, %v2728_v25  ;;  %v5698_v63 = vld [vmem:[%s5895_s5] ss:$0 sm:$0xff] }
0x2541   :  { %v2734_v23 = vsel %vm73_vm1, %v2729_v24, %v2732_v26 }
0x2542   :  { %4260 = vmatmul.mubr.msk.f32.vlgmr.msra.gmra.mrb[14].mxu0 %vm171_vm6, %v2734_v23 }
0x2543   :  { %4523 = vmatpush3.bf16.msra.mxu0 %v5052_v30  ;;  %4297 = vmatprep.mubr.msk.f32.mxu0 %vm4801_vm0, %v4802_v4 }
0x2544   :  { %4524 = vmatprep.subr.bf16.mxu0 %v4800_v0 }
0x2547   :  { %4526 = vmatpush3.bf16.msra.mxu0 %v5062_v38 }
0x2548   :  { %4527 = vmatprep.subr.bf16.mxu0 %v4800_v0 }
0x254b   :  { %4529 = vmatpush3.bf16.msra.mxu0 %v5072_v42 }
0x254c   :  { %4530 = vmatprep.subr.bf16.mxu0 %v4800_v0 }
0x254f   :  { %4532 = vmatpush3.bf16.msra.mxu0 %v5082_v47 }
0x2550   :  { %4545 = vmatprep.subr.bf16.mxu0 %v4800_v0 }
0x2615   :  { %v2810_v35 = vpop.f32.mrb[14].mxu0 }
0x2616   :  { %v2811_v40 = vadd.f32 %v2810_v35, %v2740_v19  ;;  %v4261_v49 = vpop.f32.mrb[15].mxu0 }
0x2618   :  { %v2814_v39 = vadd.f32 %v5443_v6, %v2811_v40 }
0x261a   :  { %4726 = vtanh.f32 %v2814_v39  ;;  %v3849_v48 = vmul.f32 -1.442695, %v2814_v39 }
0x261c   :  { %4728 = vpow2.f32 %v3849_v48 }
0x2624   :  { %v4727_v43 = vpop.eup %4726 }
0x2625   :  { %2824 = vrot.lane.b32.xlu1 %v4727_v43, %s4805_s30 }
0x2626   :  { %v4729_v50 = vpop.eup %4728 }
0x2627   :  { %v2818_v36 = vadd.f32 1.0, %v4729_v50 }
0x2629   :  { %4730 = vrcp.f32 %v2818_v36 }
0x2633   :  { %v4731_v16 = vpop.eup %4730 }
0x2634   :  { %v2822_v61 = vmul.f32 %v4731_v16, %v5546_v2 }
0x2697   :  { %v2825_v28 = vpop.permute.xlu1 %2824 }
0x2698   :  { %v2827_v53 = vmul.f32 %v4731_v16, %v2825_v28 }
0x269a   :  { %2829 = vrot.lane.b32.xlu1 %v2827_v53, %s4806_s12 }
0x270c   :  { %v2830_v9 = vpop.permute.xlu1 %2829 }
0x270d   :  { %v5663_v55 = vadd.f32 %v2830_v9, %v2822_v61 }
0x270f   :  { %4732 = vtanh.f32 %v5663_v55 }
0x2719   :  { %v4733_v6 = vpop.eup %4732 }
0x271a   :  { %2835 = vrot.lane.b32.xlu0 %v4733_v6, %s4805_s30 }
0x278c   :  { %v2836_v57 = vpop.permute.xlu0 %2835 }
0x278d   :  { %v5667_v58 = vmul.f32 %v4731_v16, %v2836_v57 }
0x278f   :  { %2840 = vrot.lane.b32.xlu1 %v5667_v58, %s4806_s12 }
0x2801   :  { %v2841_v59 = vpop.permute.xlu1 %2840 }
0x2802   :  { %v2843_v60 = vsel %vm73_vm1, %v2841_v59, %v5663_v55 }
0x2803   :  { %4279 = vmatmul.mubr.msk.f32.vlgmr.msra.gmra.mrb[12].mxu1 %vm171_vm6, %v2843_v60 }
0x2804   :  { %4535 = vmatpush3.bf16.msra.mxu1 %v4879_v5  ;;  %4316 = vmatprep.mubr.msk.f32.mxu1 %vm4801_vm0, %v4802_v4 }
0x2805   :  { %4536 = vmatprep.subr.bf16.mxu1 %v4800_v0 }
0x2808   :  { %4538 = vmatpush3.bf16.msra.mxu1 %v4894_v11 }
0x2809   :  { %4539 = vmatprep.subr.bf16.mxu1 %v4800_v0 }
0x280c   :  { %4541 = vmatpush3.bf16.msra.mxu1 %v4914_v17 }
0x280d   :  { %4542 = vmatprep.subr.bf16.mxu1 %v4800_v0 }
0x2810   :  { %4544 = vmatpush3.bf16.msra.mxu1 %v4935_v22 }
0x2811   :  { %4557 = vmatprep.subr.bf16.mxu1 %v4800_v0 }
0x28d6   :  { %v2913_v2 = vpop.f32.mrb[12].mxu1 }
0x28d7   :  { %v2924_v5 = vrot.slane %v2913_v2, %v4967_v31  ;;  %v4280_v62 = vpop.f32.mrb[13].mxu1 }
0x28d9   :  { %v2925_v56 = vcombine.high %v2924_v5, %v2924_v5  ;;  %v2932_v20 = vrot.slane %v2924_v5, %v4967_v31 }
0x28db   :  { %v2939_v27 = vrot.slane %v2925_v56, %v4967_v31  ;;  %v2940_v11 = vcombine.high %v2932_v20, %v2932_v20  ;;  %v2945_v1 = vrot.slane %v2932_v20, %v4974_v37 }
0x28dd   :  { %v2941_v44 = vcombine.high %v2939_v27, %v2939_v27  ;;  %v2949_v17 = vrot.slane %v2939_v27, %v4974_v37  ;;  %v2953_v3 = vrot.slane %v2940_v11, %v4974_v37  ;;  %v2962_v22 = vadd.f32 %v2945_v1, %v4977_v41 }
0x28df   :  { %v2957_v8 = vrot.slane %v2941_v44, %v4974_v37  ;;  %v2963_v12 = vadd.f32 %v2949_v17, %v4983_v46  ;;  %v2964_v21 = vadd.f32 %v2953_v3, %v4981_v45  ;;  %4734 = vtanh.f32 %v2962_v22 }
0x28e1   :  { %v2965_v13 = vadd.f32 %v2957_v8, %v4988_v51  ;;  %4736 = vtanh.f32 %v2963_v12 }
0x28e2   :  { %4738 = vtanh.f32 %v2964_v21 }
0x28e3   :  { %4740 = vtanh.f32 %v2965_v13 }
0x28e9   :  { %v4735_v7 = vpop.eup %4734 }
0x28ea   :  { %v2970_v15 = vmul.f32 %v5698_v63, %v4735_v7 }
0x28eb   :  { %v4737_v25 = vpop.eup %4736 }
0x28ec   :  { %v4739_v24 = vpop.eup %4738  ;;  %v2974_v26 = vsel %vm73_vm1, %v2970_v15, 0.0  ;;  %v2971_v23 = vmul.f32 %v5698_v63, %v4737_v25 }
0x28ed   :  { %v4741_v29 = vpop.eup %4740  ;;  %2975 = vadd.xlane.f32.xlu1 %v2974_v26  ;;  %v2972_v19 = vmul.f32 %v5698_v63, %v4739_v24 }
0x28ee   :  { %v2977_v35 = vsel %vm73_vm1, %v2971_v23, 0.0  ;;  %v2973_v49 = vmul.f32 %v5698_v63, %v4741_v29 }
0x28ef   :  { %2978 = vadd.xlane.f32.xlu0 %v2977_v35  ;;  %v2980_v40 = vsel %vm73_vm1, %v2972_v19, 0.0 }
0x28f0   :  { %v2983_v39 = vsel %vm73_vm1, %v2973_v49, 0.0 }
0x28f1   :  { %2981 = vadd.xlane.f32.xlu1 %v2980_v40 }
0x28f5   :  { %2984 = vadd.xlane.f32.xlu1 %v2983_v39 }
0x297a   :  { %v2976_v43 = vpop.xlane.xlu1 %2975 }
0x297b   :  { %v2993_v16 = vrot.slane %v2976_v43, %v5008_v10 }
0x297c   :  { %v2979_v48 = vpop.xlane.xlu0 %2978 }
0x297d   :  { %v2997_v50 = vrot.slane %v2979_v48, %v5008_v10 }
0x297e   :  { %v2982_v36 = vpop.xlane.xlu1 %2981 }
0x297f   :  { %v3001_v28 = vrot.slane %v2982_v36, %v5008_v10  ;;  %v3006_v53 = vsel %vm342_vm2, %v2997_v50, %v2993_v16 }
0x2981   :  { %v3007_v6 = vsel %vm344_vm3, %v3001_v28, %v3006_v53 }
0x2982   :  { %v2985_v61 = vpop.xlane.xlu1 %2984 }
0x2983   :  { %v3005_v9 = vrot.slane %v2985_v61, %v5008_v10 }
0x2985   :  { %v3008_v57 = vsel %vm346_vm4, %v3005_v9, %v3007_v6 }
0x2986   :  { %v3010_v59 = vsel %vm349_vm5, %v3008_v57, -inf  ;;  %v3851_v57 = vld [vmem:[%s5896_s1 + $0x18] sm:$0xf] }
0x2987   :  { %3011 = vmax.xlane.f32.xlu1 %v3010_v59 }
0x2a14   :  { %v3012_v60 = vpop.xlane.xlu1 %3011 }
0x2a15   :  { %v3017_v2 = vrot.slane %v3012_v60, %v4974_v37  ;;  %v3021_v5 = vrot.slane %v3012_v60, %v5019_v32  ;;  %v3025_v62 = vrot.slane %v3012_v60, %v5022_v33  ;;  %v3029_v56 = vrot.slane %v3012_v60, %v5025_v34 }
0x2a17   :  { %v3034_v20 = vsub.f32 %v2976_v43, %v3017_v2  ;;  %v3035_v27 = vsub.f32 %v2979_v48, %v3021_v5  ;;  %v3037_v11 = vsub.f32 %v2985_v61, %v3029_v56  ;;  %v3036_v1 = vsub.f32 %v2982_v36, %v3025_v62 }
0x2a19   :  { %v3038_v44 = vmul.f32 1.442695, %v3034_v20  ;;  %v3040_v17 = vmul.f32 1.442695, %v3035_v27  ;;  %v3044_v3 = vmul.f32 1.442695, %v3037_v11 }
0x2a1a   :  { %v3042_v22 = vmul.f32 1.442695, %v3036_v1 }
0x2a1b   :  { %4742 = vpow2.f32 %v3038_v44 }
0x2a1c   :  { %4744 = vpow2.f32 %v3040_v17 }
0x2a1d   :  { %4746 = vpow2.f32 %v3044_v3 }
0x2a1e   :  { %4748 = vpow2.f32 %v3042_v22 }
0x2a25   :  { %v4743_v8 = vpop.eup %4742 }
0x2a26   :  { %v4745_v12 = vpop.eup %4744  ;;  %3051 = vperm.xlu0 %4577, %v4743_v8  }
0x2a27   :  { %3054 = vperm.xlu1 %4576, %v4745_v12   ;;  %v4747_v21 = vpop.eup %4746 }
0x2a28   :  { %v4749_v13 = vpop.eup %4748 }
0x2a2a   :  { %3060 = vperm.xlu0 %4577, %v4747_v21  }
0x2a2b   :  { %3057 = vperm.xlu1 %4576, %v4749_v13  }
0x2aa5   :  { %v3052_v7 = vpop.permute.xlu0 %3051 }
0x2aa6   :  { %v3055_v15 = vpop.permute.xlu1 %3054  ;;  %v3065_v24 = vrot.slane %v3052_v7, %v5008_v10 }
0x2aa7   :  { %v3069_v25 = vrot.slane %v3055_v15, %v5008_v10 }
0x2aa9   :  { %v3061_v26 = vpop.permute.xlu0 %3060  ;;  %v3078_v35 = vsel %vm342_vm2, %v3069_v25, %v3065_v24 }
0x2aaa   :  { %v3058_v23 = vpop.permute.xlu1 %3057  ;;  %v3077_v29 = vrot.slane %v3061_v26, %v5008_v10 }
0x2aab   :  { %v3073_v19 = vrot.slane %v3058_v23, %v5008_v10 }
0x2aad   :  { %v3079_v40 = vsel %vm344_vm3, %v3073_v19, %v3078_v35 }
0x2aae   :  { %v3080_v49 = vsel %vm346_vm4, %v3077_v29, %v3079_v40 }
0x2aaf   :  { %v3082_v39 = vsel %vm349_vm5, %v3080_v49, 0.0 }
0x2ab0   :  { %3083 = vadd.xlane.f32.xlu1 %v3082_v39 }
0x2b3d   :  { %v3084_v43 = vpop.xlane.xlu1 %3083 }
0x2b3e   :  { %4750 = vrcp.f32 %v3084_v43 }
0x2b48   :  { %v4751_v48 = vpop.eup %4750 }
0x2b49   :  { %v3090_v50 = vrot.slane %v4751_v48, %v4974_v37  ;;  %v3094_v16 = vrot.slane %v4751_v48, %v5019_v32  ;;  %v3098_v53 = vrot.slane %v4751_v48, %v5022_v33  ;;  %v3102_v9 = vrot.slane %v4751_v48, %v5025_v34 }
0x2b4b   :  { %v3107_v36 = vmul.f32 %v4743_v8, %v3090_v50  ;;  %v3108_v28 = vmul.f32 %v4745_v12, %v3094_v16  ;;  %v3109_v61 = vmul.f32 %v4749_v13, %v3098_v53  ;;  %v3110_v6 = vmul.f32 %v4747_v21, %v3102_v9 }
0x2b4d   :  { %3113 = vperm.xlu0 %4577, %v3107_v36  }
0x2b51   :  { %3118 = vperm.xlu0 %4577, %v3108_v28  }
0x2b55   :  { %3123 = vperm.xlu0 %4577, %v3109_v61  }
0x2b59   :  { %3128 = vperm.xlu0 %4577, %v3110_v6  }
0x2b5d   :  { %3173 = vrot.lane.b32.xlu0 %v5667_v58, %s4805_s30 }
0x2b61   :  { %3179 = vperm.xlu0 %4577, %v3851_v57  }
0x2bcc   :  { %v3114_v59 = vpop.permute.xlu0 %3113 }
0x2bcd   :  { %v3131_v60 = vmul.f32 %v5618_v18, %v3114_v59 }
0x2bcf   :  { %v3135_v2 = vsel %vm73_vm1, %v3131_v60, 0.0 }
0x2bd0   :  { %v3136_v5 = vrot.slane %v3135_v2, 4  ;;  %v3119_v62 = vpop.permute.xlu0 %3118 }
0x2bd1   :  { %v3132_v56 = vmul.f32 %v5625_v14, %v3119_v62 }
0x2bd2   :  { %v3137_v27 = vadd.f32 %v3136_v5, %v3135_v2 }
0x2bd3   :  { %v3142_v20 = vsel %vm73_vm1, %v3132_v56, 0.0 }
0x2bd4   :  { %v3143_v11 = vrot.slane %v3142_v20, 4  ;;  %v3124_v1 = vpop.permute.xlu0 %3123  ;;  %v3138_v3 = vrot.slane %v3137_v27, 2 }
0x2bd5   :  { %v3133_v58 = vmul.f32 %v5632_v52, %v3124_v1 }
0x2bd6   :  { %v3144_v44 = vadd.f32 %v3143_v11, %v3142_v20  ;;  %v3139_v25 = vadd.f32 %v3138_v3, %v3137_v27 }
0x2bd7   :  { %v3149_v17 = vsel %vm73_vm1, %v3133_v58, 0.0 }
0x2bd8   :  { %v3145_v22 = vrot.slane %v3144_v44, 2  ;;  %v3150_v8 = vrot.slane %v3149_v17, 4  ;;  %v3129_v12 = vpop.permute.xlu0 %3128  ;;  %v3140_v35 = vrot.slane %v3139_v25, 1 }
0x2bd9   :  { %v3134_v21 = vmul.f32 %v5639_v54, %v3129_v12 }
0x2bda   :  { %v3146_v13 = vadd.f32 %v3145_v22, %v3144_v44  ;;  %v3151_v7 = vadd.f32 %v3150_v8, %v3149_v17  ;;  %v3141_v50 = vadd.f32 %v3140_v35, %v3139_v25 }
0x2bdb   :  { %v3156_v15 = vsel %vm73_vm1, %v3134_v21, 0.0 }
0x2bdc   :  { %v3152_v24 = vrot.slane %v3151_v7, 2  ;;  %v3157_v26 = vrot.slane %v3156_v15, 4  ;;  %v3147_v23 = vrot.slane %v3146_v13, 1  ;;  %v3174_v9 = vpop.permute.xlu0 %3173 }
0x2bde   :  { %v3153_v29 = vadd.f32 %v3152_v24, %v3151_v7  ;;  %v3158_v19 = vadd.f32 %v3157_v26, %v3156_v15  ;;  %v3148_v39 = vadd.f32 %v3147_v23, %v3146_v13 }
0x2be0   :  { %v3154_v40 = vrot.slane %v3153_v29, 1  ;;  %v3159_v49 = vrot.slane %v3158_v19, 2  ;;  %v3169_v28 = vsel %vm342_vm2, %v3148_v39, %v3141_v50  ;;  %v3180_v57 = vpop.permute.xlu0 %3179 }
0x2be2   :  { %v3160_v43 = vadd.f32 %v3159_v49, %v3158_v19  ;;  %v3155_v48 = vadd.f32 %v3154_v40, %v3153_v29 }
0x2be4   :  { %v3161_v36 = vrot.slane %v3160_v43, 1  ;;  %v3170_v53 = vsel %vm344_vm3, %v3155_v48, %v3169_v28 }
0x2be6   :  { %v3162_v16 = vadd.f32 %v3161_v36, %v3160_v43 }
0x2be8   :  { %v3171_v61 = vsel %vm346_vm4, %v3162_v16, %v3170_v53 }
0x2be9   :  { %v3176_v6 = vsel %vm73_vm1, %v3171_v61, %v3174_v9 }
0x2bea   :  { %4298 = vmatmul.mubr.msk.f32.vlgmr.msra.gmra.mrb[16].mxu0 %vm171_vm6, %v3176_v6 }
0x2beb   :  { %4547 = vmatpush3.bf16.msra.mxu0 %v5052_v30  ;;  %4335 = vmatprep.mubr.msk.f32.mxu0 %vm4801_vm0, %v4802_v4  ;;  %v5762_v30 = vld [vmem:[%s5898_s7] ss:$0 sm:$0xff] }
0x2bec   :  { %4548 = vmatprep.subr.bf16.mxu0 %v4800_v0  ;;  %v3182_v59 = vmul.f32 %v5762_v30, %v3180_v57 }
0x2bef   :  { %4550 = vmatpush3.bf16.msra.mxu0 %v5062_v38  ;;  %v5768_v38 = vld [vmem:[%s5899_s8] ss:$0 sm:$0xff] }
0x2bf0   :  { %4551 = vmatprep.subr.bf16.mxu0 %v4800_v0 }
0x2bf3   :  { %4553 = vmatpush3.bf16.msra.mxu0 %v5072_v42 }
0x2bf4   :  { %4554 = vmatprep.subr.bf16.mxu0 %v4800_v0 }
0x2bf7   :  { %4556 = vmatpush3.bf16.msra.mxu0 %v5082_v47 }
0x2cbd   :  { %v3252_v60 = vpop.f32.mrb[16].mxu0 }
0x2cbe   :  { %v3253_v2 = vadd.f32 %v3252_v60, %v3182_v59  ;;  %v4299_v5 = vpop.f32.mrb[17].mxu0 }
0x2cc0   :  { %v3256_v42 = vadd.f32 %v5768_v38, %v3253_v2 }
0x2cc2   :  { %4752 = vtanh.f32 %v3256_v42  ;;  %v3853_v62 = vmul.f32 -1.442695, %v3256_v42 }
0x2cc4   :  { %4754 = vpow2.f32 %v3853_v62 }
0x2ccc   :  { %v4753_v47 = vpop.eup %4752 }
0x2ccd   :  { %3266 = vrot.lane.b32.xlu0 %v4753_v47, %s4805_s30 }
0x2cce   :  { %v4755_v56 = vpop.eup %4754 }
0x2ccf   :  { %v3260_v20 = vadd.f32 1.0, %v4755_v56 }
0x2cd1   :  { %4756 = vrcp.f32 %v3260_v20 }
0x2cdb   :  { %v4757_v27 = vpop.eup %4756 }
0x2cdc   :  { %v3264_v58 = vmul.f32 %v4757_v27, %v5663_v55 }
0x2d3f   :  { %v3267_v11 = vpop.permute.xlu0 %3266 }
0x2d40   :  { %v3269_v1 = vmul.f32 %v4757_v27, %v3267_v11 }
0x2d42   :  { %3271 = vrot.lane.b32.xlu0 %v3269_v1, %s4806_s12 }
0x2db4   :  { %v3272_v44 = vpop.permute.xlu0 %3271 }
0x2db5   :  { %v5774_v17 = vadd.f32 %v3272_v44, %v3264_v58 }
0x2db7   :  { %4758 = vtanh.f32 %v5774_v17 }
0x2dc1   :  { %v4759_v3 = vpop.eup %4758 }
0x2dc2   :  { %3277 = vrot.lane.b32.xlu0 %v4759_v3, %s4805_s30 }
0x2e34   :  { %v3278_v22 = vpop.permute.xlu0 %3277 }
0x2e35   :  { %v5778_v8 = vmul.f32 %v4757_v27, %v3278_v22 }
0x2e37   :  { %3282 = vrot.lane.b32.xlu1 %v5778_v8, %s4806_s12 }
0x2ea9   :  { %v3283_v12 = vpop.permute.xlu1 %3282 }
0x2eaa   :  { %v3285_v21 = vsel %vm73_vm1, %v3283_v12, %v5774_v17 }
0x2eab   :  { %4317 = vmatmul.mubr.msk.f32.vlgmr.msra.gmra.mrb[14].mxu1 %vm171_vm6, %v3285_v21 }
0x2eac   :  { %4354 = vmatprep.mubr.msk.f32.mxu1 %vm4801_vm0, %v4802_v4 }
0x2f7e   :  { %v3355_v55 = vpop.f32.mrb[14].mxu1 }
0x2f7f   :  { %v3366_v13 = vrot.slane %v3355_v55, %v4967_v31  ;;  %v4318_v7 = vpop.f32.mrb[15].mxu1 }
0x2f81   :  { %v3367_v15 = vcombine.high %v3366_v13, %v3366_v13  ;;  %v3374_v25 = vrot.slane %v3366_v13, %v4967_v31 }
0x2f83   :  { %v3381_v24 = vrot.slane %v3367_v15, %v4967_v31  ;;  %v3382_v26 = vcombine.high %v3374_v25, %v3374_v25  ;;  %v3387_v23 = vrot.slane %v3374_v25, %v4974_v37 }
0x2f85   :  { %v3383_v29 = vcombine.high %v3381_v24, %v3381_v24  ;;  %v3391_v19 = vrot.slane %v3381_v24, %v4974_v37  ;;  %v3395_v35 = vrot.slane %v3382_v26, %v4974_v37  ;;  %v3404_v40 = vadd.f32 %v3387_v23, %v4977_v41 }
0x2f87   :  { %v3399_v4 = vrot.slane %v3383_v29, %v4974_v37  ;;  %v3405_v49 = vadd.f32 %v3391_v19, %v4983_v46  ;;  %v3406_v39 = vadd.f32 %v3395_v35, %v4981_v45  ;;  %4760 = vtanh.f32 %v3404_v40 }
0x2f89   :  { %v3407_v43 = vadd.f32 %v3399_v4, %v4988_v51  ;;  %4762 = vtanh.f32 %v3405_v49 }
0x2f8a   :  { %4764 = vtanh.f32 %v3406_v39 }
0x2f8b   :  { %4766 = vtanh.f32 %v3407_v43 }
0x2f91   :  { %v4761_v31 = vpop.eup %4760 }
0x2f92   :  { %v3412_v48 = vmul.f32 %v5698_v63, %v4761_v31 }
0x2f93   :  { %v4763_v50 = vpop.eup %4762 }
0x2f94   :  { %v4765_v36 = vpop.eup %4764  ;;  %v3416_v16 = vsel %vm73_vm1, %v3412_v48, 0.0  ;;  %v3413_v41 = vmul.f32 %v5698_v63, %v4763_v50 }
0x2f95   :  { %v4767_v28 = vpop.eup %4766  ;;  %3417 = vadd.xlane.f32.xlu0 %v3416_v16  ;;  %v3414_v46 = vmul.f32 %v5698_v63, %v4765_v36 }
0x2f96   :  { %v3419_v45 = vsel %vm73_vm1, %v3413_v41, 0.0  ;;  %v3415_v53 = vmul.f32 %v5698_v63, %v4767_v28 }
0x2f97   :  { %3420 = vadd.xlane.f32.xlu1 %v3419_v45  ;;  %v3422_v51 = vsel %vm73_vm1, %v3414_v46, 0.0 }
0x2f98   :  { %v3425_v61 = vsel %vm73_vm1, %v3415_v53, 0.0 }
0x2f99   :  { %3423 = vadd.xlane.f32.xlu0 %v3422_v51 }
0x2f9d   :  { %3426 = vadd.xlane.f32.xlu0 %v3425_v61 }
0x3022   :  { %v3418_v9 = vpop.xlane.xlu0 %3417 }
0x3023   :  { %v3435_v60 = vrot.slane %v3418_v9, %v5008_v10 }
0x3024   :  { %v3421_v6 = vpop.xlane.xlu1 %3420 }
0x3025   :  { %v3439_v57 = vrot.slane %v3421_v6, %v5008_v10 }
0x3026   :  { %v3424_v59 = vpop.xlane.xlu0 %3423 }
0x3027   :  { %v3443_v2 = vrot.slane %v3424_v59, %v5008_v10  ;;  %v3448_v5 = vsel %vm342_vm2, %v3439_v57, %v3435_v60 }
0x3029   :  { %v3449_v63 = vsel %vm344_vm3, %v3443_v2, %v3448_v5 }
0x302a   :  { %v3427_v42 = vpop.xlane.xlu0 %3426 }
0x302b   :  { %v3447_v47 = vrot.slane %v3427_v42, %v5008_v10 }
0x302d   :  { %v3450_v62 = vsel %vm346_vm4, %v3447_v47, %v3449_v63 }
0x302e   :  { %v3452_v56 = vsel %vm349_vm5, %v3450_v62, -inf }
0x302f   :  { %3453 = vmax.xlane.f32.xlu0 %v3452_v56 }
0x30bc   :  { %v3454_v20 = vpop.xlane.xlu0 %3453 }
0x30bd   :  { %v3459_v27 = vrot.slane %v3454_v20, %v4974_v37  ;;  %v3463_v11 = vrot.slane %v3454_v20, %v5019_v32  ;;  %v3467_v1 = vrot.slane %v3454_v20, %v5022_v33  ;;  %v3471_v58 = vrot.slane %v3454_v20, %v5025_v34 }
0x30bf   :  { %v3476_v44 = vsub.f32 %v3418_v9, %v3459_v27  ;;  %v3477_v3 = vsub.f32 %v3421_v6, %v3463_v11  ;;  %v3478_v22 = vsub.f32 %v3424_v59, %v3467_v1  ;;  %v3479_v12 = vsub.f32 %v3427_v42, %v3471_v58 }
0x30c1   :  { %v3480_v21 = vmul.f32 1.442695, %v3476_v44  ;;  %v3482_v55 = vmul.f32 1.442695, %v3477_v3  ;;  %v3484_v13 = vmul.f32 1.442695, %v3478_v22 }
0x30c2   :  { %v3486_v7 = vmul.f32 1.442695, %v3479_v12 }
0x30c3   :  { %4768 = vpow2.f32 %v3480_v21 }
0x30c4   :  { %4770 = vpow2.f32 %v3482_v55 }
0x30c5   :  { %4772 = vpow2.f32 %v3484_v13 }
0x30c6   :  { %4774 = vpow2.f32 %v3486_v7 }
0x30cd   :  { %v4769_v15 = vpop.eup %4768 }
0x30ce   :  { %v4771_v25 = vpop.eup %4770  ;;  %3493 = vperm.xlu0 %4577, %v4769_v15  }
0x30cf   :  { %3496 = vperm.xlu1 %4576, %v4771_v25   ;;  %v4773_v24 = vpop.eup %4772 }
0x30d0   :  { %v4775_v26 = vpop.eup %4774 }
0x30d2   :  { %3499 = vperm.xlu0 %4577, %v4773_v24  }
0x30d3   :  { %3502 = vperm.xlu1 %4576, %v4775_v26  }
0x314d   :  { %v3494_v23 = vpop.permute.xlu0 %3493 }
0x314e   :  { %v3497_v29 = vpop.permute.xlu1 %3496  ;;  %v3507_v35 = vrot.slane %v3494_v23, %v5008_v10 }
0x314f   :  { %v3511_v19 = vrot.slane %v3497_v29, %v5008_v10 }
0x3151   :  { %v3500_v40 = vpop.permute.xlu0 %3499  ;;  %v3520_v39 = vsel %vm342_vm2, %v3511_v19, %v3507_v35 }
0x3152   :  { %v3503_v4 = vpop.permute.xlu1 %3502  ;;  %v3515_v49 = vrot.slane %v3500_v40, %v5008_v10 }
0x3153   :  { %v3519_v43 = vrot.slane %v3503_v4, %v5008_v10 }
0x3154   :  { %v3521_v31 = vsel %vm344_vm3, %v3515_v49, %v3520_v39 }
0x3155   :  { %v3522_v48 = vsel %vm346_vm4, %v3519_v43, %v3521_v31 }
0x3156   :  { %v3524_v50 = vsel %vm349_vm5, %v3522_v48, 0.0 }
0x3157   :  { %3525 = vadd.xlane.f32.xlu0 %v3524_v50 }
0x31e4   :  { %v3526_v36 = vpop.xlane.xlu0 %3525 }
0x31e5   :  { %4776 = vrcp.f32 %v3526_v36 }
0x31ef   :  { %v4777_v16 = vpop.eup %4776 }
0x31f0   :  { %v3532_v41 = vrot.slane %v4777_v16, %v4974_v37  ;;  %v3536_v46 = vrot.slane %v4777_v16, %v5019_v32  ;;  %v3540_v51 = vrot.slane %v4777_v16, %v5022_v33  ;;  %v3544_v53 = vrot.slane %v4777_v16, %v5025_v34  ;;  %v3855_v37 = vld [vmem:[%s5896_s1 + $0x1c] sm:$0xf] }
0x31f2   :  { %v3549_v28 = vmul.f32 %v4769_v15, %v3532_v41  ;;  %v3550_v45 = vmul.f32 %v4771_v25, %v3536_v46  ;;  %v3551_v10 = vmul.f32 %v4773_v24, %v3540_v51  ;;  %v3552_v61 = vmul.f32 %v4775_v26, %v3544_v53  ;;  %v3733_v53 = vld [vmem:[%s5900_s9 + $0x10] sm:$0xff] }
0x31f4   :  { %3555 = vperm.xlu1 %4576, %v3549_v28  }
0x31f8   :  { %3560 = vperm.xlu1 %4576, %v3550_v45  }
0x31fc   :  { %3565 = vperm.xlu1 %4576, %v3551_v10   ;;  %v3732_v10 = vld [vmem:[%s5900_s9 + $0x8] sm:$0xff] }
0x3200   :  { %3570 = vperm.xlu1 %4576, %v3552_v61  }
0x3204   :  { %3615 = vrot.lane.b32.xlu1 %v5778_v8, %s4805_s30 }
0x3208   :  { %3621 = vperm.xlu1 %4576, %v3855_v37  }
0x3273   :  { %v3556_v32 = vpop.permute.xlu1 %3555 }
0x3274   :  { %v3573_v9 = vmul.f32 %v5618_v18, %v3556_v32  ;;  %v3735_v32 = vld [vmem:[%s5900_s9 + $0x20] sm:$0xff] }
0x3276   :  { %v3577_v33 = vsel %vm73_vm1, %v3573_v9, 0.0  ;;  %v3736_v9 = vld [vmem:[%s5900_s9 + $0x28] sm:$0xff] }
0x3277   :  { %v3578_v6 = vrot.slane %v3577_v33, 4  ;;  %v3561_v57 = vpop.permute.xlu1 %3560 }
0x3278   :  { %v3574_v34 = vmul.f32 %v5625_v14, %v3561_v57  ;;  %v3737_v57 = vld [vmem:[%s5900_s9 + $0x30] sm:$0xff] }
0x3279   :  { %v3579_v60 = vadd.f32 %v3578_v6, %v3577_v33  ;;  %v4564_v6 = vpack.c.bf16 %v3736_v9, %v3735_v32 }
0x327a   :  { %v3584_v59 = vsel %vm73_vm1, %v3574_v34, 0.0  ;;  %v3738_v34 = vld [vmem:[%s5900_s9 + $0x38] sm:$0xff] }
0x327b   :  { %v3585_v2 = vrot.slane %v3584_v59, 4  ;;  %v3566_v5 = vpop.permute.xlu1 %3565  ;;  %v3580_v63 = vrot.slane %v3579_v60, 2 }
0x327c   :  { %v3575_v8 = vmul.f32 %v5632_v52, %v3566_v5 }
0x327d   :  { %v3586_v42 = vadd.f32 %v3585_v2, %v3584_v59  ;;  %v3581_v1 = vadd.f32 %v3580_v63, %v3579_v60  ;;  %v4567_v59 = vpack.c.bf16 %v3738_v34, %v3737_v57 }
0x327e   :  { %v3591_v47 = vsel %vm73_vm1, %v3575_v8, 0.0 }
0x327f   :  { %v3587_v62 = vrot.slane %v3586_v42, 2  ;;  %v3592_v56 = vrot.slane %v3591_v47, 4  ;;  %v3571_v18 = vpop.permute.xlu1 %3570  ;;  %v3582_v52 = vrot.slane %v3581_v1, 1 }
0x3280   :  { %v3576_v20 = vmul.f32 %v5639_v54, %v3571_v18 }
0x3281   :  { %v3588_v27 = vadd.f32 %v3587_v62, %v3586_v42  ;;  %v3593_v11 = vadd.f32 %v3592_v56, %v3591_v47  ;;  %v3583_v25 = vadd.f32 %v3582_v52, %v3581_v1  ;;  %v3740_v42 = vstv %s5901_s10 }
0x3282   :  { %v3598_v14 = vsel %vm73_vm1, %v3576_v20, 0.0 }
0x3283   :  { %v3594_v58 = vrot.slane %v3593_v11, 2  ;;  %v3599_v44 = vrot.slane %v3598_v14, 4  ;;  %v3589_v3 = vrot.slane %v3588_v27, 1  ;;  %v3616_v19 = vpop.permute.xlu1 %3615 }
0x3285   :  { %v3595_v22 = vadd.f32 %v3594_v58, %v3593_v11  ;;  %v3600_v12 = vadd.f32 %v3599_v44, %v3598_v14  ;;  %v3590_v13 = vadd.f32 %v3589_v3, %v3588_v27 }
0x3287   :  { %v3596_v21 = vrot.slane %v3595_v22, 1  ;;  %v3601_v55 = vrot.slane %v3600_v12, 2  ;;  %v3611_v54 = vsel %vm342_vm2, %v3590_v13, %v3583_v25  ;;  %v3622_v40 = vpop.permute.xlu1 %3621 }
0x3288   :  { %v3624_v4 = vmul.f32 %v5762_v30, %v3622_v40 }
0x3289   :  { %v3602_v7 = vadd.f32 %v3601_v55, %v3600_v12  ;;  %v3597_v15 = vadd.f32 %v3596_v21, %v3595_v22 }
0x328b   :  { %v3603_v24 = vrot.slane %v3602_v7, 1  ;;  %v3612_v23 = vsel %vm344_vm3, %v3597_v15, %v3611_v54 }
0x328d   :  { %v3604_v26 = vadd.f32 %v3603_v24, %v3602_v7 }
0x328f   :  { %v3613_v29 = vsel %vm346_vm4, %v3604_v26, %v3612_v23 }
0x3290   :  { %v3618_v35 = vsel %vm73_vm1, %v3613_v29, %v3616_v19 }
0x3291   :  { %4336 = vmatmul.mubr.msk.f32.vlgmr.msra.gmra.mrb[18].mxu0 %vm171_vm6, %v3618_v35 }
0x3364   :  { %v3694_v49 = vpop.f32.mrb[18].mxu0 }
0x3365   :  { %v3695_v39 = vadd.f32 %v3694_v49, %v3624_v4  ;;  %v4337_v43 = vpop.f32.mrb[19].mxu0 }
0x3367   :  { %v3698_v31 = vadd.f32 %v5768_v38, %v3695_v39  ;;  %v3731_v38 = vld [vmem:[%s5900_s9] sm:$0xff] }
0x3368   :  { %v4558_v61 = vpack.c.bf16 %v3732_v10, %v3731_v38 }
0x3369   :  { %4778 = vtanh.f32 %v3698_v31  ;;  %v3857_v50 = vmul.f32 -1.442695, %v3698_v31 }
0x336a   :  { %4559 = vmatpush3.bf16.msra.mxu1 %v4558_v61 }
0x336b   :  { %4780 = vpow2.f32 %v3857_v50  ;;  %4560 = vmatprep.subr.bf16.mxu1 %v4800_v0 }
0x3373   :  { %v4779_v48 = vpop.eup %4778 }
0x3374   :  { %3708 = vrot.lane.b32.xlu1 %v4779_v48, %s4805_s30 }
0x3375   :  { %v4781_v36 = vpop.eup %4780 }
0x3376   :  { %v3702_v16 = vadd.f32 1.0, %v4781_v36 }
0x3378   :  { %4782 = vrcp.f32 %v3702_v16 }
0x3382   :  { %v4783_v41 = vpop.eup %4782 }
0x3383   :  { %v3706_v30 = vmul.f32 %v4783_v41, %v5774_v17  ;;  %v3734_v17 = vld [vmem:[%s5900_s9 + $0x18] sm:$0xff] }
0x3384   :  { %v4561_v37 = vpack.c.bf16 %v3734_v17, %v3733_v53 }
0x3386   :  { %4562 = vmatpush3.bf16.msra.mxu1 %v4561_v37 }
0x3387   :  { %4563 = vmatprep.subr.bf16.mxu1 %v4800_v0 }
0x338a   :  { %4565 = vmatpush3.bf16.msra.mxu1 %v4564_v6 }
0x338b   :  { %4566 = vmatprep.subr.bf16.mxu1 %v4800_v0 }
0x338e   :  { %4568 = vmatpush3.bf16.msra.mxu1 %v4567_v59 }
0x33e6   :  { %v3709_v28 = vpop.permute.xlu1 %3708 }
0x33e7   :  { %v3711_v46 = vmul.f32 %v4783_v41, %v3709_v28 }
0x33e9   :  { %3713 = vrot.lane.b32.xlu1 %v3711_v46, %s4806_s12 }
0x345b   :  { %v3714_v45 = vpop.permute.xlu1 %3713 }
0x345c   :  { %v3716_v51 = vadd.f32 %v3714_v45, %v3706_v30 }
0x345e   :  { %4784 = vtanh.f32 %v3716_v51 }
0x3468   :  { %v4785_v33 = vpop.eup %4784 }
0x3469   :  { %3719 = vrot.lane.b32.xlu0 %v4785_v33, %s4805_s30 }
0x34db   :  { %v3720_v60 = vpop.permute.xlu0 %3719 }
0x34dc   :  { %v3722_v2 = vmul.f32 %v4783_v41, %v3720_v60 }
0x34de   :  { %3724 = vrot.lane.b32.xlu1 %v3722_v2, %s4806_s12 }
0x34e2   :  { %3727 = vrot.lane.b32.xlu1 %v3613_v29, %s4806_s12 }
0x3550   :  { %v3725_v5 = vpop.permute.xlu1 %3724 }
0x3554   :  { %v3728_v8 = vpop.permute.xlu1 %3727 }
0x3555   :  { %v3730_v0 = vsel %vm73_vm1, %v3725_v5, %v3728_v8 }
0x3556   :  { %4355 = vmatmul.mubr.msk.f32.vlgmr.msra.gmra.mrb[16].mxu1 %vm171_vm6, %v3730_v0 }
0x3629   :  { %v3810_v47 = vpop.f32.mrb[16].mxu1 }
0x362a   :  { %v3811_v63 = vadd.f32 %v3810_v47, %v3740_v42  ;;  %v4356_v62 = vpop.f32.mrb[17].mxu1 }
0x362c   :  { %3815 = vst.msk [vmem:[%s5902_s11] sm:$0xf] %vm3814_vm7, %v3811_v63 }

</bundles_post_ra>
